<compile_context>
chip_gen: v5e
topology: v5e:2x2
jax: 0.10.0
libtpu: 0.0.40
codegen_flags: <defaults>
</compile_context>

<pallas_src>
import functools

import jax
import jax.numpy as jnp
from jax.experimental import pallas as pl
from jax.experimental.pallas import tpu as pltpu


# --------------------------------------------------------------------------
# Fused kernel: the full RK4 integration in one invocation.
# --------------------------------------------------------------------------
def make_rk4_kernel(num_steps):
    dt = 1.0 / float(num_steps)   # integration over [0, 1]

    def kernel(x0_ref,                      # (n, d_P)     initial condition
               msrcT_ref, mtgtT_ref,        # (m, n)       Msrc^T, Mtgt^T
               mtgt_ref,                    # (n, m)       Mtgt
               w0st_ref,                    # (2*d_P, 150) vstack(W0_src, W0_tgt), bf16
               w0time_ref,                  # (1, 150)     time row of W0
               b0p_ref,                     # (m, 150)     folded per-relation bias
               w1_ref, b1_ref, w2_ref, b2_ref, w3_ref, b3_ref,   # fR hidden (bf16/f32)
               w4_ref, b4_ref,              # fR out: (150,50) bf16, (1,50) f32
               u0_ref, c0_ref, u1_ref, c1_ref,                   # fO (bf16/f32)
               y_ref):                      # (n, d_P)     output
        def mxu(a, w_ref):
            # bf16 MXU operands (weights pre-cast outside), f32 accumulation.
            # Weight read happens at the use site: no long vreg live ranges.
            return jnp.dot(a.astype(jnp.bfloat16), w_ref[...],
                           preferred_element_type=jnp.float32)

        def deriv(t, y):
            # Incidence "gathers" stay f32 (tiny, exact 0/1 matrices).
            gs = jnp.dot(msrcT_ref[...], y, preferred_element_type=jnp.float32)  # (m,d_P)
            gt = jnp.dot(mtgtT_ref[...], y, preferred_element_type=jnp.float32)  # (m,d_P)
            # fR layer 0 with both concats removed algebraically: the constant
            # Ofixed half lives in b0p, the time column is t * w0time; the two
            # x-dependent weight matmuls are merged into one via lane-concat.
            g = jnp.concatenate([gs, gt], axis=1)                  # (m, 2*d_P)
            h = mxu(g, w0st_ref) + t * w0time_ref[...] + b0p_ref[...]
            h = jnp.maximum(h, 0.0)
            # fR hidden layers 2..4 + output; (1,N) biases add via sublane bcast.
            h = jnp.maximum(mxu(h, w1_ref) + b1_ref[...], 0.0)
            h = jnp.maximum(mxu(h, w2_ref) + b2_ref[...], 0.0)
            h = jnp.maximum(mxu(h, w3_ref) + b3_ref[...], 0.0)
            E = mxu(h, w4_ref) + b4_ref[...]                       # (m, d_E)
            # E' = Mtgt @ E, then fO MLP.
            Ep = jnp.dot(mtgt_ref[...], E, preferred_element_type=jnp.float32)   # (n,d_E)
            h2 = jnp.maximum(mxu(Ep, u0_ref) + c0_ref[...], 0.0)
            return mxu(h2, u1_ref) + c1_ref[...]                   # (n, d_P)

        def step_body(i, y):
            t = i.astype(jnp.float32) * dt
            k1 = deriv(t, y)
            k2 = deriv(t + 0.5 * dt, y + (0.5 * dt) * k1)
            k3 = deriv(t + 0.5 * dt, y + (0.5 * dt) * k2)
            k4 = deriv(t + dt, y + dt * k3)
            return y + (dt / 6.0) * (k1 + 2.0 * k2 + 2.0 * k3 + k4)

        y_ref[...] = jax.lax.fori_loop(0, num_steps, step_body, x0_ref[...])

    return kernel


# --------------------------------------------------------------------------
# Parameter construction (deterministic, matches the module's shapes)
# --------------------------------------------------------------------------
def init_params(key, d_O, d_P):
    # Module constants (IN_ODEfunc.__init__): d_R = d_X = 0, d_E = 50,
    # d_E_hidden = 150 (x4), d_P_hidden = 100.
    d_E, d_E_hidden, d_P_hidden = 50, 150, 100
    fR_dims = [2 * d_O + 1] + 4 * [d_E_hidden] + [d_E]   # 13->150x4->50
    fO_dims = [d_E, d_P_hidden, d_P]                      # 50->100->d_P

    params = []
    for dims in (fR_dims, fO_dims):
        for d_i, d_o in zip(dims[:-1], dims[1:]):
            key, kw, kb = jax.random.split(key, 3)
            scale = 1.0 / jnp.sqrt(jnp.float32(d_i))
            # stored (in, out): kernel computes h @ W + b
            W = jax.random.uniform(kw, (d_i, d_o), jnp.float32, -scale, scale)
            b = jax.random.uniform(kb, (1, d_o), jnp.float32, -scale, scale)
            params += [W, b]
    return params   # flat list: w0,b0,...,w4,b4, u0,c0,u1,c1  (14 arrays)


# --------------------------------------------------------------------------
# Wrapper: folds constants, builds the single fused pallas_call
# --------------------------------------------------------------------------
def in_ode_forward(O, Msrc, Mtgt, params, d_P, num_steps=32):
    n, d_O = O.shape
    (w0, b0, w1, b1, w2, b2, w3, b3, w4, b4, u0, c0, u1, c1) = params

    Ohead = O[:, :d_P]           # integration initial condition  (n, d_P)
    Ofixed = O[:, d_P:]          # fixed tail                     (n, d_O - d_P)
    MsrcT = Msrc.T               # (m, n)
    MtgtT = Mtgt.T               # (m, n)

    hi = jax.lax.Precision.HIGHEST
    # Fold the constant Ofixed half of the incidence matmuls and of fR's first
    # layer into a per-relation bias (computed once, outside the kernel).
    Rsrc_fix = jnp.dot(MsrcT, Ofixed, precision=hi)      # (m, d_O - d_P)
    Rtgt_fix = jnp.dot(MtgtT, Ofixed, precision=hi)      # (m, d_O - d_P)
    # Merge the two x-dependent layer-0 weight blocks into one (2*d_P, 150).
    w0st = jnp.concatenate([w0[:d_P], w0[d_O:d_O + d_P]], axis=0)
    w0_time = w0[2 * d_O:2 * d_O + 1]                    # (1, 150)
    b0p = (b0
           + jnp.dot(Rsrc_fix, w0[d_P:d_O], precision=hi)
           + jnp.dot(Rtgt_fix, w0[d_O + d_P:2 * d_O], precision=hi))   # (m, 150)

    bf16 = jnp.bfloat16          # MXU operands; accumulation stays f32
    operands = (Ohead, MsrcT, MtgtT, Mtgt,
                w0st.astype(bf16), w0_time, b0p,
                w1.astype(bf16), b1, w2.astype(bf16), b2,
                w3.astype(bf16), b3, w4.astype(bf16), b4,
                u0.astype(bf16), c0, u1.astype(bf16), c1)

    def resident_spec(a):
        # Whole array as one VMEM-resident block (DMA'd exactly once).
        return pl.BlockSpec(a.shape, lambda s: (0, 0))

    return pl.pallas_call(
        make_rk4_kernel(num_steps),
        out_shape=jax.ShapeDtypeStruct((n, d_P), jnp.float32),
        grid_spec=pltpu.PrefetchScalarGridSpec(
            num_scalar_prefetch=0,
            grid=(1,),                       # single invocation; RK loop is in-kernel
            in_specs=[resident_spec(a) for a in operands],
            out_specs=pl.BlockSpec((n, d_P), lambda s: (0, 0)),
        ),
        compiler_params=pltpu.CompilerParams(
            dimension_semantics=("arbitrary",)),
    )(*operands)


# --------------------------------------------------------------------------
# Pure-JAX reference of the unfused (concat-based) module math, same RK4.
# --------------------------------------------------------------------------
def in_ode_forward_ref(O, Msrc, Mtgt, params, d_P, num_steps=32):
    (w0, b0, w1, b1, w2, b2, w3, b3, w4, b4, u0, c0, u1, c1) = params
    hi = jax.lax.Precision.HIGHEST
    Ohead, Ofixed = O[:, :d_P], O[:, d_P:]

    def f(t, x):
        Ofull = jnp.concatenate([x, Ofixed], axis=1)
        Rsrc = jnp.dot(Msrc.T, Ofull, precision=hi)
        Rtgt = jnp.dot(Mtgt.T, Ofull, precision=hi)
        tt = jnp.full((Rsrc.shape[0], 1), t, jnp.float32)
        h = jnp.concatenate([Rsrc, Rtgt, tt], axis=1)
        for W, b in ((w0, b0), (w1, b1), (w2, b2), (w3, b3)):
            h = jnp.maximum(jnp.dot(h, W, precision=hi) + b, 0.0)
        E = jnp.dot(h, w4, precision=hi) + b4
        Ep = jnp.dot(Mtgt, E, precision=hi)
        h2 = jnp.maximum(jnp.dot(Ep, u0, precision=hi) + c0, 0.0)
        return jnp.dot(h2, u1, precision=hi) + c1

    dt = 1.0 / num_steps
    y = Ohead
    for i in range(num_steps):
        t = i * dt
        k1 = f(t, y)
        k2 = f(t + 0.5 * dt, y + (0.5 * dt) * k1)
        k3 = f(t + 0.5 * dt, y + (0.5 * dt) * k2)
        k4 = f(t + dt, y + dt * k3)
        y = y + (dt / 6.0) * (k1 + 2.0 * k2 + 2.0 * k3 + k4)
    return y


# --------------------------------------------------------------------------
# Demo
# --------------------------------------------------------------------------
if __name__ == "__main__":
    # Small, module-consistent shapes:
    #   n objects = 8, m relations = 12, d_O = 6, d_P = 4, d_R = d_X = 0
    n, m, d_O, d_P = 8, 12, 6, 4

    key = jax.random.PRNGKey(0)
    k_O, k_s, k_t, k_p = jax.random.split(key, 4)

    O = jax.random.normal(k_O, (n, d_O), jnp.float32)
    # one-hot incidence matrices (source / target of each relation)
    src_idx = jax.random.randint(k_s, (m,), 0, n)
    tgt_idx = jax.random.randint(k_t, (m,), 0, n)
    Msrc = jax.nn.one_hot(src_idx, n, dtype=jnp.float32).T   # (n, m)
    Mtgt = jax.nn.one_hot(tgt_idx, n, dtype=jnp.float32).T   # (n, m)
    # R (m, 0) and X (n, 0) are unused by the forward pass (d_R = d_X = 0).

    params = init_params(k_p, d_O, d_P)

    fwd = jax.jit(functools.partial(in_ode_forward, d_P=d_P, num_steps=32))
    P = fwd(O, Msrc, Mtgt, params)
    jax.block_until_ready(P)

    assert P.shape == (n, d_P) and P.dtype == jnp.float32
    assert bool(jnp.all(jnp.isfinite(P)))

    # Numerical check against the f32 HIGHEST-precision reference trajectory.
    # Kernel matmuls use bf16 MXU operands (f32 accumulation), so allow a
    # slightly looser relative tolerance than pure-f32 would need.
    P_ref = jax.jit(functools.partial(in_ode_forward_ref, d_P=d_P,
                                      num_steps=32))(O, Msrc, Mtgt, params)
    err = float(jnp.max(jnp.abs(P - P_ref)))
    tol = 2e-2 * (1.0 + float(jnp.max(jnp.abs(P_ref))))
    assert err <= tol, f"kernel vs reference mismatch: {err} > {tol}"

    print("KERNEL_OK")
</pallas_src>

<mosaic_0001>
module attributes {stable_mosaic.version = 11 : i64} {
  func.func @kernel(%arg0: i32, %arg1: memref<8x4xf32, #tpu.memory_space<vmem>>, %arg2: memref<12x8xf32, #tpu.memory_space<vmem>>, %arg3: memref<12x8xf32, #tpu.memory_space<vmem>>, %arg4: memref<8x12xf32, #tpu.memory_space<vmem>>, %arg5: memref<8x150xbf16, #tpu.memory_space<vmem>>, %arg6: memref<1x150xf32, #tpu.memory_space<vmem>>, %arg7: memref<12x150xf32, #tpu.memory_space<vmem>>, %arg8: memref<150x150xbf16, #tpu.memory_space<vmem>>, %arg9: memref<1x150xf32, #tpu.memory_space<vmem>>, %arg10: memref<150x150xbf16, #tpu.memory_space<vmem>>, %arg11: memref<1x150xf32, #tpu.memory_space<vmem>>, %arg12: memref<150x150xbf16, #tpu.memory_space<vmem>>, %arg13: memref<1x150xf32, #tpu.memory_space<vmem>>, %arg14: memref<150x50xbf16, #tpu.memory_space<vmem>>, %arg15: memref<1x50xf32, #tpu.memory_space<vmem>>, %arg16: memref<50x100xbf16, #tpu.memory_space<vmem>>, %arg17: memref<1x100xf32, #tpu.memory_space<vmem>>, %arg18: memref<100x4xbf16, #tpu.memory_space<vmem>>, %arg19: memref<1x4xf32, #tpu.memory_space<vmem>>, %arg20: memref<8x4xf32, #tpu.memory_space<vmem>>) attributes {dimension_semantics = [#tpu.dimension_semantics<arbitrary>], iteration_bounds = array<i64: 1>, scalar_prefetch = 0 : i64, scratch_operands = 0 : i64, tpu.core_type = #tpu.core_type<tc>, window_params = [{pipeline_mode = #tpu.pipeline_mode<synchronous>, transform_indices = @transform_0, window_bounds = array<i64: 8, 4>}, {pipeline_mode = #tpu.pipeline_mode<synchronous>, transform_indices = @transform_1, window_bounds = array<i64: 12, 8>}, {pipeline_mode = #tpu.pipeline_mode<synchronous>, transform_indices = @transform_2, window_bounds = array<i64: 12, 8>}, {pipeline_mode = #tpu.pipeline_mode<synchronous>, transform_indices = @transform_3, window_bounds = array<i64: 8, 12>}, {pipeline_mode = #tpu.pipeline_mode<synchronous>, transform_indices = @transform_4, window_bounds = array<i64: 8, 150>}, {pipeline_mode = #tpu.pipeline_mode<synchronous>, transform_indices = @transform_5, window_bounds = array<i64: 1, 150>}, {pipeline_mode = #tpu.pipeline_mode<synchronous>, transform_indices = @transform_6, window_bounds = array<i64: 12, 150>}, {pipeline_mode = #tpu.pipeline_mode<synchronous>, transform_indices = @transform_7, window_bounds = array<i64: 150, 150>}, {pipeline_mode = #tpu.pipeline_mode<synchronous>, transform_indices = @transform_8, window_bounds = array<i64: 1, 150>}, {pipeline_mode = #tpu.pipeline_mode<synchronous>, transform_indices = @transform_9, window_bounds = array<i64: 150, 150>}, {pipeline_mode = #tpu.pipeline_mode<synchronous>, transform_indices = @transform_10, window_bounds = array<i64: 1, 150>}, {pipeline_mode = #tpu.pipeline_mode<synchronous>, transform_indices = @transform_11, window_bounds = array<i64: 150, 150>}, {pipeline_mode = #tpu.pipeline_mode<synchronous>, transform_indices = @transform_12, window_bounds = array<i64: 1, 150>}, {pipeline_mode = #tpu.pipeline_mode<synchronous>, transform_indices = @transform_13, window_bounds = array<i64: 150, 50>}, {pipeline_mode = #tpu.pipeline_mode<synchronous>, transform_indices = @transform_14, window_bounds = array<i64: 1, 50>}, {pipeline_mode = #tpu.pipeline_mode<synchronous>, transform_indices = @transform_15, window_bounds = array<i64: 50, 100>}, {pipeline_mode = #tpu.pipeline_mode<synchronous>, transform_indices = @transform_16, window_bounds = array<i64: 1, 100>}, {pipeline_mode = #tpu.pipeline_mode<synchronous>, transform_indices = @transform_17, window_bounds = array<i64: 100, 4>}, {pipeline_mode = #tpu.pipeline_mode<synchronous>, transform_indices = @transform_18, window_bounds = array<i64: 1, 4>}, {pipeline_mode = #tpu.pipeline_mode<synchronous>, transform_indices = @transform_19, window_bounds = array<i64: 8, 4>}]} {
    %c0 = arith.constant 0 : index
    %c0_0 = arith.constant 0 : index
    %0 = vector.load %arg1[%c0, %c0_0] : memref<8x4xf32, #tpu.memory_space<vmem>>, vector<8x4xf32>
    %c0_i32 = arith.constant 0 : i32
    %c32_i32 = arith.constant 32 : i32
    %1 = arith.addi %c0_i32, %c32_i32 : i32
    %c1_i32 = arith.constant 1 : i32
    %2 = scf.for %arg21 = %c0_i32 to %1 step %c1_i32 iter_args(%arg22 = %0) -> (vector<8x4xf32>)  : i32 {
      %4 = arith.sitofp %arg21 : i32 to f32
      %cst = arith.constant 3.125000e-02 : f32
      %5 = arith.mulf %4, %cst : f32
      %c0_4 = arith.constant 0 : index
      %c0_5 = arith.constant 0 : index
      %6 = vector.load %arg2[%c0_4, %c0_5] : memref<12x8xf32, #tpu.memory_space<vmem>>, vector<12x8xf32>
      %cst_6 = arith.constant dense<0.000000e+00> : vector<12x4xf32>
      %7 = tpu.matmul %6, %arg22, %cst_6 {dimension_numbers = #tpu.dot_dimension_numbers<[1], [0], [0], [1], [0, 0, 1, 1], [], []>} : vector<12x8xf32>, vector<8x4xf32>, vector<12x4xf32> -> vector<12x4xf32>
      %c0_7 = arith.constant 0 : index
      %c0_8 = arith.constant 0 : index
      %8 = vector.load %arg3[%c0_7, %c0_8] : memref<12x8xf32, #tpu.memory_space<vmem>>, vector<12x8xf32>
      %cst_9 = arith.constant dense<0.000000e+00> : vector<12x4xf32>
      %9 = tpu.matmul %8, %arg22, %cst_9 {dimension_numbers = #tpu.dot_dimension_numbers<[1], [0], [0], [1], [0, 0, 1, 1], [], []>} : vector<12x8xf32>, vector<8x4xf32>, vector<12x4xf32> -> vector<12x4xf32>
      %10 = tpu.concatenate %7, %9 in 1 : vector<12x4xf32>, vector<12x4xf32> -> vector<12x8xf32>
      %11 = arith.truncf %10 : vector<12x8xf32> to vector<12x8xbf16>
      %c0_10 = arith.constant 0 : index
      %c0_11 = arith.constant 0 : index
      %12 = vector.load %arg5[%c0_10, %c0_11] : memref<8x150xbf16, #tpu.memory_space<vmem>>, vector<8x150xbf16>
      %cst_12 = arith.constant dense<0.000000e+00> : vector<12x150xf32>
      %13 = tpu.matmul %11, %12, %cst_12 {dimension_numbers = #tpu.dot_dimension_numbers<[1], [0], [0], [1], [0, 0, 1, 1], [], []>} : vector<12x8xbf16>, vector<8x150xbf16>, vector<12x150xf32> -> vector<12x150xf32>
      %c0_13 = arith.constant 0 : index
      %c0_14 = arith.constant 0 : index
      %14 = vector.load %arg6[%c0_13, %c0_14] : memref<1x150xf32, #tpu.memory_space<vmem>>, vector<1x150xf32>
      %15 = vector.broadcast %5 : f32 to vector<1x150xf32>
      %16 = arith.mulf %15, %14 : vector<1x150xf32>
      %17 = vector.broadcast %16 : vector<1x150xf32> to vector<12x150xf32>
      %18 = arith.addf %13, %17 : vector<12x150xf32>
      %c0_15 = arith.constant 0 : index
      %c0_16 = arith.constant 0 : index
      %19 = vector.load %arg7[%c0_15, %c0_16] : memref<12x150xf32, #tpu.memory_space<vmem>>, vector<12x150xf32>
      %20 = arith.addf %18, %19 : vector<12x150xf32>
      %cst_17 = arith.constant 0.000000e+00 : f32
      %21 = vector.broadcast %cst_17 : f32 to vector<12x150xf32>
      %22 = arith.maximumf %20, %21 : vector<12x150xf32>
      %23 = arith.truncf %22 : vector<12x150xf32> to vector<12x150xbf16>
      %c0_18 = arith.constant 0 : index
      %c0_19 = arith.constant 0 : index
      %24 = vector.load %arg8[%c0_18, %c0_19] : memref<150x150xbf16, #tpu.memory_space<vmem>>, vector<150x150xbf16>
      %cst_20 = arith.constant dense<0.000000e+00> : vector<12x150xf32>
      %25 = tpu.matmul %23, %24, %cst_20 {dimension_numbers = #tpu.dot_dimension_numbers<[1], [0], [0], [1], [0, 0, 1, 1], [], []>} : vector<12x150xbf16>, vector<150x150xbf16>, vector<12x150xf32> -> vector<12x150xf32>
      %c0_21 = arith.constant 0 : index
      %c0_22 = arith.constant 0 : index
      %26 = vector.load %arg9[%c0_21, %c0_22] : memref<1x150xf32, #tpu.memory_space<vmem>>, vector<1x150xf32>
      %27 = vector.broadcast %26 : vector<1x150xf32> to vector<12x150xf32>
      %28 = arith.addf %25, %27 : vector<12x150xf32>
      %cst_23 = arith.constant 0.000000e+00 : f32
      %29 = vector.broadcast %cst_23 : f32 to vector<12x150xf32>
      %30 = arith.maximumf %28, %29 : vector<12x150xf32>
      %31 = arith.truncf %30 : vector<12x150xf32> to vector<12x150xbf16>
      %c0_24 = arith.constant 0 : index
      %c0_25 = arith.constant 0 : index
      %32 = vector.load %arg10[%c0_24, %c0_25] : memref<150x150xbf16, #tpu.memory_space<vmem>>, vector<150x150xbf16>
      %cst_26 = arith.constant dense<0.000000e+00> : vector<12x150xf32>
      %33 = tpu.matmul %31, %32, %cst_26 {dimension_numbers = #tpu.dot_dimension_numbers<[1], [0], [0], [1], [0, 0, 1, 1], [], []>} : vector<12x150xbf16>, vector<150x150xbf16>, vector<12x150xf32> -> vector<12x150xf32>
      %c0_27 = arith.constant 0 : index
      %c0_28 = arith.constant 0 : index
      %34 = vector.load %arg11[%c0_27, %c0_28] : memref<1x150xf32, #tpu.memory_space<vmem>>, vector<1x150xf32>
      %35 = vector.broadcast %34 : vector<1x150xf32> to vector<12x150xf32>
      %36 = arith.addf %33, %35 : vector<12x150xf32>
      %cst_29 = arith.constant 0.000000e+00 : f32
      %37 = vector.broadcast %cst_29 : f32 to vector<12x150xf32>
      %38 = arith.maximumf %36, %37 : vector<12x150xf32>
      %39 = arith.truncf %38 : vector<12x150xf32> to vector<12x150xbf16>
      %c0_30 = arith.constant 0 : index
      %c0_31 = arith.constant 0 : index
      %40 = vector.load %arg12[%c0_30, %c0_31] : memref<150x150xbf16, #tpu.memory_space<vmem>>, vector<150x150xbf16>
      %cst_32 = arith.constant dense<0.000000e+00> : vector<12x150xf32>
      %41 = tpu.matmul %39, %40, %cst_32 {dimension_numbers = #tpu.dot_dimension_numbers<[1], [0], [0], [1], [0, 0, 1, 1], [], []>} : vector<12x150xbf16>, vector<150x150xbf16>, vector<12x150xf32> -> vector<12x150xf32>
      %c0_33 = arith.constant 0 : index
      %c0_34 = arith.constant 0 : index
      %42 = vector.load %arg13[%c0_33, %c0_34] : memref<1x150xf32, #tpu.memory_space<vmem>>, vector<1x150xf32>
      %43 = vector.broadcast %42 : vector<1x150xf32> to vector<12x150xf32>
      %44 = arith.addf %41, %43 : vector<12x150xf32>
      %cst_35 = arith.constant 0.000000e+00 : f32
      %45 = vector.broadcast %cst_35 : f32 to vector<12x150xf32>
      %46 = arith.maximumf %44, %45 : vector<12x150xf32>
      %47 = arith.truncf %46 : vector<12x150xf32> to vector<12x150xbf16>
      %c0_36 = arith.constant 0 : index
      %c0_37 = arith.constant 0 : index
      %48 = vector.load %arg14[%c0_36, %c0_37] : memref<150x50xbf16, #tpu.memory_space<vmem>>, vector<150x50xbf16>
      %cst_38 = arith.constant dense<0.000000e+00> : vector<12x50xf32>
      %49 = tpu.matmul %47, %48, %cst_38 {dimension_numbers = #tpu.dot_dimension_numbers<[1], [0], [0], [1], [0, 0, 1, 1], [], []>} : vector<12x150xbf16>, vector<150x50xbf16>, vector<12x50xf32> -> vector<12x50xf32>
      %c0_39 = arith.constant 0 : index
      %c0_40 = arith.constant 0 : index
      %50 = vector.load %arg15[%c0_39, %c0_40] : memref<1x50xf32, #tpu.memory_space<vmem>>, vector<1x50xf32>
      %51 = vector.broadcast %50 : vector<1x50xf32> to vector<12x50xf32>
      %52 = arith.addf %49, %51 : vector<12x50xf32>
      %c0_41 = arith.constant 0 : index
      %c0_42 = arith.constant 0 : index
      %53 = vector.load %arg4[%c0_41, %c0_42] : memref<8x12xf32, #tpu.memory_space<vmem>>, vector<8x12xf32>
      %cst_43 = arith.constant dense<0.000000e+00> : vector<8x50xf32>
      %54 = tpu.matmul %53, %52, %cst_43 {dimension_numbers = #tpu.dot_dimension_numbers<[1], [0], [0], [1], [0, 0, 1, 1], [], []>} : vector<8x12xf32>, vector<12x50xf32>, vector<8x50xf32> -> vector<8x50xf32>
      %55 = arith.truncf %54 : vector<8x50xf32> to vector<8x50xbf16>
      %c0_44 = arith.constant 0 : index
      %c0_45 = arith.constant 0 : index
      %56 = vector.load %arg16[%c0_44, %c0_45] : memref<50x100xbf16, #tpu.memory_space<vmem>>, vector<50x100xbf16>
      %cst_46 = arith.constant dense<0.000000e+00> : vector<8x100xf32>
      %57 = tpu.matmul %55, %56, %cst_46 {dimension_numbers = #tpu.dot_dimension_numbers<[1], [0], [0], [1], [0, 0, 1, 1], [], []>} : vector<8x50xbf16>, vector<50x100xbf16>, vector<8x100xf32> -> vector<8x100xf32>
      %c0_47 = arith.constant 0 : index
      %c0_48 = arith.constant 0 : index
      %58 = vector.load %arg17[%c0_47, %c0_48] : memref<1x100xf32, #tpu.memory_space<vmem>>, vector<1x100xf32>
      %59 = vector.broadcast %58 : vector<1x100xf32> to vector<8x100xf32>
      %60 = arith.addf %57, %59 : vector<8x100xf32>
      %cst_49 = arith.constant 0.000000e+00 : f32
      %61 = vector.broadcast %cst_49 : f32 to vector<8x100xf32>
      %62 = arith.maximumf %60, %61 : vector<8x100xf32>
      %63 = arith.truncf %62 : vector<8x100xf32> to vector<8x100xbf16>
      %c0_50 = arith.constant 0 : index
      %c0_51 = arith.constant 0 : index
      %64 = vector.load %arg18[%c0_50, %c0_51] : memref<100x4xbf16, #tpu.memory_space<vmem>>, vector<100x4xbf16>
      %cst_52 = arith.constant dense<0.000000e+00> : vector<8x4xf32>
      %65 = tpu.matmul %63, %64, %cst_52 {dimension_numbers = #tpu.dot_dimension_numbers<[1], [0], [0], [1], [0, 0, 1, 1], [], []>} : vector<8x100xbf16>, vector<100x4xbf16>, vector<8x4xf32> -> vector<8x4xf32>
      %c0_53 = arith.constant 0 : index
      %c0_54 = arith.constant 0 : index
      %66 = vector.load %arg19[%c0_53, %c0_54] : memref<1x4xf32, #tpu.memory_space<vmem>>, vector<1x4xf32>
      %67 = vector.broadcast %66 : vector<1x4xf32> to vector<8x4xf32>
      %68 = arith.addf %65, %67 : vector<8x4xf32>
      %cst_55 = arith.constant 1.562500e-02 : f32
      %69 = arith.addf %5, %cst_55 : f32
      %cst_56 = arith.constant 1.562500e-02 : f32
      %70 = vector.broadcast %cst_56 : f32 to vector<8x4xf32>
      %71 = arith.mulf %70, %68 : vector<8x4xf32>
      %72 = arith.addf %arg22, %71 : vector<8x4xf32>
      %c0_57 = arith.constant 0 : index
      %c0_58 = arith.constant 0 : index
      %73 = vector.load %arg2[%c0_57, %c0_58] : memref<12x8xf32, #tpu.memory_space<vmem>>, vector<12x8xf32>
      %cst_59 = arith.constant dense<0.000000e+00> : vector<12x4xf32>
      %74 = tpu.matmul %73, %72, %cst_59 {dimension_numbers = #tpu.dot_dimension_numbers<[1], [0], [0], [1], [0, 0, 1, 1], [], []>} : vector<12x8xf32>, vector<8x4xf32>, vector<12x4xf32> -> vector<12x4xf32>
      %c0_60 = arith.constant 0 : index
      %c0_61 = arith.constant 0 : index
      %75 = vector.load %arg3[%c0_60, %c0_61] : memref<12x8xf32, #tpu.memory_space<vmem>>, vector<12x8xf32>
      %cst_62 = arith.constant dense<0.000000e+00> : vector<12x4xf32>
      %76 = tpu.matmul %75, %72, %cst_62 {dimension_numbers = #tpu.dot_dimension_numbers<[1], [0], [0], [1], [0, 0, 1, 1], [], []>} : vector<12x8xf32>, vector<8x4xf32>, vector<12x4xf32> -> vector<12x4xf32>
      %77 = tpu.concatenate %74, %76 in 1 : vector<12x4xf32>, vector<12x4xf32> -> vector<12x8xf32>
      %78 = arith.truncf %77 : vector<12x8xf32> to vector<12x8xbf16>
      %c0_63 = arith.constant 0 : index
      %c0_64 = arith.constant 0 : index
      %79 = vector.load %arg5[%c0_63, %c0_64] : memref<8x150xbf16, #tpu.memory_space<vmem>>, vector<8x150xbf16>
      %cst_65 = arith.constant dense<0.000000e+00> : vector<12x150xf32>
      %80 = tpu.matmul %78, %79, %cst_65 {dimension_numbers = #tpu.dot_dimension_numbers<[1], [0], [0], [1], [0, 0, 1, 1], [], []>} : vector<12x8xbf16>, vector<8x150xbf16>, vector<12x150xf32> -> vector<12x150xf32>
      %c0_66 = arith.constant 0 : index
      %c0_67 = arith.constant 0 : index
      %81 = vector.load %arg6[%c0_66, %c0_67] : memref<1x150xf32, #tpu.memory_space<vmem>>, vector<1x150xf32>
      %82 = vector.broadcast %69 : f32 to vector<1x150xf32>
      %83 = arith.mulf %82, %81 : vector<1x150xf32>
      %84 = vector.broadcast %83 : vector<1x150xf32> to vector<12x150xf32>
      %85 = arith.addf %80, %84 : vector<12x150xf32>
      %c0_68 = arith.constant 0 : index
      %c0_69 = arith.constant 0 : index
      %86 = vector.load %arg7[%c0_68, %c0_69] : memref<12x150xf32, #tpu.memory_space<vmem>>, vector<12x150xf32>
      %87 = arith.addf %85, %86 : vector<12x150xf32>
      %cst_70 = arith.constant 0.000000e+00 : f32
      %88 = vector.broadcast %cst_70 : f32 to vector<12x150xf32>
      %89 = arith.maximumf %87, %88 : vector<12x150xf32>
      %90 = arith.truncf %89 : vector<12x150xf32> to vector<12x150xbf16>
      %c0_71 = arith.constant 0 : index
      %c0_72 = arith.constant 0 : index
      %91 = vector.load %arg8[%c0_71, %c0_72] : memref<150x150xbf16, #tpu.memory_space<vmem>>, vector<150x150xbf16>
      %cst_73 = arith.constant dense<0.000000e+00> : vector<12x150xf32>
      %92 = tpu.matmul %90, %91, %cst_73 {dimension_numbers = #tpu.dot_dimension_numbers<[1], [0], [0], [1], [0, 0, 1, 1], [], []>} : vector<12x150xbf16>, vector<150x150xbf16>, vector<12x150xf32> -> vector<12x150xf32>
      %c0_74 = arith.constant 0 : index
      %c0_75 = arith.constant 0 : index
      %93 = vector.load %arg9[%c0_74, %c0_75] : memref<1x150xf32, #tpu.memory_space<vmem>>, vector<1x150xf32>
      %94 = vector.broadcast %93 : vector<1x150xf32> to vector<12x150xf32>
      %95 = arith.addf %92, %94 : vector<12x150xf32>
      %cst_76 = arith.constant 0.000000e+00 : f32
      %96 = vector.broadcast %cst_76 : f32 to vector<12x150xf32>
      %97 = arith.maximumf %95, %96 : vector<12x150xf32>
      %98 = arith.truncf %97 : vector<12x150xf32> to vector<12x150xbf16>
      %c0_77 = arith.constant 0 : index
      %c0_78 = arith.constant 0 : index
      %99 = vector.load %arg10[%c0_77, %c0_78] : memref<150x150xbf16, #tpu.memory_space<vmem>>, vector<150x150xbf16>
      %cst_79 = arith.constant dense<0.000000e+00> : vector<12x150xf32>
      %100 = tpu.matmul %98, %99, %cst_79 {dimension_numbers = #tpu.dot_dimension_numbers<[1], [0], [0], [1], [0, 0, 1, 1], [], []>} : vector<12x150xbf16>, vector<150x150xbf16>, vector<12x150xf32> -> vector<12x150xf32>
      %c0_80 = arith.constant 0 : index
      %c0_81 = arith.constant 0 : index
      %101 = vector.load %arg11[%c0_80, %c0_81] : memref<1x150xf32, #tpu.memory_space<vmem>>, vector<1x150xf32>
      %102 = vector.broadcast %101 : vector<1x150xf32> to vector<12x150xf32>
      %103 = arith.addf %100, %102 : vector<12x150xf32>
      %cst_82 = arith.constant 0.000000e+00 : f32
      %104 = vector.broadcast %cst_82 : f32 to vector<12x150xf32>
      %105 = arith.maximumf %103, %104 : vector<12x150xf32>
      %106 = arith.truncf %105 : vector<12x150xf32> to vector<12x150xbf16>
      %c0_83 = arith.constant 0 : index
      %c0_84 = arith.constant 0 : index
      %107 = vector.load %arg12[%c0_83, %c0_84] : memref<150x150xbf16, #tpu.memory_space<vmem>>, vector<150x150xbf16>
      %cst_85 = arith.constant dense<0.000000e+00> : vector<12x150xf32>
      %108 = tpu.matmul %106, %107, %cst_85 {dimension_numbers = #tpu.dot_dimension_numbers<[1], [0], [0], [1], [0, 0, 1, 1], [], []>} : vector<12x150xbf16>, vector<150x150xbf16>, vector<12x150xf32> -> vector<12x150xf32>
      %c0_86 = arith.constant 0 : index
      %c0_87 = arith.constant 0 : index
      %109 = vector.load %arg13[%c0_86, %c0_87] : memref<1x150xf32, #tpu.memory_space<vmem>>, vector<1x150xf32>
      %110 = vector.broadcast %109 : vector<1x150xf32> to vector<12x150xf32>
      %111 = arith.addf %108, %110 : vector<12x150xf32>
      %cst_88 = arith.constant 0.000000e+00 : f32
      %112 = vector.broadcast %cst_88 : f32 to vector<12x150xf32>
      %113 = arith.maximumf %111, %112 : vector<12x150xf32>
      %114 = arith.truncf %113 : vector<12x150xf32> to vector<12x150xbf16>
      %c0_89 = arith.constant 0 : index
      %c0_90 = arith.constant 0 : index
      %115 = vector.load %arg14[%c0_89, %c0_90] : memref<150x50xbf16, #tpu.memory_space<vmem>>, vector<150x50xbf16>
      %cst_91 = arith.constant dense<0.000000e+00> : vector<12x50xf32>
      %116 = tpu.matmul %114, %115, %cst_91 {dimension_numbers = #tpu.dot_dimension_numbers<[1], [0], [0], [1], [0, 0, 1, 1], [], []>} : vector<12x150xbf16>, vector<150x50xbf16>, vector<12x50xf32> -> vector<12x50xf32>
      %c0_92 = arith.constant 0 : index
      %c0_93 = arith.constant 0 : index
      %117 = vector.load %arg15[%c0_92, %c0_93] : memref<1x50xf32, #tpu.memory_space<vmem>>, vector<1x50xf32>
      %118 = vector.broadcast %117 : vector<1x50xf32> to vector<12x50xf32>
      %119 = arith.addf %116, %118 : vector<12x50xf32>
      %c0_94 = arith.constant 0 : index
      %c0_95 = arith.constant 0 : index
      %120 = vector.load %arg4[%c0_94, %c0_95] : memref<8x12xf32, #tpu.memory_space<vmem>>, vector<8x12xf32>
      %cst_96 = arith.constant dense<0.000000e+00> : vector<8x50xf32>
      %121 = tpu.matmul %120, %119, %cst_96 {dimension_numbers = #tpu.dot_dimension_numbers<[1], [0], [0], [1], [0, 0, 1, 1], [], []>} : vector<8x12xf32>, vector<12x50xf32>, vector<8x50xf32> -> vector<8x50xf32>
      %122 = arith.truncf %121 : vector<8x50xf32> to vector<8x50xbf16>
      %c0_97 = arith.constant 0 : index
      %c0_98 = arith.constant 0 : index
      %123 = vector.load %arg16[%c0_97, %c0_98] : memref<50x100xbf16, #tpu.memory_space<vmem>>, vector<50x100xbf16>
      %cst_99 = arith.constant dense<0.000000e+00> : vector<8x100xf32>
      %124 = tpu.matmul %122, %123, %cst_99 {dimension_numbers = #tpu.dot_dimension_numbers<[1], [0], [0], [1], [0, 0, 1, 1], [], []>} : vector<8x50xbf16>, vector<50x100xbf16>, vector<8x100xf32> -> vector<8x100xf32>
      %c0_100 = arith.constant 0 : index
      %c0_101 = arith.constant 0 : index
      %125 = vector.load %arg17[%c0_100, %c0_101] : memref<1x100xf32, #tpu.memory_space<vmem>>, vector<1x100xf32>
      %126 = vector.broadcast %125 : vector<1x100xf32> to vector<8x100xf32>
      %127 = arith.addf %124, %126 : vector<8x100xf32>
      %cst_102 = arith.constant 0.000000e+00 : f32
      %128 = vector.broadcast %cst_102 : f32 to vector<8x100xf32>
      %129 = arith.maximumf %127, %128 : vector<8x100xf32>
      %130 = arith.truncf %129 : vector<8x100xf32> to vector<8x100xbf16>
      %c0_103 = arith.constant 0 : index
      %c0_104 = arith.constant 0 : index
      %131 = vector.load %arg18[%c0_103, %c0_104] : memref<100x4xbf16, #tpu.memory_space<vmem>>, vector<100x4xbf16>
      %cst_105 = arith.constant dense<0.000000e+00> : vector<8x4xf32>
      %132 = tpu.matmul %130, %131, %cst_105 {dimension_numbers = #tpu.dot_dimension_numbers<[1], [0], [0], [1], [0, 0, 1, 1], [], []>} : vector<8x100xbf16>, vector<100x4xbf16>, vector<8x4xf32> -> vector<8x4xf32>
      %c0_106 = arith.constant 0 : index
      %c0_107 = arith.constant 0 : index
      %133 = vector.load %arg19[%c0_106, %c0_107] : memref<1x4xf32, #tpu.memory_space<vmem>>, vector<1x4xf32>
      %134 = vector.broadcast %133 : vector<1x4xf32> to vector<8x4xf32>
      %135 = arith.addf %132, %134 : vector<8x4xf32>
      %cst_108 = arith.constant 1.562500e-02 : f32
      %136 = arith.addf %5, %cst_108 : f32
      %cst_109 = arith.constant 1.562500e-02 : f32
      %137 = vector.broadcast %cst_109 : f32 to vector<8x4xf32>
      %138 = arith.mulf %137, %135 : vector<8x4xf32>
      %139 = arith.addf %arg22, %138 : vector<8x4xf32>
      %c0_110 = arith.constant 0 : index
      %c0_111 = arith.constant 0 : index
      %140 = vector.load %arg2[%c0_110, %c0_111] : memref<12x8xf32, #tpu.memory_space<vmem>>, vector<12x8xf32>
      %cst_112 = arith.constant dense<0.000000e+00> : vector<12x4xf32>
      %141 = tpu.matmul %140, %139, %cst_112 {dimension_numbers = #tpu.dot_dimension_numbers<[1], [0], [0], [1], [0, 0, 1, 1], [], []>} : vector<12x8xf32>, vector<8x4xf32>, vector<12x4xf32> -> vector<12x4xf32>
      %c0_113 = arith.constant 0 : index
      %c0_114 = arith.constant 0 : index
      %142 = vector.load %arg3[%c0_113, %c0_114] : memref<12x8xf32, #tpu.memory_space<vmem>>, vector<12x8xf32>
      %cst_115 = arith.constant dense<0.000000e+00> : vector<12x4xf32>
      %143 = tpu.matmul %142, %139, %cst_115 {dimension_numbers = #tpu.dot_dimension_numbers<[1], [0], [0], [1], [0, 0, 1, 1], [], []>} : vector<12x8xf32>, vector<8x4xf32>, vector<12x4xf32> -> vector<12x4xf32>
      %144 = tpu.concatenate %141, %143 in 1 : vector<12x4xf32>, vector<12x4xf32> -> vector<12x8xf32>
      %145 = arith.truncf %144 : vector<12x8xf32> to vector<12x8xbf16>
      %c0_116 = arith.constant 0 : index
      %c0_117 = arith.constant 0 : index
      %146 = vector.load %arg5[%c0_116, %c0_117] : memref<8x150xbf16, #tpu.memory_space<vmem>>, vector<8x150xbf16>
      %cst_118 = arith.constant dense<0.000000e+00> : vector<12x150xf32>
      %147 = tpu.matmul %145, %146, %cst_118 {dimension_numbers = #tpu.dot_dimension_numbers<[1], [0], [0], [1], [0, 0, 1, 1], [], []>} : vector<12x8xbf16>, vector<8x150xbf16>, vector<12x150xf32> -> vector<12x150xf32>
      %c0_119 = arith.constant 0 : index
      %c0_120 = arith.constant 0 : index
      %148 = vector.load %arg6[%c0_119, %c0_120] : memref<1x150xf32, #tpu.memory_space<vmem>>, vector<1x150xf32>
      %149 = vector.broadcast %136 : f32 to vector<1x150xf32>
      %150 = arith.mulf %149, %148 : vector<1x150xf32>
      %151 = vector.broadcast %150 : vector<1x150xf32> to vector<12x150xf32>
      %152 = arith.addf %147, %151 : vector<12x150xf32>
      %c0_121 = arith.constant 0 : index
      %c0_122 = arith.constant 0 : index
      %153 = vector.load %arg7[%c0_121, %c0_122] : memref<12x150xf32, #tpu.memory_space<vmem>>, vector<12x150xf32>
      %154 = arith.addf %152, %153 : vector<12x150xf32>
      %cst_123 = arith.constant 0.000000e+00 : f32
      %155 = vector.broadcast %cst_123 : f32 to vector<12x150xf32>
      %156 = arith.maximumf %154, %155 : vector<12x150xf32>
      %157 = arith.truncf %156 : vector<12x150xf32> to vector<12x150xbf16>
      %c0_124 = arith.constant 0 : index
      %c0_125 = arith.constant 0 : index
      %158 = vector.load %arg8[%c0_124, %c0_125] : memref<150x150xbf16, #tpu.memory_space<vmem>>, vector<150x150xbf16>
      %cst_126 = arith.constant dense<0.000000e+00> : vector<12x150xf32>
      %159 = tpu.matmul %157, %158, %cst_126 {dimension_numbers = #tpu.dot_dimension_numbers<[1], [0], [0], [1], [0, 0, 1, 1], [], []>} : vector<12x150xbf16>, vector<150x150xbf16>, vector<12x150xf32> -> vector<12x150xf32>
      %c0_127 = arith.constant 0 : index
      %c0_128 = arith.constant 0 : index
      %160 = vector.load %arg9[%c0_127, %c0_128] : memref<1x150xf32, #tpu.memory_space<vmem>>, vector<1x150xf32>
      %161 = vector.broadcast %160 : vector<1x150xf32> to vector<12x150xf32>
      %162 = arith.addf %159, %161 : vector<12x150xf32>
      %cst_129 = arith.constant 0.000000e+00 : f32
      %163 = vector.broadcast %cst_129 : f32 to vector<12x150xf32>
      %164 = arith.maximumf %162, %163 : vector<12x150xf32>
      %165 = arith.truncf %164 : vector<12x150xf32> to vector<12x150xbf16>
      %c0_130 = arith.constant 0 : index
      %c0_131 = arith.constant 0 : index
      %166 = vector.load %arg10[%c0_130, %c0_131] : memref<150x150xbf16, #tpu.memory_space<vmem>>, vector<150x150xbf16>
      %cst_132 = arith.constant dense<0.000000e+00> : vector<12x150xf32>
      %167 = tpu.matmul %165, %166, %cst_132 {dimension_numbers = #tpu.dot_dimension_numbers<[1], [0], [0], [1], [0, 0, 1, 1], [], []>} : vector<12x150xbf16>, vector<150x150xbf16>, vector<12x150xf32> -> vector<12x150xf32>
      %c0_133 = arith.constant 0 : index
      %c0_134 = arith.constant 0 : index
      %168 = vector.load %arg11[%c0_133, %c0_134] : memref<1x150xf32, #tpu.memory_space<vmem>>, vector<1x150xf32>
      %169 = vector.broadcast %168 : vector<1x150xf32> to vector<12x150xf32>
      %170 = arith.addf %167, %169 : vector<12x150xf32>
      %cst_135 = arith.constant 0.000000e+00 : f32
      %171 = vector.broadcast %cst_135 : f32 to vector<12x150xf32>
      %172 = arith.maximumf %170, %171 : vector<12x150xf32>
      %173 = arith.truncf %172 : vector<12x150xf32> to vector<12x150xbf16>
      %c0_136 = arith.constant 0 : index
      %c0_137 = arith.constant 0 : index
      %174 = vector.load %arg12[%c0_136, %c0_137] : memref<150x150xbf16, #tpu.memory_space<vmem>>, vector<150x150xbf16>
      %cst_138 = arith.constant dense<0.000000e+00> : vector<12x150xf32>
      %175 = tpu.matmul %173, %174, %cst_138 {dimension_numbers = #tpu.dot_dimension_numbers<[1], [0], [0], [1], [0, 0, 1, 1], [], []>} : vector<12x150xbf16>, vector<150x150xbf16>, vector<12x150xf32> -> vector<12x150xf32>
      %c0_139 = arith.constant 0 : index
      %c0_140 = arith.constant 0 : index
      %176 = vector.load %arg13[%c0_139, %c0_140] : memref<1x150xf32, #tpu.memory_space<vmem>>, vector<1x150xf32>
      %177 = vector.broadcast %176 : vector<1x150xf32> to vector<12x150xf32>
      %178 = arith.addf %175, %177 : vector<12x150xf32>
      %cst_141 = arith.constant 0.000000e+00 : f32
      %179 = vector.broadcast %cst_141 : f32 to vector<12x150xf32>
      %180 = arith.maximumf %178, %179 : vector<12x150xf32>
      %181 = arith.truncf %180 : vector<12x150xf32> to vector<12x150xbf16>
      %c0_142 = arith.constant 0 : index
      %c0_143 = arith.constant 0 : index
      %182 = vector.load %arg14[%c0_142, %c0_143] : memref<150x50xbf16, #tpu.memory_space<vmem>>, vector<150x50xbf16>
      %cst_144 = arith.constant dense<0.000000e+00> : vector<12x50xf32>
      %183 = tpu.matmul %181, %182, %cst_144 {dimension_numbers = #tpu.dot_dimension_numbers<[1], [0], [0], [1], [0, 0, 1, 1], [], []>} : vector<12x150xbf16>, vector<150x50xbf16>, vector<12x50xf32> -> vector<12x50xf32>
      %c0_145 = arith.constant 0 : index
      %c0_146 = arith.constant 0 : index
      %184 = vector.load %arg15[%c0_145, %c0_146] : memref<1x50xf32, #tpu.memory_space<vmem>>, vector<1x50xf32>
      %185 = vector.broadcast %184 : vector<1x50xf32> to vector<12x50xf32>
      %186 = arith.addf %183, %185 : vector<12x50xf32>
      %c0_147 = arith.constant 0 : index
      %c0_148 = arith.constant 0 : index
      %187 = vector.load %arg4[%c0_147, %c0_148] : memref<8x12xf32, #tpu.memory_space<vmem>>, vector<8x12xf32>
      %cst_149 = arith.constant dense<0.000000e+00> : vector<8x50xf32>
      %188 = tpu.matmul %187, %186, %cst_149 {dimension_numbers = #tpu.dot_dimension_numbers<[1], [0], [0], [1], [0, 0, 1, 1], [], []>} : vector<8x12xf32>, vector<12x50xf32>, vector<8x50xf32> -> vector<8x50xf32>
      %189 = arith.truncf %188 : vector<8x50xf32> to vector<8x50xbf16>
      %c0_150 = arith.constant 0 : index
      %c0_151 = arith.constant 0 : index
      %190 = vector.load %arg16[%c0_150, %c0_151] : memref<50x100xbf16, #tpu.memory_space<vmem>>, vector<50x100xbf16>
      %cst_152 = arith.constant dense<0.000000e+00> : vector<8x100xf32>
      %191 = tpu.matmul %189, %190, %cst_152 {dimension_numbers = #tpu.dot_dimension_numbers<[1], [0], [0], [1], [0, 0, 1, 1], [], []>} : vector<8x50xbf16>, vector<50x100xbf16>, vector<8x100xf32> -> vector<8x100xf32>
      %c0_153 = arith.constant 0 : index
      %c0_154 = arith.constant 0 : index
      %192 = vector.load %arg17[%c0_153, %c0_154] : memref<1x100xf32, #tpu.memory_space<vmem>>, vector<1x100xf32>
      %193 = vector.broadcast %192 : vector<1x100xf32> to vector<8x100xf32>
      %194 = arith.addf %191, %193 : vector<8x100xf32>
      %cst_155 = arith.constant 0.000000e+00 : f32
      %195 = vector.broadcast %cst_155 : f32 to vector<8x100xf32>
      %196 = arith.maximumf %194, %195 : vector<8x100xf32>
      %197 = arith.truncf %196 : vector<8x100xf32> to vector<8x100xbf16>
      %c0_156 = arith.constant 0 : index
      %c0_157 = arith.constant 0 : index
      %198 = vector.load %arg18[%c0_156, %c0_157] : memref<100x4xbf16, #tpu.memory_space<vmem>>, vector<100x4xbf16>
      %cst_158 = arith.constant dense<0.000000e+00> : vector<8x4xf32>
      %199 = tpu.matmul %197, %198, %cst_158 {dimension_numbers = #tpu.dot_dimension_numbers<[1], [0], [0], [1], [0, 0, 1, 1], [], []>} : vector<8x100xbf16>, vector<100x4xbf16>, vector<8x4xf32> -> vector<8x4xf32>
      %c0_159 = arith.constant 0 : index
      %c0_160 = arith.constant 0 : index
      %200 = vector.load %arg19[%c0_159, %c0_160] : memref<1x4xf32, #tpu.memory_space<vmem>>, vector<1x4xf32>
      %201 = vector.broadcast %200 : vector<1x4xf32> to vector<8x4xf32>
      %202 = arith.addf %199, %201 : vector<8x4xf32>
      %cst_161 = arith.constant 3.125000e-02 : f32
      %203 = arith.addf %5, %cst_161 : f32
      %cst_162 = arith.constant 3.125000e-02 : f32
      %204 = vector.broadcast %cst_162 : f32 to vector<8x4xf32>
      %205 = arith.mulf %204, %202 : vector<8x4xf32>
      %206 = arith.addf %arg22, %205 : vector<8x4xf32>
      %c0_163 = arith.constant 0 : index
      %c0_164 = arith.constant 0 : index
      %207 = vector.load %arg2[%c0_163, %c0_164] : memref<12x8xf32, #tpu.memory_space<vmem>>, vector<12x8xf32>
      %cst_165 = arith.constant dense<0.000000e+00> : vector<12x4xf32>
      %208 = tpu.matmul %207, %206, %cst_165 {dimension_numbers = #tpu.dot_dimension_numbers<[1], [0], [0], [1], [0, 0, 1, 1], [], []>} : vector<12x8xf32>, vector<8x4xf32>, vector<12x4xf32> -> vector<12x4xf32>
      %c0_166 = arith.constant 0 : index
      %c0_167 = arith.constant 0 : index
      %209 = vector.load %arg3[%c0_166, %c0_167] : memref<12x8xf32, #tpu.memory_space<vmem>>, vector<12x8xf32>
      %cst_168 = arith.constant dense<0.000000e+00> : vector<12x4xf32>
      %210 = tpu.matmul %209, %206, %cst_168 {dimension_numbers = #tpu.dot_dimension_numbers<[1], [0], [0], [1], [0, 0, 1, 1], [], []>} : vector<12x8xf32>, vector<8x4xf32>, vector<12x4xf32> -> vector<12x4xf32>
      %211 = tpu.concatenate %208, %210 in 1 : vector<12x4xf32>, vector<12x4xf32> -> vector<12x8xf32>
      %212 = arith.truncf %211 : vector<12x8xf32> to vector<12x8xbf16>
      %c0_169 = arith.constant 0 : index
      %c0_170 = arith.constant 0 : index
      %213 = vector.load %arg5[%c0_169, %c0_170] : memref<8x150xbf16, #tpu.memory_space<vmem>>, vector<8x150xbf16>
      %cst_171 = arith.constant dense<0.000000e+00> : vector<12x150xf32>
      %214 = tpu.matmul %212, %213, %cst_171 {dimension_numbers = #tpu.dot_dimension_numbers<[1], [0], [0], [1], [0, 0, 1, 1], [], []>} : vector<12x8xbf16>, vector<8x150xbf16>, vector<12x150xf32> -> vector<12x150xf32>
      %c0_172 = arith.constant 0 : index
      %c0_173 = arith.constant 0 : index
      %215 = vector.load %arg6[%c0_172, %c0_173] : memref<1x150xf32, #tpu.memory_space<vmem>>, vector<1x150xf32>
      %216 = vector.broadcast %203 : f32 to vector<1x150xf32>
      %217 = arith.mulf %216, %215 : vector<1x150xf32>
      %218 = vector.broadcast %217 : vector<1x150xf32> to vector<12x150xf32>
      %219 = arith.addf %214, %218 : vector<12x150xf32>
      %c0_174 = arith.constant 0 : index
      %c0_175 = arith.constant 0 : index
      %220 = vector.load %arg7[%c0_174, %c0_175] : memref<12x150xf32, #tpu.memory_space<vmem>>, vector<12x150xf32>
      %221 = arith.addf %219, %220 : vector<12x150xf32>
      %cst_176 = arith.constant 0.000000e+00 : f32
      %222 = vector.broadcast %cst_176 : f32 to vector<12x150xf32>
      %223 = arith.maximumf %221, %222 : vector<12x150xf32>
      %224 = arith.truncf %223 : vector<12x150xf32> to vector<12x150xbf16>
      %c0_177 = arith.constant 0 : index
      %c0_178 = arith.constant 0 : index
      %225 = vector.load %arg8[%c0_177, %c0_178] : memref<150x150xbf16, #tpu.memory_space<vmem>>, vector<150x150xbf16>
      %cst_179 = arith.constant dense<0.000000e+00> : vector<12x150xf32>
      %226 = tpu.matmul %224, %225, %cst_179 {dimension_numbers = #tpu.dot_dimension_numbers<[1], [0], [0], [1], [0, 0, 1, 1], [], []>} : vector<12x150xbf16>, vector<150x150xbf16>, vector<12x150xf32> -> vector<12x150xf32>
      %c0_180 = arith.constant 0 : index
      %c0_181 = arith.constant 0 : index
      %227 = vector.load %arg9[%c0_180, %c0_181] : memref<1x150xf32, #tpu.memory_space<vmem>>, vector<1x150xf32>
      %228 = vector.broadcast %227 : vector<1x150xf32> to vector<12x150xf32>
      %229 = arith.addf %226, %228 : vector<12x150xf32>
      %cst_182 = arith.constant 0.000000e+00 : f32
      %230 = vector.broadcast %cst_182 : f32 to vector<12x150xf32>
      %231 = arith.maximumf %229, %230 : vector<12x150xf32>
      %232 = arith.truncf %231 : vector<12x150xf32> to vector<12x150xbf16>
      %c0_183 = arith.constant 0 : index
      %c0_184 = arith.constant 0 : index
      %233 = vector.load %arg10[%c0_183, %c0_184] : memref<150x150xbf16, #tpu.memory_space<vmem>>, vector<150x150xbf16>
      %cst_185 = arith.constant dense<0.000000e+00> : vector<12x150xf32>
      %234 = tpu.matmul %232, %233, %cst_185 {dimension_numbers = #tpu.dot_dimension_numbers<[1], [0], [0], [1], [0, 0, 1, 1], [], []>} : vector<12x150xbf16>, vector<150x150xbf16>, vector<12x150xf32> -> vector<12x150xf32>
      %c0_186 = arith.constant 0 : index
      %c0_187 = arith.constant 0 : index
      %235 = vector.load %arg11[%c0_186, %c0_187] : memref<1x150xf32, #tpu.memory_space<vmem>>, vector<1x150xf32>
      %236 = vector.broadcast %235 : vector<1x150xf32> to vector<12x150xf32>
      %237 = arith.addf %234, %236 : vector<12x150xf32>
      %cst_188 = arith.constant 0.000000e+00 : f32
      %238 = vector.broadcast %cst_188 : f32 to vector<12x150xf32>
      %239 = arith.maximumf %237, %238 : vector<12x150xf32>
      %240 = arith.truncf %239 : vector<12x150xf32> to vector<12x150xbf16>
      %c0_189 = arith.constant 0 : index
      %c0_190 = arith.constant 0 : index
      %241 = vector.load %arg12[%c0_189, %c0_190] : memref<150x150xbf16, #tpu.memory_space<vmem>>, vector<150x150xbf16>
      %cst_191 = arith.constant dense<0.000000e+00> : vector<12x150xf32>
      %242 = tpu.matmul %240, %241, %cst_191 {dimension_numbers = #tpu.dot_dimension_numbers<[1], [0], [0], [1], [0, 0, 1, 1], [], []>} : vector<12x150xbf16>, vector<150x150xbf16>, vector<12x150xf32> -> vector<12x150xf32>
      %c0_192 = arith.constant 0 : index
      %c0_193 = arith.constant 0 : index
      %243 = vector.load %arg13[%c0_192, %c0_193] : memref<1x150xf32, #tpu.memory_space<vmem>>, vector<1x150xf32>
      %244 = vector.broadcast %243 : vector<1x150xf32> to vector<12x150xf32>
      %245 = arith.addf %242, %244 : vector<12x150xf32>
      %cst_194 = arith.constant 0.000000e+00 : f32
      %246 = vector.broadcast %cst_194 : f32 to vector<12x150xf32>
      %247 = arith.maximumf %245, %246 : vector<12x150xf32>
      %248 = arith.truncf %247 : vector<12x150xf32> to vector<12x150xbf16>
      %c0_195 = arith.constant 0 : index
      %c0_196 = arith.constant 0 : index
      %249 = vector.load %arg14[%c0_195, %c0_196] : memref<150x50xbf16, #tpu.memory_space<vmem>>, vector<150x50xbf16>
      %cst_197 = arith.constant dense<0.000000e+00> : vector<12x50xf32>
      %250 = tpu.matmul %248, %249, %cst_197 {dimension_numbers = #tpu.dot_dimension_numbers<[1], [0], [0], [1], [0, 0, 1, 1], [], []>} : vector<12x150xbf16>, vector<150x50xbf16>, vector<12x50xf32> -> vector<12x50xf32>
      %c0_198 = arith.constant 0 : index
      %c0_199 = arith.constant 0 : index
      %251 = vector.load %arg15[%c0_198, %c0_199] : memref<1x50xf32, #tpu.memory_space<vmem>>, vector<1x50xf32>
      %252 = vector.broadcast %251 : vector<1x50xf32> to vector<12x50xf32>
      %253 = arith.addf %250, %252 : vector<12x50xf32>
      %c0_200 = arith.constant 0 : index
      %c0_201 = arith.constant 0 : index
      %254 = vector.load %arg4[%c0_200, %c0_201] : memref<8x12xf32, #tpu.memory_space<vmem>>, vector<8x12xf32>
      %cst_202 = arith.constant dense<0.000000e+00> : vector<8x50xf32>
      %255 = tpu.matmul %254, %253, %cst_202 {dimension_numbers = #tpu.dot_dimension_numbers<[1], [0], [0], [1], [0, 0, 1, 1], [], []>} : vector<8x12xf32>, vector<12x50xf32>, vector<8x50xf32> -> vector<8x50xf32>
      %256 = arith.truncf %255 : vector<8x50xf32> to vector<8x50xbf16>
      %c0_203 = arith.constant 0 : index
      %c0_204 = arith.constant 0 : index
      %257 = vector.load %arg16[%c0_203, %c0_204] : memref<50x100xbf16, #tpu.memory_space<vmem>>, vector<50x100xbf16>
      %cst_205 = arith.constant dense<0.000000e+00> : vector<8x100xf32>
      %258 = tpu.matmul %256, %257, %cst_205 {dimension_numbers = #tpu.dot_dimension_numbers<[1], [0], [0], [1], [0, 0, 1, 1], [], []>} : vector<8x50xbf16>, vector<50x100xbf16>, vector<8x100xf32> -> vector<8x100xf32>
      %c0_206 = arith.constant 0 : index
      %c0_207 = arith.constant 0 : index
      %259 = vector.load %arg17[%c0_206, %c0_207] : memref<1x100xf32, #tpu.memory_space<vmem>>, vector<1x100xf32>
      %260 = vector.broadcast %259 : vector<1x100xf32> to vector<8x100xf32>
      %261 = arith.addf %258, %260 : vector<8x100xf32>
      %cst_208 = arith.constant 0.000000e+00 : f32
      %262 = vector.broadcast %cst_208 : f32 to vector<8x100xf32>
      %263 = arith.maximumf %261, %262 : vector<8x100xf32>
      %264 = arith.truncf %263 : vector<8x100xf32> to vector<8x100xbf16>
      %c0_209 = arith.constant 0 : index
      %c0_210 = arith.constant 0 : index
      %265 = vector.load %arg18[%c0_209, %c0_210] : memref<100x4xbf16, #tpu.memory_space<vmem>>, vector<100x4xbf16>
      %cst_211 = arith.constant dense<0.000000e+00> : vector<8x4xf32>
      %266 = tpu.matmul %264, %265, %cst_211 {dimension_numbers = #tpu.dot_dimension_numbers<[1], [0], [0], [1], [0, 0, 1, 1], [], []>} : vector<8x100xbf16>, vector<100x4xbf16>, vector<8x4xf32> -> vector<8x4xf32>
      %c0_212 = arith.constant 0 : index
      %c0_213 = arith.constant 0 : index
      %267 = vector.load %arg19[%c0_212, %c0_213] : memref<1x4xf32, #tpu.memory_space<vmem>>, vector<1x4xf32>
      %268 = vector.broadcast %267 : vector<1x4xf32> to vector<8x4xf32>
      %269 = arith.addf %266, %268 : vector<8x4xf32>
      %cst_214 = arith.constant 2.000000e+00 : f32
      %270 = vector.broadcast %cst_214 : f32 to vector<8x4xf32>
      %271 = arith.mulf %270, %135 : vector<8x4xf32>
      %272 = arith.addf %68, %271 : vector<8x4xf32>
      %cst_215 = arith.constant 2.000000e+00 : f32
      %273 = vector.broadcast %cst_215 : f32 to vector<8x4xf32>
      %274 = arith.mulf %273, %202 : vector<8x4xf32>
      %275 = arith.addf %272, %274 : vector<8x4xf32>
      %276 = arith.addf %275, %269 : vector<8x4xf32>
      %cst_216 = arith.constant 0.00520833349 : f32
      %277 = vector.broadcast %cst_216 : f32 to vector<8x4xf32>
      %278 = arith.mulf %277, %276 : vector<8x4xf32>
      %279 = arith.addf %arg22, %278 : vector<8x4xf32>
      scf.yield %279 : vector<8x4xf32>
    }
    %c32_i32_1 = arith.constant 32 : i32
    %c0_2 = arith.constant 0 : index
    %c0_3 = arith.constant 0 : index
    %3 = vector.load %arg20[%c0_2, %c0_3] : memref<8x4xf32, #tpu.memory_space<vmem>>, vector<8x4xf32>
    tpu.vector_store %arg20[%c0_2, %c0_3], %2 {strides = array<i32>} : memref<8x4xf32, #tpu.memory_space<vmem>>, vector<8x4xf32>,
    return
  }
  func.func @transform_0(%arg0: i32) -> (i32, i32) {
    %c0_i32 = arith.constant 0 : i32
    %c0_i32_0 = arith.constant 0 : i32
    %c0_i32_1 = arith.constant 0 : i32
    return %c0_i32, %c0_i32_0 : i32, i32
  }
  func.func @transform_1(%arg0: i32) -> (i32, i32) {
    %c0_i32 = arith.constant 0 : i32
    %c0_i32_0 = arith.constant 0 : i32
    %c0_i32_1 = arith.constant 0 : i32
    return %c0_i32, %c0_i32_0 : i32, i32
  }
  func.func @transform_2(%arg0: i32) -> (i32, i32) {
    %c0_i32 = arith.constant 0 : i32
    %c0_i32_0 = arith.constant 0 : i32
    %c0_i32_1 = arith.constant 0 : i32
    return %c0_i32, %c0_i32_0 : i32, i32
  }
  func.func @transform_3(%arg0: i32) -> (i32, i32) {
    %c0_i32 = arith.constant 0 : i32
    %c0_i32_0 = arith.constant 0 : i32
    %c0_i32_1 = arith.constant 0 : i32
    return %c0_i32, %c0_i32_0 : i32, i32
  }
  func.func @transform_4(%arg0: i32) -> (i32, i32) {
    %c0_i32 = arith.constant 0 : i32
    %c0_i32_0 = arith.constant 0 : i32
    %c0_i32_1 = arith.constant 0 : i32
    return %c0_i32, %c0_i32_0 : i32, i32
  }
  func.func @transform_5(%arg0: i32) -> (i32, i32) {
    %c0_i32 = arith.constant 0 : i32
    %c0_i32_0 = arith.constant 0 : i32
    %c0_i32_1 = arith.constant 0 : i32
    return %c0_i32, %c0_i32_0 : i32, i32
  }
  func.func @transform_6(%arg0: i32) -> (i32, i32) {
    %c0_i32 = arith.constant 0 : i32
    %c0_i32_0 = arith.constant 0 : i32
    %c0_i32_1 = arith.constant 0 : i32
    return %c0_i32, %c0_i32_0 : i32, i32
  }
  func.func @transform_7(%arg0: i32) -> (i32, i32) {
    %c0_i32 = arith.constant 0 : i32
    %c0_i32_0 = arith.constant 0 : i32
    %c0_i32_1 = arith.constant 0 : i32
    return %c0_i32, %c0_i32_0 : i32, i32
  }
  func.func @transform_8(%arg0: i32) -> (i32, i32) {
    %c0_i32 = arith.constant 0 : i32
    %c0_i32_0 = arith.constant 0 : i32
    %c0_i32_1 = arith.constant 0 : i32
    return %c0_i32, %c0_i32_0 : i32, i32
  }
  func.func @transform_9(%arg0: i32) -> (i32, i32) {
    %c0_i32 = arith.constant 0 : i32
    %c0_i32_0 = arith.constant 0 : i32
    %c0_i32_1 = arith.constant 0 : i32
    return %c0_i32, %c0_i32_0 : i32, i32
  }
  func.func @transform_10(%arg0: i32) -> (i32, i32) {
    %c0_i32 = arith.constant 0 : i32
    %c0_i32_0 = arith.constant 0 : i32
    %c0_i32_1 = arith.constant 0 : i32
    return %c0_i32, %c0_i32_0 : i32, i32
  }
  func.func @transform_11(%arg0: i32) -> (i32, i32) {
    %c0_i32 = arith.constant 0 : i32
    %c0_i32_0 = arith.constant 0 : i32
    %c0_i32_1 = arith.constant 0 : i32
    return %c0_i32, %c0_i32_0 : i32, i32
  }
  func.func @transform_12(%arg0: i32) -> (i32, i32) {
    %c0_i32 = arith.constant 0 : i32
    %c0_i32_0 = arith.constant 0 : i32
    %c0_i32_1 = arith.constant 0 : i32
    return %c0_i32, %c0_i32_0 : i32, i32
  }
  func.func @transform_13(%arg0: i32) -> (i32, i32) {
    %c0_i32 = arith.constant 0 : i32
    %c0_i32_0 = arith.constant 0 : i32
    %c0_i32_1 = arith.constant 0 : i32
    return %c0_i32, %c0_i32_0 : i32, i32
  }
  func.func @transform_14(%arg0: i32) -> (i32, i32) {
    %c0_i32 = arith.constant 0 : i32
    %c0_i32_0 = arith.constant 0 : i32
    %c0_i32_1 = arith.constant 0 : i32
    return %c0_i32, %c0_i32_0 : i32, i32
  }
  func.func @transform_15(%arg0: i32) -> (i32, i32) {
    %c0_i32 = arith.constant 0 : i32
    %c0_i32_0 = arith.constant 0 : i32
    %c0_i32_1 = arith.constant 0 : i32
    return %c0_i32, %c0_i32_0 : i32, i32
  }
  func.func @transform_16(%arg0: i32) -> (i32, i32) {
    %c0_i32 = arith.constant 0 : i32
    %c0_i32_0 = arith.constant 0 : i32
    %c0_i32_1 = arith.constant 0 : i32
    return %c0_i32, %c0_i32_0 : i32, i32
  }
  func.func @transform_17(%arg0: i32) -> (i32, i32) {
    %c0_i32 = arith.constant 0 : i32
    %c0_i32_0 = arith.constant 0 : i32
    %c0_i32_1 = arith.constant 0 : i32
    return %c0_i32, %c0_i32_0 : i32, i32
  }
  func.func @transform_18(%arg0: i32) -> (i32, i32) {
    %c0_i32 = arith.constant 0 : i32
    %c0_i32_0 = arith.constant 0 : i32
    %c0_i32_1 = arith.constant 0 : i32
    return %c0_i32, %c0_i32_0 : i32, i32
  }
  func.func @transform_19(%arg0: i32) -> (i32, i32) {
    %c0_i32 = arith.constant 0 : i32
    %c0_i32_0 = arith.constant 0 : i32
    %c0_i32_1 = arith.constant 0 : i32
    return %c0_i32, %c0_i32_0 : i32, i32
  }
}

</mosaic_0001>

<bundles_post_ra>
// kernel: in_ode_forward.1
= control target key start
LH: loop header
LB: loop body
LE: loop exit
PB: predicated region body
PF: predicated region fallthrough
CT: control target
= control target key end

     0   :  { %s2874_s21 = smov 0   ;;  %s4174_s0 = inlined_call_operand.vmem [shape: f32[8,4], index: 0, kind: input, shape index: {}]   ;;  %s4175_s1 = inlined_call_operand.vmem [shape: f32[12,8], index: 1, kind: input, shape index: {}]   ;;  %s4176_s2 = inlined_call_operand.vmem [shape: f32[12,8], index: 2, kind: input, shape index: {}]   ;;  %s4177_s3 = inlined_call_operand.vmem [shape: f32[8,12], index: 3, kind: input, shape index: {}]   ;;  %s4178_s4 = inlined_call_operand.vmem [shape: bf16[8,150], index: 4, kind: input, shape index: {}]   ;;  %s4179_s5 = inlined_call_operand.vmem [shape: f32[1,150], index: 5, kind: input, shape index: {}]   ;;  %s4180_s6 = inlined_call_operand.vmem [shape: f32[12,150], index: 6, kind: input, shape index: {}]   ;;  %s4181_s7 = inlined_call_operand.vmem [shape: bf16[150,150], index: 7, kind: input, shape index: {}]   ;;  %s4182_s8 = inlined_call_operand.vmem [shape: f32[1,150], index: 8, kind: input, shape index: {}]   ;;  %s4183_s9 = inlined_call_operand.vmem [shape: bf16[150,150], index: 9, kind: input, shape index: {}]   ;;  %s4184_s10 = inlined_call_operand.vmem [shape: f32[1,150], index: 10, kind: input, shape index: {}]   ;;  %s4185_s11 = inlined_call_operand.vmem [shape: bf16[150,150], index: 11, kind: input, shape index: {}]   ;;  %s4186_s12 = inlined_call_operand.vmem [shape: f32[1,150], index: 12, kind: input, shape index: {}]   ;;  %s4187_s13 = inlined_call_operand.vmem [shape: bf16[150,50], index: 13, kind: input, shape index: {}]   ;;  %s4188_s14 = inlined_call_operand.vmem [shape: f32[1,50], index: 14, kind: input, shape index: {}]   ;;  %s4189_s15 = inlined_call_operand.vmem [shape: bf16[50,100], index: 15, kind: input, shape index: {}]   ;;  %s4190_s16 = inlined_call_operand.vmem [shape: f32[1,100], index: 16, kind: input, shape index: {}]   ;;  %s4191_s17 = inlined_call_operand.vmem [shape: bf16[100,4], index: 17, kind: input, shape index: {}]   ;;  %s4192_s18 = inlined_call_operand.vmem [shape: f32[1,4], index: 18, kind: input, shape index: {}]   ;;  %s4193_s19 = inlined_call_operand.vmem [shape: f32[8,4], index: 19, kind: output, shape index: {}]  }
   0x1   :  { %4344 = sst [smem:[#allocation81_spill]] %s4174_s0 }
   0x2   :  { %4345 = sst [smem:[#allocation82_spill]] %s4175_s1 }
   0x3   :  { %4346 = sst [smem:[#allocation83_spill]] %s4176_s2 }
   0x4   :  { %4347 = sst [smem:[#allocation84_spill]] %s4177_s3 }
   0x5   :  { %s4348_s20 = sld [smem:[#allocation81_spill]] }
   0xb   :  { %v63_v0 = vld [vmem:[%s4348_s20] sm:$0xff]  }
   0xc LB: > { %vm75_vm0 = vcmask 64512   ;;  %s4349_s2 = sld [smem:[#allocation83_spill]]  ;;  %128 = vmatpush.msra.mxu2 %v2762_v0  ;;  %97 = vmatpush.msra.mxu0 %v2762_v0  ;;  %s2768_s29 = smov 4   ;;  %v148_v8 = vld [vmem:[%s4178_s4] sm:$0xff]  ;;  %vm165_vm1 = vcmask 1043456   ;;  %vm144_vm2 = vcmask 31744   ;;  %s2766_s21 = sphi %s2874_s21, %s69_s21   ;;  %v2762_v0 = vphi %v63_v0, %v4585_v0  }
   0xd   : > { %s4350_s25 = sld [smem:[#allocation82_spill]]  ;;  %v158_v9 = vunpack.c.l.b16 %v148_v8  ;;  %v159_v10 = vunpack.c.h.b16 %v148_v8  ;;  %v2317_v15 = vld [vmem:[%s4181_s7 + $0x70] sm:$0xf]  ;;  %v2624_v16 = vld [vmem:[%s4181_s7 + $0x74] sm:$0xf0]  ;;  %vm338_vm3 = vcmask 1042432   ;;  %s71_s28 = scvt.s32.f32 %s2766_s21 }
   0xe   : > { %v2623_v17 = vld [vmem:[%s4181_s7 + $0x74] sm:$0xf]  ;;  %v2921_v18 = vor.u32 %v2624_v16, %v2317_v15  ;;  %v2319_v19 = vld [vmem:[%s4181_s7 + $0x78] sm:$0xf0]  ;;  %v2309_v20 = vld [vmem:[%s4181_s7 + $0x60] sm:$0xf] }
   0xf   : > { %v160_v11 = vpack.c.b16 %v158_v9, %v158_v9  ;;  %v161_v12 = vpack.c.b16 %v159_v10, %v159_v10  ;;  %v2622_v21 = vld [vmem:[%s4181_s7 + $0x64] sm:$0xf0]  ;;  %v2932_v22 = vor.u32 %v2623_v17, %v2319_v19  ;;  %v2621_v23 = vld [vmem:[%s4181_s7 + $0x64] sm:$0xf]  ;;  %v2311_v24 = vld [vmem:[%s4181_s7 + $0x68] sm:$0xf0] }
  0x10   : > { %4352 = vst [vmem:[#allocation3_spill] sm:$0xff] %v2921_v18  ;;  %345 = vmatpush.bf16.msrb.mxu0 %v2921_v18  ;;  %v2941_v25 = vor.u32 %v2622_v21, %v2309_v20  ;;  %v2944_v26 = vor.u32 %v2621_v23, %v2311_v24  ;;  %v2301_v27 = vld [vmem:[%s4181_s7 + $0x50] sm:$0xf]  ;;  %v2620_v28 = vld [vmem:[%s4181_s7 + $0x54] sm:$0xf0]  ;;  %s3121_s24 = smul.f32 0.03125, %s71_s28 }
  0x11   : > { %v2905_v13 = vsel %vm165_vm1, %v160_v11, 0  ;;  %v2908_v14 = vsel %vm165_vm1, %v161_v12, 0  ;;  %v2619_v29 = vld [vmem:[%s4181_s7 + $0x54] sm:$0xf]  ;;  %v2303_v30 = vld [vmem:[%s4181_s7 + $0x58] sm:$0xf0]  ;;  %v2959_v31 = vor.u32 %v2620_v28, %v2301_v27 }
  0x12   : > { %v105_v1 = vld [vmem:[%s4349_s2] sm:$0xff]  ;;  %v106_v3 = vld [vmem:[%s4349_s2 + $0x8] sm:$0xf]  ;;  %4351 = vst [vmem:[#allocation2_spill] sm:$0xff] %v2908_v14  ;;  %179 = vmatpush.bf16.msrb.mxu2 %v2905_v13  ;;  %193 = vmatpush.bf16.msra.mxu3 %v2908_v14  ;;  %v2962_v32 = vor.u32 %v2619_v29, %v2303_v30  ;;  %v2295_v36 = vld [vmem:[%s4181_s7 + $0x48] sm:$0xf0] }
  0x13   : > { %v73_v2 = vld [vmem:[%s4350_s25] sm:$0xff]  ;;  %2255 = vmatmul.msk.f32.vlgmr.msra.gmra.mxu2 %vm75_vm0, %v105_v1  ;;  %v74_v4 = vld [vmem:[%s4350_s25 + $0x8] sm:$0xf]  ;;  %4353 = vst [vmem:[#allocation4_spill] sm:$0xff] %v2941_v25  ;;  %v2285_v47 = vld [vmem:[%s4181_s7 + $0x30] sm:$0xf] }
  0x14   : > { %2253 = vmatmul.msk.f32.vlgmr.msra.gmra.mxu0 %vm75_vm0, %v73_v2  ;;  %4354 = vst [vmem:[#allocation5_spill] sm:$0xff] %v2959_v31  ;;  %v2293_v33 = vld [vmem:[%s4181_s7 + $0x40] sm:$0xf]  ;;  %v2618_v34 = vld [vmem:[%s4181_s7 + $0x44] sm:$0xf0]  ;;  %vm334_vm4 = vcmask 179200  }
  0x15   : > { %346 = vmatpush.bf16.msrb.mxu0 %v2941_v25  ;;  %v2617_v35 = vld [vmem:[%s4181_s7 + $0x44] sm:$0xf]  ;;  %v2977_v37 = vor.u32 %v2618_v34, %v2293_v33  ;;  %v2616_v48 = vld [vmem:[%s4181_s7 + $0x34] sm:$0xf0]  ;;  %v2615_v50 = vld [vmem:[%s4181_s7 + $0x34] sm:$0xf] }
  0x16   : > { %373 = vmatpush.bf16.msra.mxu2 %v2932_v22  ;;  %v2980_v38 = vor.u32 %v2617_v35, %v2295_v36  ;;  %v2994_v49 = vor.u32 %v2616_v48, %v2285_v47  ;;  %v2287_v51 = vld [vmem:[%s4181_s7 + $0x38] sm:$0xf0]  ;;  %v2277_v53 = vld [vmem:[%s4181_s7 + $0x20] sm:$0xf]  ;;  %v2614_v54 = vld [vmem:[%s4181_s7 + $0x24] sm:$0xf0] }
  0x17   : > { %4355 = vst [vmem:[#allocation6_spill] sm:$0xff] %v2977_v37  ;;  %v3002_v52 = vor.u32 %v2615_v50, %v2287_v51  ;;  %v2613_v55 = vld [vmem:[%s4181_s7 + $0x24] sm:$0xf]  ;;  %v3015_v56 = vor.u32 %v2614_v54, %v2277_v53  ;;  %v2279_v57 = vld [vmem:[%s4181_s7 + $0x28] sm:$0xf0]  ;;  %v150_v50 = vstv %s3121_s24  ;;  %vm968_vm5 = vcmask 1040384  }
  0x18   : > { %4356 = vst [vmem:[#allocation7_spill] sm:$0xff] %v2994_v49  ;;  %v232_v58 = vld [vmem:[%s4181_s7 + $0x90] sm:$0x77]  ;;  %v3023_v59 = vor.u32 %v2613_v55, %v2279_v57  ;;  %v2612_v63 = vld [vmem:[%s4181_s7 + $0x14] sm:$0xf0]  ;;  %s4421_s22 = sld [smem:[#allocation84_spill]] }
  0x19   : > { %347 = vmatpush.bf16.msrb.mxu0 %v2959_v31  ;;  %4357 = vst [vmem:[#allocation8_spill] sm:$0xff] %v3015_v56  ;;  %v294_v60 = vunpack.c.l.b16 %v232_v58  ;;  %v295_v61 = vunpack.c.h.b16 %v232_v58  ;;  %v2269_v62 = vld [vmem:[%s4181_s7 + $0x10] sm:$0xf]  ;;  %v2611_v2 = vld [vmem:[%s4181_s7 + $0x14] sm:$0xf]  ;;  %vm904_vm6 = vcmask 97280  }
  0x1a   : > { %374 = vmatpush.bf16.msra.mxu2 %v2944_v26  ;;  %v2261_v9 = vld [vmem:[%s4181_s7] sm:$0xf]  ;;  %v2610_v10 = vld [vmem:[%s4181_s7 + $0x4] sm:$0xf0]  ;;  %v2609_v16 = vld [vmem:[%s4181_s7 + $0x4] sm:$0xf] }
  0x1b   : > { %2256 = vmatmul.msk.f32.gmra.mxu2 %vm75_vm0, %v106_v3  ;;  %v314_v1 = vpack.c.b16 %v294_v60, %v294_v60  ;;  %v315_v3 = vpack.c.b16 %v295_v61, %v295_v61  ;;  %v2325_v11 = vld [vmem:[%s4181_s7 + $0x80] sm:$0xf]  ;;  %v3062_v12 = vor.u32 %v2610_v10, %v2261_v9  ;;  %v2626_v15 = vld [vmem:[%s4181_s7 + $0x84] sm:$0xf0]  ;;  %v2263_v17 = vld [vmem:[%s4181_s7 + $0x8] sm:$0xf0] }
  0x1c   : > { %2254 = vmatmul.msk.f32.gmra.mxu0 %vm75_vm0, %v74_v4  ;;  %v3036_v4 = vor.u32 %v2612_v63, %v2269_v62  ;;  %v3073_v19 = vor.u32 %v2626_v15, %v2325_v11  ;;  %v3075_v20 = vor.u32 %v2609_v16, %v2263_v17  ;;  %v2625_v21 = vld [vmem:[%s4181_s7 + $0x84] sm:$0xf]  ;;  %v2327_v23 = vld [vmem:[%s4181_s7 + $0x88] sm:$0xf0]  ;;  %v2391_v27 = vld [vmem:[%s4183_s9 + $0x70] sm:$0xf] }
  0x1d   : > { %348 = vmatpush.bf16.msrb.mxu0 %v2977_v37  ;;  %v3047_v8 = vsel %vm338_vm3, %v315_v3, 0  ;;  %4360 = vst [vmem:[#allocation11_spill] sm:$0xff] %v3062_v12  ;;  %v3084_v24 = vor.u32 %v2625_v21, %v2327_v23  ;;  %v2642_v28 = vld [vmem:[%s4183_s9 + $0x74] sm:$0xf0]  ;;  %v2641_v29 = vld [vmem:[%s4183_s9 + $0x74] sm:$0xf] }
  0x1e   : > { %375 = vmatpush.bf16.msra.mxu2 %v2962_v32  ;;  %4358 = vst [vmem:[#allocation9_spill] sm:$0xff] %v3036_v4  ;;  %393 = vmatpush.bf16.msrb.mxu3 %v3047_v8  ;;  %v3099_v30 = vor.u32 %v2642_v28, %v2391_v27  ;;  %v2393_v33 = vld [vmem:[%s4183_s9 + $0x78] sm:$0xf0]  ;;  %v2383_v34 = vld [vmem:[%s4183_s9 + $0x60] sm:$0xf]  ;;  %v3179_v10 = vld [vmem:[%s4180_s6 + $0x8] sm:$0xff] }
  0x1f   : > { %4359 = vst [vmem:[#allocation10_spill] sm:$0xff] %v3047_v8  ;;  %v2640_v35 = vld [vmem:[%s4183_s9 + $0x64] sm:$0xf0]  ;;  %v3110_v36 = vor.u32 %v2641_v29, %v2393_v33  ;;  %v3144_v48 = vld [vmem:[%s4179_s5] sm:$0x3]  ;;  %vm1047_vm7 = vcmask 1041408  }
  0x20   : > { %4361 = vst [vmem:[#allocation12_spill] sm:$0xff] %v3084_v24  ;;  %v2367_v53 = vld [vmem:[%s4183_s9 + $0x40] sm:$0xf]  ;;  %v2636_v54 = vld [vmem:[%s4183_s9 + $0x44] sm:$0xf0]  ;;  %v151_v58 = vmul.f32 %v150_v50, %v3144_v48  ;;  %vm964_vm8 = vcmask 408576  }
  0x21   : > { %349 = vmatpush.bf16.msrb.mxu0 %v2994_v49  ;;  %4362 = vst [vmem:[#allocation13_spill] sm:$0xff] %v3099_v30  ;;  %v2635_v55 = vld [vmem:[%s4183_s9 + $0x44] sm:$0xf]  ;;  %v2369_v57 = vld [vmem:[%s4183_s9 + $0x48] sm:$0xf0]  ;;  %v3164_v60 = vor.u32 %v2636_v54, %v2367_v53  ;;  %vm1043_vm9 = vcmask 818176  }
  0x22   : > { %376 = vmatpush.bf16.msra.mxu2 %v2980_v38  ;;  %394 = vmatpush.bf16.msrb.mxu3 %v3084_v24  ;;  %4363 = vst [vmem:[#allocation14_spill] sm:$0xff] %v3110_v36  ;;  %v3167_v61 = vor.u32 %v2635_v55, %v2369_v57  ;;  %v3174_v9 = vld [vmem:[%s4180_s6] sm:$0xff]  ;;  %v3184_v15 = vld [vmem:[%s4180_s6 + $0x10] sm:$0xf]  ;;  %v3189_v17 = vld [vmem:[%s4180_s6 + $0x18] sm:$0xf] }
  0x23   : > { %4367 = vst [vmem:[#allocation18_spill] sm:$0xff] %v3144_v48  ;;  %v2633_v50 = vld [vmem:[%s4183_s9 + $0x34] sm:$0xf]  ;;  %v2361_v54 = vld [vmem:[%s4183_s9 + $0x38] sm:$0xf0]  ;;  %s1064_s3 = sadd.f32 0.015625, %s3121_s24 }
  0x24   : > { %4369 = vst [vmem:[#allocation20_spill] sm:$0xff] %v3164_v60  ;;  %v3211_v55 = vor.u32 %v2633_v50, %v2361_v54  ;;  %v2351_v57 = vld [vmem:[%s4183_s9 + $0x20] sm:$0xf]  ;;  %s69_s21 = sadd.s32 1, %s2766_s21  }
  0x25   : > { %350 = vmatpush.bf16.msrb.mxu0 %v3015_v56  ;;  %4370 = vst [vmem:[#allocation21_spill] sm:$0xff] %v3167_v61  ;;  %v2399_v54 = vld [vmem:[%s4183_s9 + $0x80] sm:$0xf]  ;;  %p66_p0 = scmp.ge.s32.totalorder %s69_s21, 32  }
  0x26   : > { %377 = vmatpush.bf16.msra.mxu2 %v3002_v52  ;;  %4371 = vst [vmem:[#allocation22_spill] sm:$0xff] %v3174_v9 }
  0x27   : > { %4372 = vst [vmem:[#allocation23_spill] sm:$0xff] %v3179_v10 }
  0x28   : > { %4373 = vst [vmem:[#allocation24_spill] sm:$0xff] %v3184_v15 }
  0x29   : > { %351 = vmatpush.bf16.msrb.mxu0 %v3036_v4  ;;  %4374 = vst [vmem:[#allocation25_spill] sm:$0xff] %v3189_v17 }
  0x2a   : > { %378 = vmatpush.bf16.msra.mxu2 %v3023_v59  ;;  %4376 = vst [vmem:[#allocation27_spill] sm:$0xff] %v3211_v55 }
  0x2d   : > { %352 = vmatpush.bf16.msrb.mxu0 %v3062_v12 }
  0x31   : > { %564 = vmatpush.bf16.msra.mxu0 %v3110_v36 }
  0x91   : > { %v99_v39 = vpop.f32.mrf.mxu0 }
  0x96   : > { %v130_v5 = vpop.f32.mrf.mxu2 }
  0x99   : > { %v102_v41 = vpop.f32.mrf.mxu0 }
  0x9e   : > { %v133_v6 = vpop.f32.mrf.mxu2 }
  0x9f   : > { %v2698_v7 = vpack.i.bf16 %v133_v6, %v130_v5  ;;  %v2271_v5 = vld [vmem:[%s4181_s7 + $0x18] sm:$0xf0]  ;;  %v3042_v6 = vsel %vm338_vm3, %v314_v1, 0  ;;  %v153_v1 = vperm.slane %v151_v58, 0 }
  0xa0   : > { %365 = vmatpush.bf16.msra.mxu1 %v3042_v6 }
  0xa1   : > { %2699 = vrot.lane.b32.xlu0 %v2698_v7, %s2768_s29  ;;  %v3044_v7 = vor.u32 %v2611_v2, %v2271_v5  ;;  %v154_v2 = vperm.slane %v151_v58, 1  ;;  %v2632_v58 = vld [vmem:[%s4183_s9 + $0x24] sm:$0xf0] }
  0xa3   : > { %379 = vmatpush.bf16.msra.mxu2 %v3044_v7 }
  0xa4   : > { %366 = vmatpush.bf16.msra.mxu1 %v3073_v19 }
  0xa7   : > { %380 = vmatpush.bf16.msra.mxu2 %v3075_v20 }
  0xa8   : > { %536 = vmatpush.bf16.msrb.mxu1 %v3099_v30 }
 0x113   : > { %v2700_v40 = vpop.permute.xlu0 %2699 }
 0x114   : > { %v2702_v42 = vunpack.i.h.bf16 %v2700_v40  ;;  %v2701_v43 = vunpack.i.l.bf16 %v2700_v40  ;;  %v2385_v40 = vld [vmem:[%s4183_s9 + $0x68] sm:$0xf0] }
 0x116   : > { %v145_v44 = vsel %vm144_vm2, %v99_v39, %v2701_v43  ;;  %v146_v45 = vsel %vm144_vm2, %v102_v41, %v2702_v42  ;;  %v2639_v39 = vld [vmem:[%s4183_s9 + $0x64] sm:$0xf]  ;;  %v3119_v41 = vor.u32 %v2640_v35, %v2383_v34  ;;  %v2375_v43 = vld [vmem:[%s4183_s9 + $0x50] sm:$0xf] }
 0x117   : > { %v147_v46 = vpack.c.bf16 %v146_v45, %v145_v44  ;;  %v3124_v42 = vor.u32 %v2639_v39, %v2385_v40  ;;  %v2638_v44 = vld [vmem:[%s4183_s9 + $0x54] sm:$0xf0]  ;;  %v2637_v45 = vld [vmem:[%s4183_s9 + $0x54] sm:$0xf] }
 0x118   : > { %4364 = vst [vmem:[#allocation15_spill] sm:$0xff] %v3119_v41  ;;  %537 = vmatpush.bf16.msrb.mxu1 %v3119_v41  ;;  %v3139_v47 = vor.u32 %v2638_v44, %v2375_v43 }
 0x119   : > { %2257 = vmatmul.msk.bf16.vlgmr.msrb.gmra.mxu2 %vm75_vm0, %v147_v46  ;;  %2258 = vmatmul.msk.bf16.vlgmr.msra.gmra.mxu3 %vm75_vm0, %v147_v46  ;;  %4365 = vst [vmem:[#allocation16_spill] sm:$0xff] %v3124_v42  ;;  %v2377_v46 = vld [vmem:[%s4183_s9 + $0x58] sm:$0xf0] }
 0x11a   : > { %4366 = vst [vmem:[#allocation17_spill] sm:$0xff] %v3139_v47  ;;  %565 = vmatpush.bf16.msra.mxu0 %v3124_v42  ;;  %v3148_v51 = vor.u32 %v2637_v45, %v2377_v46  ;;  %v2359_v45 = vld [vmem:[%s4183_s9 + $0x30] sm:$0xf]  ;;  %v2634_v46 = vld [vmem:[%s4183_s9 + $0x34] sm:$0xf0] }
 0x11b   : > { %v3206_v53 = vor.u32 %v2634_v46, %v2359_v45 }
 0x11c   : > { %4368 = vst [vmem:[#allocation19_spill] sm:$0xff] %v3148_v51  ;;  %538 = vmatpush.bf16.msrb.mxu1 %v3139_v47 }
 0x11d   : > { %4375 = vst [vmem:[#allocation26_spill] sm:$0xff] %v3206_v53 }
 0x11e   : > { %566 = vmatpush.bf16.msra.mxu0 %v3148_v51 }
 0x120   : > { %539 = vmatpush.bf16.msrb.mxu1 %v3164_v60 }
 0x122   : > { %567 = vmatpush.bf16.msra.mxu0 %v3167_v61 }
 0x124   : > { %540 = vmatpush.bf16.msrb.mxu1 %v3206_v53 }
 0x126   : > { %568 = vmatpush.bf16.msra.mxu0 %v3211_v55 }
 0x19c   : > { %v181_v62 = vpop.f32.mrf.mxu2  ;;  %v195_v63 = vpop.f32.mrf.mxu3 }
 0x19d   : > { %v182_v3 = vadd.f32 %v181_v62, %v153_v1  ;;  %v196_v5 = vadd.f32 %v195_v63, %v154_v2  ;;  %v2631_v62 = vld [vmem:[%s4183_s9 + $0x24] sm:$0xf]  ;;  %v3224_v63 = vor.u32 %v2632_v58, %v2351_v57  ;;  %v2644_v57 = vld [vmem:[%s4183_s9 + $0x84] sm:$0xf0] }
 0x19e   : > { %v2643_v58 = vld [vmem:[%s4183_s9 + $0x84] sm:$0xf] }
 0x19f   : > { %v204_v21 = vadd.f32 %v3174_v9, %v182_v3  ;;  %v205_v23 = vadd.f32 %v3179_v10, %v196_v5  ;;  %4377 = vst [vmem:[#allocation28_spill] sm:$0xff] %v3224_v63  ;;  %541 = vmatpush.bf16.msrb.mxu1 %v3224_v63  ;;  %v2343_v3 = vld [vmem:[%s4183_s9 + $0x10] sm:$0xf]  ;;  %v2630_v5 = vld [vmem:[%s4183_s9 + $0x14] sm:$0xf0] }
 0x1a1   : > { %v208_v34 = vmax.f32 %v204_v21, 0.0  ;;  %v209_v35 = vmax.f32 %v205_v23, 0.0  ;;  %v2345_v21 = vld [vmem:[%s4183_s9 + $0x18] sm:$0xf0] }
 0x1a4   : > { %v183_v11 = vpop.f32.mrf.mxu2  ;;  %v197_v16 = vpop.f32.mrf.mxu3 }
 0x1a5   : > { %v184_v27 = vadd.f32 %v183_v11, %v153_v1  ;;  %v198_v28 = vadd.f32 %v197_v16, %v154_v2  ;;  %v2353_v1 = vld [vmem:[%s4183_s9 + $0x28] sm:$0xf0]  ;;  %v2629_v11 = vld [vmem:[%s4183_s9 + $0x14] sm:$0xf]  ;;  %v3242_v16 = vor.u32 %v2630_v5, %v2343_v3  ;;  %v2465_v5 = vld [vmem:[%s4185_s11 + $0x70] sm:$0xf] }
 0x1a6   : > { %v3229_v2 = vor.u32 %v2631_v62, %v2353_v1  ;;  %v3247_v23 = vor.u32 %v2629_v11, %v2345_v21  ;;  %v3289_v62 = vor.u32 %v2644_v57, %v2399_v54  ;;  %v2401_v1 = vld [vmem:[%s4183_s9 + $0x88] sm:$0xf0]  ;;  %v2660_v11 = vld [vmem:[%s4185_s11 + $0x74] sm:$0xf0]  ;;  %v2659_v21 = vld [vmem:[%s4185_s11 + $0x74] sm:$0xf] }
 0x1a7   : > { %v206_v29 = vadd.f32 %v3184_v15, %v184_v27  ;;  %v207_v33 = vadd.f32 %v3189_v17, %v198_v28  ;;  %4379 = vst [vmem:[#allocation30_spill] sm:$0xff] %v3242_v16  ;;  %542 = vmatpush.bf16.msrb.mxu1 %v3242_v16  ;;  %v425_v27 = vld [vmem:[%s4183_s9 + $0x90] sm:$0x77]  ;;  %v2335_v28 = vld [vmem:[%s4183_s9] sm:$0xf]  ;;  %v3294_v3 = vor.u32 %v2643_v58, %v2401_v1 }
 0x1a8   : > { %4378 = vst [vmem:[#allocation29_spill] sm:$0xff] %v3229_v2  ;;  %569 = vmatpush.bf16.msra.mxu0 %v3229_v2 }
 0x1a9   : > { %v210_v39 = vmax.f32 %v206_v29, 0.0  ;;  %v211_v40 = vmax.f32 %v207_v33, 0.0  ;;  %4380 = vst [vmem:[#allocation31_spill] sm:$0xff] %v3247_v23  ;;  %v2628_v29 = vld [vmem:[%s4183_s9 + $0x4] sm:$0xf0] }
 0x1aa   : > { %v2627_v33 = vld [vmem:[%s4183_s9 + $0x4] sm:$0xf]  ;;  %4385 = vst [vmem:[#allocation36_spill] sm:$0xff] %v3289_v62 }
 0x1ab   : > { %v212_v43 = vpack.c.bf16 %v210_v39, %v208_v34  ;;  %v213_v44 = vpack.c.bf16 %v211_v40, %v209_v35  ;;  %v487_v34 = vunpack.c.l.b16 %v425_v27  ;;  %v488_v35 = vunpack.c.h.b16 %v425_v27  ;;  %v2337_v40 = vld [vmem:[%s4183_s9 + $0x8] sm:$0xf0]  ;;  %4386 = vst [vmem:[#allocation37_spill] sm:$0xff] %v3294_v3 }
 0x1ac   : > { %570 = vmatpush.bf16.msra.mxu0 %v3247_v23  ;;  %v3263_v39 = vor.u32 %v2628_v29, %v2335_v28  ;;  %v3307_v27 = vor.u32 %v2660_v11, %v2465_v5  ;;  %v2467_v28 = vld [vmem:[%s4185_s11 + $0x78] sm:$0xf0] }
 0x1ad   : > { %353 = vmatmul.bf16.vlgmr.msrb.gmra.mxu0 %v212_v43  ;;  %2331 = vmatmul.msk.bf16.vlgmr.msra.gmra.mxu1 %vm334_vm4, %v213_v44  ;;  %v508_v45 = vpack.c.b16 %v488_v35, %v488_v35  ;;  %v3312_v29 = vor.u32 %v2659_v21, %v2467_v28 }
 0x1ae   : > { %381 = vmatmul.bf16.vlgmr.msra.gmra.mxu2 %v212_v43  ;;  %2332 = vmatmul.msk.bf16.vlgmr.msrb.gmra.mxu3 %vm334_vm4, %v213_v44  ;;  %4381 = vst [vmem:[#allocation32_spill] sm:$0xff] %v3263_v39  ;;  %v3268_v43 = vor.u32 %v2627_v33, %v2337_v40  ;;  %v507_v44 = vpack.c.b16 %v487_v34, %v487_v34  ;;  %v233_v33 = vld [vmem:[%s4182_s8] sm:$0x3] }
 0x1af   : > { %543 = vmatpush.bf16.msrb.mxu1 %v3263_v39  ;;  %v3276_v50 = vsel %vm338_vm3, %v508_v45, 0  ;;  %4387 = vst [vmem:[#allocation38_spill] sm:$0xff] %v3307_v27  ;;  %v3319_v40 = vperm.slane %v233_v33, 0  ;;  %v3322_v57 = vperm.slane %v233_v33, 1 }
 0x1b0   : > { %4382 = vst [vmem:[#allocation33_spill] sm:$0xff] %v3268_v43  ;;  %571 = vmatpush.bf16.msra.mxu0 %v3268_v43  ;;  %v3273_v46 = vsel %vm338_vm3, %v507_v44, 0  ;;  %584 = vmatpush.bf16.msrb.mxu2 %v3276_v50 }
 0x1b1   : > { %4383 = vst [vmem:[#allocation34_spill] sm:$0xff] %v3273_v46  ;;  %556 = vmatpush.bf16.msra.mxu3 %v3273_v46 }
 0x1b2   : > { %4384 = vst [vmem:[#allocation35_spill] sm:$0xff] %v3276_v50 }
 0x1b3   : > { %4388 = vst [vmem:[#allocation39_spill] sm:$0xff] %v3312_v29 }
 0x1b4   : > { %585 = vmatpush.bf16.msrb.mxu2 %v3294_v3  ;;  %4389 = vst [vmem:[#allocation40_spill] sm:$0xff] %v3319_v40 }
 0x1b5   : > { %557 = vmatpush.bf16.msra.mxu3 %v3289_v62  ;;  %4390 = vst [vmem:[#allocation41_spill] sm:$0xff] %v3322_v57 }
 0x1b8   : > { %755 = vmatpush.bf16.msra.mxu2 %v3312_v29 }
 0x1b9   : > { %727 = vmatpush.bf16.msrb.mxu3 %v3307_v27 }
 0x22a   : > { %v354_v34 = vpop.f32.mrf.mxu0  ;;  %v368_v35 = vpop.f32.mrf.mxu1 }
 0x22b   : > { %v355_v44 = vadd.f32 %v354_v34, %v3319_v40 }
 0x22d   : > { %v369_v1 = vadd.f32 %v368_v35, %v355_v44  ;;  %v2457_v44 = vld [vmem:[%s4185_s11 + $0x60] sm:$0xf] }
 0x22f   : > { %v401_v29 = vmax.f32 %v369_v1, 0.0  ;;  %v2441_v1 = vld [vmem:[%s4185_s11 + $0x40] sm:$0xf] }
 0x231   : > { %v382_v45 = vpop.f32.mrf.mxu2  ;;  %v396_v54 = vpop.f32.mrf.mxu3 }
 0x232   : > { %v356_v58 = vpop.f32.mrf.mxu0  ;;  %v370_v11 = vpop.f32.mrf.mxu1  ;;  %v383_v28 = vadd.f32 %v382_v45, %v3322_v57 }
 0x233   : > { %v357_v5 = vadd.f32 %v356_v58, %v3319_v40 }
 0x234   : > { %v397_v17 = vadd.f32 %v396_v54, %v383_v28  ;;  %v2451_v54 = vld [vmem:[%s4185_s11 + $0x58] sm:$0xf0]  ;;  %v2443_v28 = vld [vmem:[%s4185_s11 + $0x48] sm:$0xf0] }
 0x235   : > { %v371_v21 = vadd.f32 %v370_v11, %v357_v5  ;;  %v2654_v5 = vld [vmem:[%s4185_s11 + $0x44] sm:$0xf0]  ;;  %v2653_v11 = vld [vmem:[%s4185_s11 + $0x44] sm:$0xf] }
 0x236   : > { %v402_v48 = vmax.f32 %v397_v17, 0.0  ;;  %v2449_v17 = vld [vmem:[%s4185_s11 + $0x50] sm:$0xf] }
 0x237   : > { %v403_v27 = vmax.f32 %v371_v21, 0.0  ;;  %v3374_v21 = vor.u32 %v2654_v5, %v2441_v1  ;;  %v2427_v1 = vld [vmem:[%s4185_s11 + $0x28] sm:$0xf0]  ;;  %v616_v5 = vld [vmem:[%s4185_s11 + $0x90] sm:$0x77] }
 0x239   : > { %v384_v15 = vpop.f32.mrf.mxu2  ;;  %v405_v9 = vpack.c.bf16 %v403_v27, %v401_v29  ;;  %v398_v34 = vpop.f32.mrf.mxu3  ;;  %v2658_v27 = vld [vmem:[%s4185_s11 + $0x64] sm:$0xf0]  ;;  %v2655_v29 = vld [vmem:[%s4185_s11 + $0x54] sm:$0xf]  ;;  %4395 = vst [vmem:[#allocation46_spill] sm:$0xff] %v3374_v21 }
 0x23a   : > { %v385_v10 = vadd.f32 %v384_v15, %v3322_v57  ;;  %v3361_v58 = vor.u32 %v2655_v29, %v2451_v54  ;;  %v2649_v29 = vld [vmem:[%s4185_s11 + $0x24] sm:$0xf] }
 0x23b   : > { %544 = vmatmul.bf16.vlgmr.msrb.gmra.mxu1 %v405_v9  ;;  %572 = vmatmul.bf16.vlgmr.msra.gmra.mxu0 %v405_v9  ;;  %v2657_v9 = vld [vmem:[%s4185_s11 + $0x64] sm:$0xf] }
 0x23c   : > { %v399_v33 = vadd.f32 %v398_v34, %v385_v10  ;;  %v3338_v10 = vor.u32 %v2658_v27, %v2457_v44  ;;  %4394 = vst [vmem:[#allocation45_spill] sm:$0xff] %v3361_v58  ;;  %v3379_v34 = vor.u32 %v2653_v11, %v2443_v28  ;;  %v2651_v44 = vld [vmem:[%s4185_s11 + $0x34] sm:$0xf]  ;;  %v3418_v11 = vor.u32 %v2649_v29, %v2427_v1  ;;  %v2419_v1 = vld [vmem:[%s4185_s11 + $0x18] sm:$0xf0] }
 0x23d   : > { %v678_v28 = vunpack.c.l.b16 %v616_v5 }
 0x23e   : > { %v404_v3 = vmax.f32 %v399_v33, 0.0  ;;  %4391 = vst [vmem:[#allocation42_spill] sm:$0xff] %v3338_v10  ;;  %728 = vmatpush.bf16.msrb.mxu3 %v3338_v10  ;;  %v2433_v33 = vld [vmem:[%s4185_s11 + $0x30] sm:$0xf] }
 0x23f   : > { %4396 = vst [vmem:[#allocation47_spill] sm:$0xff] %v3379_v34 }
 0x240   : > { %v406_v35 = vpack.c.bf16 %v404_v3, %v402_v48  ;;  %v2459_v48 = vld [vmem:[%s4185_s11 + $0x68] sm:$0xf0]  ;;  %v2656_v3 = vld [vmem:[%s4185_s11 + $0x54] sm:$0xf0]  ;;  %4400 = vst [vmem:[#allocation51_spill] sm:$0xff] %v3418_v11 }
 0x241   : > { %v3343_v15 = vor.u32 %v2657_v9, %v2459_v48  ;;  %v3356_v45 = vor.u32 %v2656_v3, %v2449_v17  ;;  %v2435_v9 = vld [vmem:[%s4185_s11 + $0x38] sm:$0xf0]  ;;  %v2425_v17 = vld [vmem:[%s4185_s11 + $0x20] sm:$0xf]  ;;  %v2650_v3 = vld [vmem:[%s4185_s11 + $0x24] sm:$0xf0] }
 0x242   : > { %2405 = vmatmul.msk.bf16.vlgmr.msra.gmra.mxu3 %vm334_vm4, %v406_v35  ;;  %2406 = vmatmul.msk.bf16.vlgmr.msrb.gmra.mxu2 %vm334_vm4, %v406_v35  ;;  %v2652_v35 = vld [vmem:[%s4185_s11 + $0x34] sm:$0xf0]  ;;  %v3397_v48 = vor.u32 %v2651_v44, %v2435_v9  ;;  %v3410_v54 = vor.u32 %v2650_v3, %v2425_v17  ;;  %v698_v9 = vpack.c.b16 %v678_v28, %v678_v28  ;;  %v2647_v17 = vld [vmem:[%s4185_s11 + $0x14] sm:$0xf]  ;;  %v2409_v28 = vld [vmem:[%s4185_s11] sm:$0xf] }
 0x243   : > { %4392 = vst [vmem:[#allocation43_spill] sm:$0xff] %v3343_v15  ;;  %756 = vmatpush.bf16.msra.mxu2 %v3343_v15  ;;  %729 = vmatpush.bf16.msrb.mxu3 %v3356_v45  ;;  %v3392_v27 = vor.u32 %v2652_v35, %v2433_v33  ;;  %v679_v33 = vunpack.c.h.b16 %v616_v5  ;;  %v2417_v35 = vld [vmem:[%s4185_s11 + $0x10] sm:$0xf]  ;;  %v2648_v44 = vld [vmem:[%s4185_s11 + $0x14] sm:$0xf0]  ;;  %v3439_v57 = vor.u32 %v2647_v17, %v2419_v1 }
 0x244   : > { %4393 = vst [vmem:[#allocation44_spill] sm:$0xff] %v3356_v45  ;;  %v3431_v29 = vor.u32 %v2648_v44, %v2417_v35  ;;  %v3437_v5 = vsel %vm338_vm3, %v698_v9, 0  ;;  %v2473_v35 = vld [vmem:[%s4185_s11 + $0x80] sm:$0xf]  ;;  %v2662_v9 = vld [vmem:[%s4185_s11 + $0x84] sm:$0xf0] }
 0x245   : > { %4397 = vst [vmem:[#allocation48_spill] sm:$0xff] %v3392_v27  ;;  %v699_v3 = vpack.c.b16 %v679_v33, %v679_v33  ;;  %747 = vmatpush.bf16.msra.mxu1 %v3437_v5  ;;  %v2646_v33 = vld [vmem:[%s4185_s11 + $0x4] sm:$0xf0]  ;;  %v2645_v17 = vld [vmem:[%s4185_s11 + $0x4] sm:$0xf]  ;;  %v3468_v1 = vor.u32 %v2662_v9, %v2473_v35  ;;  %v3487_v35 = vld [vmem:[%s4187_s13 + $0x38] sm:$0xff] }
 0x246   : > { %4398 = vst [vmem:[#allocation49_spill] sm:$0xff] %v3397_v48  ;;  %v3457_v44 = vor.u32 %v2646_v33, %v2409_v28  ;;  %v2661_v28 = vld [vmem:[%s4185_s11 + $0x84] sm:$0xf]  ;;  %v2475_v33 = vld [vmem:[%s4185_s11 + $0x88] sm:$0xf0]  ;;  %v3493_v9 = vld [vmem:[%s4187_s13 + $0x30] sm:$0xff] }
 0x247   : > { %757 = vmatpush.bf16.msra.mxu2 %v3361_v58  ;;  %730 = vmatpush.bf16.msrb.mxu3 %v3374_v21  ;;  %4399 = vst [vmem:[#allocation50_spill] sm:$0xff] %v3410_v54  ;;  %v3442_v40 = vsel %vm338_vm3, %v699_v3, 0  ;;  %v2411_v3 = vld [vmem:[%s4185_s11 + $0x8] sm:$0xf0] }
 0x248   : > { %4401 = vst [vmem:[#allocation52_spill] sm:$0xff] %v3431_v29  ;;  %775 = vmatpush.bf16.msrb.mxu0 %v3442_v40 }
 0x249   : > { %4402 = vst [vmem:[#allocation53_spill] sm:$0xff] %v3437_v5  ;;  %748 = vmatpush.bf16.msra.mxu1 %v3468_v1 }
 0x24a   : > { %4403 = vst [vmem:[#allocation54_spill] sm:$0xff] %v3439_v57 }
 0x24b   : > { %758 = vmatpush.bf16.msra.mxu2 %v3379_v34  ;;  %731 = vmatpush.bf16.msrb.mxu3 %v3392_v27  ;;  %4404 = vst [vmem:[#allocation55_spill] sm:$0xff] %v3442_v40 }
 0x24c   : > { %4405 = vst [vmem:[#allocation56_spill] sm:$0xff] %v3457_v44 }
 0x24d   : > { %4406 = vst [vmem:[#allocation57_spill] sm:$0xff] %v3468_v1  ;;  %875 = vmatpush.bf16.msrb.mxu1 %v3487_v35 }
 0x24e   : > { %4409 = vst [vmem:[#allocation60_spill] sm:$0xff] %v3487_v35 }
 0x24f   : > { %759 = vmatpush.bf16.msra.mxu2 %v3397_v48  ;;  %732 = vmatpush.bf16.msrb.mxu3 %v3410_v54  ;;  %4410 = vst [vmem:[#allocation61_spill] sm:$0xff] %v3493_v9 }
 0x251   : > { %876 = vmatpush.bf16.msrb.mxu1 %v3493_v9 }
 0x253   : > { %760 = vmatpush.bf16.msra.mxu2 %v3418_v11  ;;  %733 = vmatpush.bf16.msrb.mxu3 %v3431_v29  ;;  %v3479_v11 = vor.u32 %v2661_v28, %v2475_v33  ;;  %v426_v28 = vld [vmem:[%s4184_s10] sm:$0x3] }
 0x254   : > { %v3501_v29 = vperm.slane %v426_v28, 1 }
 0x255   : > { %4408 = vst [vmem:[#allocation59_spill] sm:$0xff] %v3479_v11  ;;  %776 = vmatpush.bf16.msrb.mxu0 %v3479_v11 }
 0x256   : > { %4412 = vst [vmem:[#allocation63_spill] sm:$0xff] %v3501_v29 }
 0x257   : > { %761 = vmatpush.bf16.msra.mxu2 %v3439_v57  ;;  %v3470_v57 = vor.u32 %v2645_v17, %v2411_v3  ;;  %734 = vmatpush.bf16.msrb.mxu3 %v3457_v44  ;;  %v3499_v44 = vperm.slane %v426_v28, 0 }
 0x259   : > { %4407 = vst [vmem:[#allocation58_spill] sm:$0xff] %v3470_v57 }
 0x25a   : > { %4411 = vst [vmem:[#allocation62_spill] sm:$0xff] %v3499_v44 }
 0x25b   : > { %762 = vmatpush.bf16.msra.mxu2 %v3470_v57 }
 0x2b8   : > { %v545_v17 = vpop.f32.mrf.mxu1  ;;  %v573_v3 = vpop.f32.mrf.mxu0 }
 0x2b9   : > { %v546_v54 = vadd.f32 %v545_v17, %v3499_v44  ;;  %v574_v34 = vadd.f32 %v573_v3, %v3501_v29 }
 0x2c0   : > { %v547_v35 = vpop.f32.mrf.mxu1  ;;  %v575_v48 = vpop.f32.mrf.mxu0 }
 0x2c1   : > { %v548_v9 = vadd.f32 %v547_v35, %v3499_v44  ;;  %v576_v27 = vadd.f32 %v575_v48, %v3501_v29  ;;  %v617_v48 = vld [vmem:[%s4186_s12] sm:$0x3] }
 0x2c5   : > { %v559_v33 = vpop.f32.mrf.mxu3  ;;  %v587_v57 = vpop.f32.mrf.mxu2 }
 0x2c6   : > { %v560_v58 = vadd.f32 %v559_v33, %v546_v54  ;;  %v588_v21 = vadd.f32 %v587_v57, %v574_v34  ;;  %v3512_v57 = vld [vmem:[%s4187_s13 + $0x28] sm:$0xff]  ;;  %v3549_v34 = vld [vmem:[%s4187_s13] sm:$0xff] }
 0x2c7   : > { %4413 = vst [vmem:[#allocation64_spill] sm:$0xff] %v3512_v57  ;;  %877 = vmatpush.bf16.msrb.mxu1 %v3512_v57 }
 0x2c8   : > { %v592_v1 = vmax.f32 %v560_v58, 0.0  ;;  %v593_v10 = vmax.f32 %v588_v21, 0.0  ;;  %v3539_v58 = vld [vmem:[%s4187_s13 + $0x8] sm:$0xff]  ;;  %4418 = vst [vmem:[#allocation69_spill] sm:$0xff] %v3549_v34 }
 0x2c9   : > { %4417 = vst [vmem:[#allocation68_spill] sm:$0xff] %v3539_v58 }
 0x2cd   : > { %v561_v11 = vpop.f32.mrf.mxu3  ;;  %v589_v15 = vpop.f32.mrf.mxu2 }
 0x2ce   : > { %v562_v45 = vadd.f32 %v561_v11, %v548_v9  ;;  %v590_v40 = vadd.f32 %v589_v15, %v576_v27  ;;  %v3518_v15 = vld [vmem:[%s4187_s13 + $0x20] sm:$0xff]  ;;  %v3563_v9 = vperm.slane %v617_v48, 1 }
 0x2cf   : > { %4414 = vst [vmem:[#allocation65_spill] sm:$0xff] %v3518_v15  ;;  %878 = vmatpush.bf16.msrb.mxu1 %v3518_v15  ;;  %v3554_v27 = vld [vmem:[%s4187_s13 + $0x40] sm:$0xff] }
 0x2d0   : > { %v594_v28 = vmax.f32 %v562_v45, 0.0  ;;  %v595_v5 = vmax.f32 %v590_v40, 0.0  ;;  %v807_v40 = vld [vmem:[%s4187_s13 + $0x48] sm:$0x7]  ;;  %4419 = vst [vmem:[#allocation70_spill] sm:$0xff] %v3554_v27 }
 0x2d2   : > { %v596_v62 = vpack.c.bf16 %v594_v28, %v592_v1  ;;  %v597_v50 = vpack.c.bf16 %v595_v5, %v593_v10  ;;  %v849_v10 = vunpack.c.l.b16 %v807_v40  ;;  %v3561_v1 = vperm.slane %v617_v48, 0 }
 0x2d4   : > { %735 = vmatmul.bf16.vlgmr.msrb.gmra.mxu3 %v596_v62  ;;  %2479 = vmatmul.msk.bf16.vlgmr.msra.gmra.mxu1 %vm334_vm4, %v597_v50  ;;  %v859_v45 = vpack.c.b16 %v849_v10, %v849_v10 }
 0x2d5   : > { %763 = vmatmul.bf16.vlgmr.msra.gmra.mxu2 %v596_v62  ;;  %2480 = vmatmul.msk.bf16.vlgmr.msrb.gmra.mxu0 %vm334_vm4, %v597_v50  ;;  %v3524_v62 = vld [vmem:[%s4187_s13 + $0x18] sm:$0xff]  ;;  %v3530_v50 = vld [vmem:[%s4187_s13 + $0x10] sm:$0xff] }
 0x2d6   : > { %4415 = vst [vmem:[#allocation66_spill] sm:$0xff] %v3524_v62  ;;  %879 = vmatpush.bf16.msrb.mxu1 %v3524_v62  ;;  %v3542_v21 = vsel %vm338_vm3, %v859_v45, 0 }
 0x2d7   : > { %4416 = vst [vmem:[#allocation67_spill] sm:$0xff] %v3530_v50  ;;  %895 = vmatpush.bf16.msra.mxu3 %v3542_v21 }
 0x2da   : > { %880 = vmatpush.bf16.msrb.mxu1 %v3530_v50 }
 0x2db   : > { %896 = vmatpush.bf16.msra.mxu3 %v3554_v27 }
 0x2de   : > { %881 = vmatpush.bf16.msrb.mxu1 %v3539_v58 }
 0x2e2   : > { %882 = vmatpush.bf16.msrb.mxu1 %v3549_v34 }
 0x351   : > { %v750_v54 = vpop.f32.mrf.mxu1 }
 0x352   : > { %v778_v5 = vpop.f32.mrf.mxu0 }
 0x357   : > { %v736_v11 = vpop.f32.mrf.mxu3 }
 0x358   : > { %v764_v35 = vpop.f32.mrf.mxu2  ;;  %v737_v17 = vadd.f32 %v736_v11, %v3561_v1 }
 0x359   : > { %v765_v3 = vadd.f32 %v764_v35, %v3563_v9  ;;  %v752_v29 = vpop.f32.mrf.mxu1 }
 0x35a   : > { %v751_v28 = vadd.f32 %v750_v54, %v737_v17  ;;  %v780_v34 = vpop.f32.mrf.mxu0  ;;  %v938_v54 = vld [vmem:[%s4189_s15 + $0x18] sm:$0x1] }
 0x35b   : > { %v779_v45 = vadd.f32 %v778_v5, %v765_v3  ;;  %v956_v5 = vunpack.c.l.b16 %v938_v54  ;;  %v3619_v54 = vld [vmem:[%s4191_s17 + $0x28] sm:$0xff] }
 0x35c   : > { %v783_v62 = vmax.f32 %v751_v28, 0.0  ;;  %v3599_v28 = vld [vmem:[%s4421_s22] sm:$0xff] }
 0x35d   : > { %v784_v48 = vmax.f32 %v779_v45, 0.0  ;;  %v960_v35 = vpack.c.b16 %v956_v5, %v956_v5  ;;  %v3625_v5 = vld [vmem:[%s4191_s17 + $0x20] sm:$0xff] }
 0x35f   : > { %v738_v33 = vpop.f32.mrf.mxu3  ;;  %v3573_v17 = vsel %vm968_vm5, %v960_v35, 0  ;;  %v3631_v35 = vld [vmem:[%s4191_s17 + $0x18] sm:$0xff] }
 0x360   : > { %v739_v40 = vadd.f32 %v738_v33, %v3561_v1  ;;  %v766_v10 = vpop.f32.mrf.mxu2  ;;  %976 = vmatpush.bf16.msrb.mxu2 %v3573_v17 }
 0x361   : > { %v767_v44 = vadd.f32 %v766_v10, %v3563_v9  ;;  %v999_v10 = vld [vmem:[%s4191_s17 + $0x30] sm:$0x3] }
 0x362   : > { %v753_v58 = vadd.f32 %v752_v29, %v739_v40  ;;  %v3579_v29 = vld [vmem:[%s4189_s15 + $0x10] sm:$0xff]  ;;  %v3606_v40 = vld [vmem:[%s4189_s15] sm:$0xff]  ;;  %v1029_v45 = vunpack.c.l.b16 %v999_v10 }
 0x363   : > { %v781_v50 = vadd.f32 %v780_v34, %v767_v44  ;;  %v3585_v44 = vld [vmem:[%s4189_s15 + $0x8] sm:$0xff]  ;;  %4422 = vst [vmem:[#allocation72_spill] sm:$0xff] %v3606_v40 }
 0x364   : > { %v785_v15 = vmax.f32 %v753_v58, 0.0  ;;  %977 = vmatpush.bf16.msrb.mxu2 %v3579_v29  ;;  %4420 = vst [vmem:[#allocation71_spill] sm:$0xff] %v3585_v44 }
 0x365   : > { %v786_v57 = vmax.f32 %v781_v50, 0.0  ;;  %v3591_v50 = vld [vmem:[%s4188_s14] ss:$0 sm:$0xff] }
 0x366   : > { %v787_v27 = vpack.c.bf16 %v785_v15, %v783_v62 }
 0x367   : > { %v788_v11 = vpack.c.bf16 %v786_v57, %v784_v48  ;;  %v1036_v48 = vpack.c.b16 %v1029_v45, %v1029_v45 }
 0x368   : > { %883 = vmatmul.bf16.vlgmr.msrb.gmra.mxu1 %v787_v27  ;;  %978 = vmatpush.bf16.msrb.mxu2 %v3585_v44 }
 0x369   : > { %2517 = vmatmul.msk.bf16.vlgmr.msra.gmra.mxu3 %vm334_vm4, %v788_v11  ;;  %v3613_v11 = vsel %vm1047_vm7, %v1036_v48, 0 }
 0x36a   : > { %1052 = vmatpush.bf16.msrb.mxu3 %v3613_v11 }
 0x36c   : > { %979 = vmatpush.bf16.msrb.mxu2 %v3606_v40 }
 0x36e   : > { %1053 = vmatpush.bf16.msrb.mxu3 %v3619_v54 }
 0x370   : > { %1141 = vmatpush.bf16.msra.mxu2 %v2905_v13 }
 0x372   : > { %1054 = vmatpush.bf16.msrb.mxu3 %v3625_v5 }
 0x376   : > { %1055 = vmatpush.bf16.msrb.mxu3 %v3631_v35 }
 0x3e5   : > { %v884_v57 = vpop.f32.mrf.mxu1 }
 0x3e6   : > { %v885_v27 = vadd.f32 %v3591_v50, %v884_v57  ;;  %v3637_v57 = vld [vmem:[%s4191_s17 + $0x10] sm:$0xff] }
 0x3e7   : > { %4423 = vst [vmem:[#allocation73_spill] sm:$0xff] %v3637_v57  ;;  %1056 = vmatpush.bf16.msrb.mxu3 %v3637_v57 }
 0x3ec   : > { %v898_v15 = vpop.f32.mrf.mxu3 }
 0x3ed   : > { %v886_v62 = vpop.f32.mrf.mxu1  ;;  %v899_v33 = vadd.f32 %v898_v15, %v885_v27  ;;  %v3670_v27 = vld [vmem:[%s4190_s16] ss:$0 sm:$0xff] }
 0x3ee   : > { %v887_v58 = vadd.f32 %v3591_v50, %v886_v62 }
 0x3f4   : > { %v900_v34 = vpop.f32.mrf.mxu3 }
 0x3f5   : > { %v901_v3 = vadd.f32 %v900_v34, %v887_v58  ;;  %v3652_v58 = vld [vmem:[%s4191_s17 + $0x8] sm:$0xff]  ;;  %v3658_v34 = vld [vmem:[%s4191_s17] sm:$0xff] }
 0x3f6   : > { %4424 = vst [vmem:[#allocation74_spill] sm:$0xff] %v3652_v58  ;;  %1057 = vmatpush.bf16.msrb.mxu3 %v3652_v58 }
 0x3f7   : > { %2518 = vmatpush.msk.msra.mxu0 %vm165_vm1, %v901_v3  ;;  %4425 = vst [vmem:[#allocation75_spill] sm:$0xff] %v3658_v34 }
 0x3f9   : > { %926 = vmatpush.msra.mxu0 %v899_v33 }
 0x3fa   : > { %2519 = vmatmul.msk.f32.vlgmr.msra.gmra.mxu0 %vm904_vm6, %v3599_v28  ;;  %1058 = vmatpush.bf16.msrb.mxu3 %v3658_v34 }
 0x3fe   : > { %1175 = vmatpush.bf16.msra.mxu3 %v2921_v18 }
 0x402   : > { %1176 = vmatpush.bf16.msra.mxu3 %v2941_v25 }
 0x406   : > { %1177 = vmatpush.bf16.msra.mxu3 %v2959_v31 }
 0x40a   : > { %1178 = vmatpush.bf16.msra.mxu3 %v2977_v37 }
 0x40e   : > { %1179 = vmatpush.bf16.msra.mxu3 %v2994_v49 }
 0x412   : > { %1180 = vmatpush.bf16.msra.mxu3 %v3015_v56  ;;  %v4439_v56 = vld [vmem:[#allocation24_spill] sm:$0xff] }
 0x416   : > { %1181 = vmatpush.bf16.msra.mxu3 %v3036_v4 }
 0x41a   : > { %1182 = vmatpush.bf16.msra.mxu3 %v3062_v12 }
 0x477   : > { %v928_v15 = vpop.f32.mrf.mxu0 }
 0x478   : > { %v931_v62 = vpack.c.bf16 %v928_v15, %v928_v15  ;;  %v3687_v15 = vld [vmem:[%s4192_s18] ss:$0 sm:$0xff] }
 0x47a   : > { %2532 = vmatmul.msk.bf16.vlgmr.msrb.gmra.mxu2 %vm964_vm8, %v931_v62 }
 0x47b   : > { %1203 = vmatpush.bf16.msrb.mxu2 %v2932_v22 }
 0x47f   : > { %1204 = vmatpush.bf16.msrb.mxu2 %v2944_v26 }
 0x483   : > { %1205 = vmatpush.bf16.msrb.mxu2 %v2962_v32 }
 0x487   : > { %1206 = vmatpush.bf16.msrb.mxu2 %v2980_v38 }
 0x48b   : > { %1207 = vmatpush.bf16.msrb.mxu2 %v3002_v52 }
 0x48f   : > { %1208 = vmatpush.bf16.msrb.mxu2 %v3023_v59 }
 0x493   : > { %1209 = vmatpush.bf16.msrb.mxu2 %v3044_v7 }
 0x497   : > { %1210 = vmatpush.bf16.msrb.mxu2 %v3075_v20 }
 0x4fd   : > { %v981_v3 = vpop.f32.mrf.mxu2 }
 0x4fe   : > { %v982_v33 = vadd.f32 %v3670_v27, %v981_v3 }
 0x500   : > { %v985_v10 = vmax.f32 %v982_v33, 0.0 }
 0x502   : > { %v986_v45 = vpack.c.bf16 %v985_v10, %v985_v10 }
 0x504   : > { %2557 = vmatmul.msk.bf16.vlgmr.msrb.gmra.mxu3 %vm1043_vm9, %v986_v45 }
 0x505   : > { %v983_v48 = vpop.f32.mrf.mxu2  ;;  %1268 = vmatpush.bf16.msrb.mxu3 %v3110_v36 }
 0x506   : > { %v3697_v48 = vld [vmem:[%s4349_s2] sm:$0xff] }
 0x509   : > { %1269 = vmatpush.bf16.msrb.mxu3 %v3124_v42 }
 0x50d   : > { %1270 = vmatpush.bf16.msrb.mxu3 %v3148_v51 }
 0x511   : > { %1271 = vmatpush.bf16.msrb.mxu3 %v3167_v61  ;;  %v4437_v61 = vld [vmem:[#allocation25_spill] sm:$0xff] }
 0x515   : > { %1272 = vmatpush.bf16.msrb.mxu3 %v3211_v55 }
 0x519   : > { %1273 = vmatpush.bf16.msrb.mxu3 %v3229_v2 }
 0x51d   : > { %1274 = vmatpush.bf16.msrb.mxu3 %v3247_v23 }
 0x521   : > { %1275 = vmatpush.bf16.msrb.mxu3 %v3268_v43 }
 0x587   : > { %v1060_v62 = vpop.f32.mrf.mxu3 }
 0x588   : > { %v3690_v3 = vadd.f32 %v3687_v15, %v1060_v62  ;;  %v3704_v62 = vld [vmem:[%s4350_s25] sm:$0xff] }
 0x589   : > { %4427 = vst [vmem:[#allocation77_spill] sm:$0xff] %v3704_v62 }
 0x58a   : > { %4426 = vst [vmem:[#allocation76_spill] sm:$0xff] %v3690_v3  ;;  %v1065_v33 = vmul.f32 0.015625, %v3690_v3 }
 0x58c   : > { %v1066_v10 = vadd.f32 %v2762_v0, %v1065_v33  ;;  %v3717_v33 = vld [vmem:[%s4349_s2 + $0x8] sm:$0xf] }
 0x58d   : > { %4428 = vst [vmem:[#allocation78_spill] sm:$0xff] %v3717_v33 }
 0x58e   : > { %1082 = vmatpush.msrb.mxu0 %v1066_v10  ;;  %1105 = vmatpush.msra.mxu1 %v1066_v10  ;;  %v3724_v10 = vld [vmem:[%s4350_s25 + $0x8] sm:$0xf] }
 0x58f   : > { %v1062_v45 = vpop.f32.mrf.mxu3  ;;  %2560 = vmatmul.msk.f32.vlgmr.msra.gmra.mxu1 %vm75_vm0, %v3697_v48  ;;  %2558 = vmatmul.msk.f32.vlgmr.msrb.gmra.mxu0 %vm75_vm0, %v3704_v62  ;;  %4429 = vst [vmem:[#allocation79_spill] sm:$0xff] %v3724_v10 }
 0x590   : > { %1155 = vmatpush.bf16.msra.mxu0 %v2908_v14  ;;  %1195 = vmatpush.bf16.msrb.mxu1 %v3042_v6 }
 0x594   : > { %1223 = vmatpush.bf16.msrb.mxu0 %v3047_v8  ;;  %1196 = vmatpush.bf16.msrb.mxu1 %v3073_v19 }
 0x597   : > { %2561 = vmatmul.msk.f32.gmra.mxu1 %vm75_vm0, %v3717_v33  ;;  %2559 = vmatmul.msk.f32.gmra.mxu0 %vm75_vm0, %v3724_v10 }
 0x598   : > { %1224 = vmatpush.bf16.msrb.mxu0 %v3084_v24  ;;  %1240 = vmatpush.bf16.msra.mxu1 %v3099_v30 }
 0x59c   : > { %1241 = vmatpush.bf16.msra.mxu1 %v3119_v41 }
 0x5a0   : > { %1242 = vmatpush.bf16.msra.mxu1 %v3139_v47 }
 0x5a4   : > { %1243 = vmatpush.bf16.msra.mxu1 %v3164_v60 }
 0x5a8   : > { %1244 = vmatpush.bf16.msra.mxu1 %v3206_v53 }
 0x5ac   : > { %1245 = vmatpush.bf16.msra.mxu1 %v3224_v63 }
 0x5b0   : > { %1246 = vmatpush.bf16.msra.mxu1 %v3242_v16 }
 0x5b4   : > { %1247 = vmatpush.bf16.msra.mxu1 %v3263_v39  ;;  %v1124_v39 = vstv %s1064_s3 }
 0x60c   : > { %v1107_v45 = vpop.f32.mrf.mxu1  ;;  %v1084_v43 = vpop.f32.mrf.mxu0 }
 0x614   : > { %v1110_v3 = vpop.f32.mrf.mxu1  ;;  %v1087_v23 = vpop.f32.mrf.mxu0 }
 0x615   : > { %v2703_v30 = vpack.i.bf16 %v1110_v3, %v1107_v45  ;;  %v4430_v3 = vld [vmem:[#allocation35_spill] sm:$0xff]  ;;  %v4431_v45 = vld [vmem:[#allocation36_spill] sm:$0xff] }
 0x617   : > { %2704 = vrot.lane.b32.xlu0 %v2703_v30, %s2768_s29  ;;  %v4432_v30 = vld [vmem:[#allocation37_spill] sm:$0xff] }
 0x689   : > { %v2705_v41 = vpop.permute.xlu0 %2704 }
 0x68a   : > { %v2707_v47 = vunpack.i.h.bf16 %v2705_v41  ;;  %v2706_v2 = vunpack.i.l.bf16 %v2705_v41  ;;  %v4433_v41 = vld [vmem:[#allocation18_spill] sm:$0xff] }
 0x68b   : > { %v1125_v16 = vmul.f32 %v1124_v39, %v4433_v41  ;;  %v4438_v41 = vld [vmem:[#allocation22_spill] sm:$0xff] }
 0x68c   : > { %v1121_v60 = vsel %vm144_vm2, %v1084_v43, %v2706_v2  ;;  %v1122_v53 = vsel %vm144_vm2, %v1087_v23, %v2707_v47  ;;  %v4436_v23 = vld [vmem:[#allocation23_spill] sm:$0xff] }
 0x68d   : > { %v1123_v63 = vpack.c.bf16 %v1122_v53, %v1121_v60  ;;  %v3746_v43 = vperm.slane %v1125_v16, 1  ;;  %v3749_v53 = vperm.slane %v1125_v16, 0 }
 0x68f   : > { %2562 = vmatmul.msk.bf16.vlgmr.msra.gmra.mxu2 %vm75_vm0, %v1123_v63  ;;  %2563 = vmatmul.msk.bf16.vlgmr.msra.gmra.mxu0 %vm75_vm0, %v1123_v63  ;;  %4434 = vst [vmem:[#allocation18_spill] sm:$0xff] %v3746_v43 }
 0x690   : > { %1260 = vmatpush.bf16.msra.mxu0 %v3273_v46  ;;  %1288 = vmatpush.bf16.msra.mxu2 %v4430_v3  ;;  %4435 = vst [vmem:[#allocation80_spill] sm:$0xff] %v3749_v53 }
 0x694   : > { %1261 = vmatpush.bf16.msra.mxu0 %v4431_v45  ;;  %1289 = vmatpush.bf16.msra.mxu2 %v4432_v30 }
 0x70c   : > { %v1157_v2 = vpop.f32.mrf.mxu0 }
 0x70d   : > { %v1158_v47 = vadd.f32 %v1157_v2, %v3746_v43 }
 0x70f   : > { %v1163_v46 = vadd.f32 %v1158_v47, %v4436_v23  ;;  %v4440_v47 = vld [vmem:[#allocation38_spill] sm:$0xff] }
 0x710   : > { %v4449_v23 = vld [vmem:[#allocation46_spill] sm:$0xff] }
 0x711   : > { %v1167_v42 = vmax.f32 %v1163_v46, 0.0  ;;  %v4443_v46 = vld [vmem:[#allocation57_spill] sm:$0xff] }
 0x712   : > { %v1143_v60 = vpop.f32.mrf.mxu2 }
 0x713   : > { %v1144_v45 = vadd.f32 %v1143_v60, %v3749_v53 }
 0x714   : > { %v1159_v63 = vpop.f32.mrf.mxu0 }
 0x715   : > { %v1160_v55 = vadd.f32 %v1159_v63, %v3746_v43  ;;  %v1162_v12 = vadd.f32 %v1144_v45, %v4438_v41  ;;  %v4441_v63 = vld [vmem:[#allocation53_spill] sm:$0xff]  ;;  %v4448_v45 = vld [vmem:[#allocation59_spill] sm:$0xff] }
 0x716   : > { %v4452_v41 = vld [vmem:[#allocation47_spill] sm:$0xff] }
 0x717   : > { %v1165_v51 = vadd.f32 %v1160_v55, %v4437_v61  ;;  %v1166_v60 = vmax.f32 %v1162_v12, 0.0  ;;  %v4450_v12 = vld [vmem:[#allocation45_spill] sm:$0xff] }
 0x719   : > { %v1169_v36 = vmax.f32 %v1165_v51, 0.0  ;;  %v4442_v51 = vld [vmem:[#allocation42_spill] sm:$0xff] }
 0x71a   : > { %v1145_v39 = vpop.f32.mrf.mxu2 }
 0x71b   : > { %v1171_v4 = vpack.c.bf16 %v1169_v36, %v1167_v42  ;;  %v1146_v2 = vadd.f32 %v1145_v39, %v3749_v53  ;;  %v4444_v36 = vld [vmem:[#allocation39_spill] sm:$0xff]  ;;  %v4446_v42 = vld [vmem:[#allocation44_spill] sm:$0xff] }
 0x71c   : > { %v4451_v39 = vld [vmem:[#allocation48_spill] sm:$0xff] }
 0x71d   : > { %v1164_v16 = vadd.f32 %v1146_v2, %v4439_v56  ;;  %2564 = vmatmul.msk.bf16.vlgmr.msrb.gmra.mxu1 %vm334_vm4, %v1171_v4  ;;  %2565 = vmatmul.msk.bf16.vlgmr.msrb.gmra.mxu0 %vm334_vm4, %v1171_v4  ;;  %v4445_v56 = vld [vmem:[#allocation55_spill] sm:$0xff]  ;;  %v4453_v2 = vld [vmem:[#allocation50_spill] sm:$0xff] }
 0x71e   : > { %1305 = vmatpush.bf16.msrb.mxu0 %v4440_v47  ;;  %1325 = vmatpush.bf16.msrb.mxu1 %v4441_v63  ;;  %v4447_v4 = vld [vmem:[#allocation43_spill] sm:$0xff] }
 0x71f   : > { %v1168_v61 = vmax.f32 %v1164_v16, 0.0  ;;  %v4454_v16 = vld [vmem:[#allocation49_spill] sm:$0xff] }
 0x721   : > { %v1170_v55 = vpack.c.bf16 %v1168_v61, %v1166_v60  ;;  %v4455_v60 = vld [vmem:[#allocation52_spill] sm:$0xff]  ;;  %v4456_v61 = vld [vmem:[#allocation51_spill] sm:$0xff] }
 0x722   : > { %1306 = vmatpush.bf16.msrb.mxu0 %v4442_v51  ;;  %1326 = vmatpush.bf16.msrb.mxu1 %v4443_v46  ;;  %v4461_v51 = vld [vmem:[#allocation41_spill] sm:$0xff] }
 0x723   : > { %1183 = vmatmul.bf16.vlgmr.msra.gmra.mxu3 %v1170_v55  ;;  %1211 = vmatmul.bf16.vlgmr.msrb.gmra.mxu2 %v1170_v55  ;;  %v4457_v55 = vld [vmem:[#allocation56_spill] sm:$0xff] }
 0x724   : > { %1333 = vmatpush.bf16.msrb.mxu2 %v4444_v36  ;;  %1353 = vmatpush.bf16.msra.mxu3 %v4445_v56 }
 0x726   : > { %1307 = vmatpush.bf16.msrb.mxu0 %v4446_v42  ;;  %v4458_v42 = vld [vmem:[#allocation54_spill] sm:$0xff] }
 0x728   : > { %1334 = vmatpush.bf16.msrb.mxu2 %v4447_v4  ;;  %1354 = vmatpush.bf16.msra.mxu3 %v4448_v45  ;;  %v4459_v45 = vld [vmem:[#allocation58_spill] sm:$0xff]  ;;  %v4460_v4 = vld [vmem:[#allocation40_spill] sm:$0xff] }
 0x72a   : > { %1308 = vmatpush.bf16.msrb.mxu0 %v4449_v23 }
 0x72c   : > { %1335 = vmatpush.bf16.msrb.mxu2 %v4450_v12 }
 0x72e   : > { %1309 = vmatpush.bf16.msrb.mxu0 %v4451_v39 }
 0x730   : > { %1336 = vmatpush.bf16.msrb.mxu2 %v4452_v41 }
 0x732   : > { %1310 = vmatpush.bf16.msrb.mxu0 %v4453_v2 }
 0x734   : > { %1337 = vmatpush.bf16.msrb.mxu2 %v4454_v16 }
 0x736   : > { %1311 = vmatpush.bf16.msrb.mxu0 %v4455_v60 }
 0x738   : > { %1338 = vmatpush.bf16.msrb.mxu2 %v4456_v61 }
 0x73a   : > { %1312 = vmatpush.bf16.msrb.mxu0 %v4457_v55 }
 0x73c   : > { %1339 = vmatpush.bf16.msrb.mxu2 %v4458_v42 }
 0x740   : > { %1340 = vmatpush.bf16.msrb.mxu2 %v4459_v45 }
 0x79a   : > { %v1198_v23 = vpop.f32.mrf.mxu1  ;;  %v1226_v12 = vpop.f32.mrf.mxu0 }
 0x7a2   : > { %v1200_v36 = vpop.f32.mrf.mxu1  ;;  %v1228_v42 = vpop.f32.mrf.mxu0 }
 0x7a6   : > { %v1184_v46 = vpop.f32.mrf.mxu3  ;;  %v1212_v39 = vpop.f32.mrf.mxu2 }
 0x7a7   : > { %v1185_v41 = vadd.f32 %v1184_v46, %v4460_v4  ;;  %v1213_v2 = vadd.f32 %v1212_v39, %v4461_v51 }
 0x7a9   : > { %v1199_v63 = vadd.f32 %v1198_v23, %v1185_v41  ;;  %v1227_v60 = vadd.f32 %v1226_v12, %v1213_v2  ;;  %v4462_v23 = vld [vmem:[#allocation60_spill] sm:$0xff] }
 0x7ab   : > { %v1231_v43 = vmax.f32 %v1199_v63, 0.0  ;;  %v1232_v53 = vmax.f32 %v1227_v60, 0.0  ;;  %v4464_v63 = vld [vmem:[#allocation70_spill] sm:$0xff] }
 0x7ae   : > { %v1186_v56 = vpop.f32.mrf.mxu3  ;;  %v1214_v16 = vpop.f32.mrf.mxu2 }
 0x7af   : > { %v1187_v61 = vadd.f32 %v1186_v56, %v4460_v4  ;;  %v1215_v55 = vadd.f32 %v1214_v16, %v4461_v51 }
 0x7b1   : > { %v1201_v47 = vadd.f32 %v1200_v36, %v1187_v61  ;;  %v1229_v45 = vadd.f32 %v1228_v42, %v1215_v55  ;;  %v4463_v36 = vld [vmem:[#allocation61_spill] sm:$0xff] }
 0x7b3   : > { %v1233_v49 = vmax.f32 %v1201_v47, 0.0  ;;  %v1234_v37 = vmax.f32 %v1229_v45, 0.0  ;;  %v4470_v47 = vld [vmem:[#allocation69_spill] sm:$0xff]  ;;  %v4471_v45 = vld [vmem:[#allocation62_spill] sm:$0xff] }
 0x7b5   : > { %v1235_v31 = vpack.c.bf16 %v1233_v49, %v1231_v43  ;;  %v1236_v46 = vpack.c.bf16 %v1234_v37, %v1232_v53  ;;  %v4465_v49 = vld [vmem:[#allocation64_spill] sm:$0xff]  ;;  %v4466_v37 = vld [vmem:[#allocation65_spill] sm:$0xff]  ;;  %v4468_v43 = vld [vmem:[#allocation67_spill] sm:$0xff] }
 0x7b6   : > { %v4469_v53 = vld [vmem:[#allocation68_spill] sm:$0xff] }
 0x7b7   : > { %1248 = vmatmul.bf16.vlgmr.msra.gmra.mxu1 %v1235_v31  ;;  %2566 = vmatmul.msk.bf16.vlgmr.msra.gmra.mxu0 %vm334_vm4, %v1236_v46 }
 0x7b8   : > { %1276 = vmatmul.bf16.vlgmr.msrb.gmra.mxu3 %v1235_v31  ;;  %2567 = vmatmul.msk.bf16.vlgmr.msra.gmra.mxu2 %vm334_vm4, %v1236_v46  ;;  %v4467_v31 = vld [vmem:[#allocation66_spill] sm:$0xff]  ;;  %v4472_v46 = vld [vmem:[#allocation63_spill] sm:$0xff] }
 0x7b9   : > { %1370 = vmatpush.bf16.msra.mxu1 %v4462_v23  ;;  %1390 = vmatpush.bf16.msra.mxu0 %v3542_v21 }
 0x7ba   : > { %1429 = vmatpush.bf16.msra.mxu2 %v3573_v17 }
 0x7bd   : > { %1371 = vmatpush.bf16.msra.mxu1 %v4463_v36  ;;  %1391 = vmatpush.bf16.msra.mxu0 %v4464_v63 }
 0x7be   : > { %1430 = vmatpush.bf16.msra.mxu2 %v3579_v29 }
 0x7c1   : > { %1372 = vmatpush.bf16.msra.mxu1 %v4465_v49 }
 0x7c2   : > { %1431 = vmatpush.bf16.msra.mxu2 %v3585_v44 }
 0x7c5   : > { %1373 = vmatpush.bf16.msra.mxu1 %v4466_v37 }
 0x7c6   : > { %1432 = vmatpush.bf16.msra.mxu2 %v3606_v40 }
 0x7c9   : > { %1374 = vmatpush.bf16.msra.mxu1 %v4467_v31 }
 0x7cd   : > { %1375 = vmatpush.bf16.msra.mxu1 %v4468_v43 }
 0x7d1   : > { %1376 = vmatpush.bf16.msra.mxu1 %v4469_v53 }
 0x7d5   : > { %1377 = vmatpush.bf16.msra.mxu1 %v4470_v47 }
 0x834   : > { %v1249_v56 = vpop.f32.mrf.mxu1  ;;  %v1263_v42 = vpop.f32.mrf.mxu0 }
 0x835   : > { %v1250_v12 = vadd.f32 %v1249_v56, %v4471_v45 }
 0x837   : > { %v1264_v16 = vadd.f32 %v1263_v42, %v1250_v12 }
 0x839   : > { %v1296_v40 = vmax.f32 %v1264_v16, 0.0 }
 0x83b   : > { %v1277_v39 = vpop.f32.mrf.mxu3  ;;  %v1291_v41 = vpop.f32.mrf.mxu2 }
 0x83c   : > { %v1251_v2 = vpop.f32.mrf.mxu1  ;;  %v1265_v61 = vpop.f32.mrf.mxu0  ;;  %v1278_v31 = vadd.f32 %v1277_v39, %v4472_v46 }
 0x83d   : > { %v1252_v60 = vadd.f32 %v1251_v2, %v4471_v45 }
 0x83e   : > { %v1292_v44 = vadd.f32 %v1291_v41, %v1278_v31 }
 0x83f   : > { %v1266_v55 = vadd.f32 %v1265_v61, %v1252_v60 }
 0x840   : > { %v1297_v42 = vmax.f32 %v1292_v44, 0.0 }
 0x841   : > { %v1298_v43 = vmax.f32 %v1266_v55, 0.0 }
 0x843   : > { %v1300_v37 = vpack.c.bf16 %v1298_v43, %v1296_v40  ;;  %v1279_v53 = vpop.f32.mrf.mxu3  ;;  %v1293_v49 = vpop.f32.mrf.mxu2 }
 0x844   : > { %v1280_v47 = vadd.f32 %v1279_v53, %v4472_v46 }
 0x845   : > { %1313 = vmatmul.bf16.vlgmr.msrb.gmra.mxu0 %v1300_v37  ;;  %1341 = vmatmul.bf16.vlgmr.msrb.gmra.mxu2 %v1300_v37 }
 0x846   : > { %v1294_v56 = vadd.f32 %v1293_v49, %v1280_v47  ;;  %1444 = vmatpush.bf16.msrb.mxu0 %v3613_v11  ;;  %1525 = vmatpush.bf16.msrb.mxu2 %v2905_v13 }
 0x848   : > { %v1299_v12 = vmax.f32 %v1294_v56, 0.0 }
 0x84a   : > { %v1301_v2 = vpack.c.bf16 %v1299_v12, %v1297_v42  ;;  %1445 = vmatpush.bf16.msrb.mxu0 %v3619_v54 }
 0x84c   : > { %2568 = vmatmul.msk.bf16.vlgmr.msrb.gmra.mxu1 %vm334_vm4, %v1301_v2  ;;  %2569 = vmatmul.msk.bf16.vlgmr.msra.gmra.mxu3 %vm334_vm4, %v1301_v2 }
 0x84e   : > { %1446 = vmatpush.bf16.msrb.mxu0 %v3625_v5 }
 0x852   : > { %1447 = vmatpush.bf16.msrb.mxu0 %v3631_v35 }
 0x856   : > { %1448 = vmatpush.bf16.msrb.mxu0 %v3637_v57 }
 0x85a   : > { %1449 = vmatpush.bf16.msrb.mxu0 %v3652_v58 }
 0x85e   : > { %1450 = vmatpush.bf16.msrb.mxu0 %v3658_v34 }
 0x8c2   : > { %v1314_v40 = vpop.f32.mrf.mxu0 }
 0x8c3   : > { %v1315_v31 = vadd.f32 %v1314_v40, %v3561_v1 }
 0x8c8   : > { %v1342_v49 = vpop.f32.mrf.mxu2 }
 0x8c9   : > { %v1328_v44 = vpop.f32.mrf.mxu1  ;;  %v1343_v61 = vadd.f32 %v1342_v49, %v3563_v9 }
 0x8ca   : > { %v1316_v37 = vpop.f32.mrf.mxu0  ;;  %v1329_v53 = vadd.f32 %v1328_v44, %v1315_v31 }
 0x8cb   : > { %v1317_v47 = vadd.f32 %v1316_v37, %v3561_v1 }
 0x8cc   : > { %v1361_v60 = vmax.f32 %v1329_v53, 0.0 }
 0x8cf   : > { %v1356_v43 = vpop.f32.mrf.mxu3 }
 0x8d0   : > { %v1344_v16 = vpop.f32.mrf.mxu2  ;;  %v1357_v56 = vadd.f32 %v1356_v43, %v1343_v61 }
 0x8d1   : > { %v1330_v39 = vpop.f32.mrf.mxu1  ;;  %v1345_v12 = vadd.f32 %v1344_v16, %v3563_v9 }
 0x8d2   : > { %v1331_v41 = vadd.f32 %v1330_v39, %v1317_v47  ;;  %v1362_v58 = vmax.f32 %v1357_v56, 0.0 }
 0x8d4   : > { %v1363_v55 = vmax.f32 %v1331_v41, 0.0 }
 0x8d6   : > { %v1365_v42 = vpack.c.bf16 %v1363_v55, %v1361_v60 }
 0x8d7   : > { %v1358_v2 = vpop.f32.mrf.mxu3 }
 0x8d8   : > { %v1359_v34 = vadd.f32 %v1358_v2, %v1345_v12  ;;  %1378 = vmatmul.bf16.vlgmr.msra.gmra.mxu1 %v1365_v42 }
 0x8da   : > { %v1364_v40 = vmax.f32 %v1359_v34, 0.0 }
 0x8dc   : > { %v1366_v57 = vpack.c.bf16 %v1364_v40, %v1362_v58  ;;  %v4473_v40 = vld [vmem:[#allocation5_spill] sm:$0xff] }
 0x8de   : > { %2570 = vmatmul.msk.bf16.vlgmr.msra.gmra.mxu0 %vm334_vm4, %v1366_v57 }
 0x8df   : > { %1587 = vmatpush.bf16.msra.mxu0 %v2932_v22 }
 0x8e3   : > { %1588 = vmatpush.bf16.msra.mxu0 %v2944_v26 }
 0x8e7   : > { %1589 = vmatpush.bf16.msra.mxu0 %v2962_v32 }
 0x8eb   : > { %1590 = vmatpush.bf16.msra.mxu0 %v2980_v38 }
 0x8ef   : > { %1591 = vmatpush.bf16.msra.mxu0 %v3002_v52 }
 0x8f3   : > { %1592 = vmatpush.bf16.msra.mxu0 %v3023_v59 }
 0x8f7   : > { %1593 = vmatpush.bf16.msra.mxu0 %v3044_v7 }
 0x8fb   : > { %1594 = vmatpush.bf16.msra.mxu0 %v3075_v20 }
 0x955   : > { %v1379_v34 = vpop.f32.mrf.mxu1 }
 0x956   : > { %v1380_v37 = vadd.f32 %v3591_v50, %v1379_v34  ;;  %v4474_v34 = vld [vmem:[#allocation6_spill] sm:$0xff] }
 0x95b   : > { %v1393_v58 = vpop.f32.mrf.mxu0 }
 0x95c   : > { %v1394_v43 = vadd.f32 %v1393_v58, %v1380_v37  ;;  %v4475_v58 = vld [vmem:[#allocation7_spill] sm:$0xff]  ;;  %v4479_v37 = vld [vmem:[#allocation14_spill] sm:$0xff] }
 0x95d   : > { %v1381_v44 = vpop.f32.mrf.mxu1 }
 0x95e   : > { %v1382_v57 = vadd.f32 %v3591_v50, %v1381_v44  ;;  %v4476_v44 = vld [vmem:[#allocation8_spill] sm:$0xff] }
 0x963   : > { %v1395_v49 = vpop.f32.mrf.mxu0 }
 0x964   : > { %v1396_v31 = vadd.f32 %v1395_v49, %v1382_v57  ;;  %v4477_v57 = vld [vmem:[#allocation9_spill] sm:$0xff]  ;;  %v4478_v49 = vld [vmem:[#allocation11_spill] sm:$0xff] }
 0x966   : > { %2571 = vmatpush.msk.msrb.mxu3 %vm165_vm1, %v1396_v31  ;;  %v4480_v31 = vld [vmem:[#allocation16_spill] sm:$0xff] }
 0x968   : > { %1416 = vmatpush.msrb.mxu3 %v1394_v43  ;;  %v4481_v43 = vld [vmem:[#allocation19_spill] sm:$0xff] }
 0x969   : > { %2572 = vmatmul.msk.f32.vlgmr.msrb.gmra.mxu3 %vm904_vm6, %v3599_v28 }
 0x9ec   : > { %v1418_v53 = vpop.f32.mrf.mxu3 }
 0x9ed   : > { %v1421_v47 = vpack.c.bf16 %v1418_v53, %v1418_v53  ;;  %v4482_v53 = vld [vmem:[#allocation21_spill] sm:$0xff] }
 0x9ef   : > { %2573 = vmatmul.msk.bf16.vlgmr.msra.gmra.mxu2 %vm964_vm8, %v1421_v47  ;;  %v4483_v47 = vld [vmem:[#allocation27_spill] sm:$0xff] }
 0x9f0   : > { %1579 = vmatpush.bf16.msra.mxu2 %v3042_v6 }
 0x9f4   : > { %1580 = vmatpush.bf16.msra.mxu2 %v3073_v19 }
 0xa72   : > { %v1434_v39 = vpop.f32.mrf.mxu2 }
 0xa73   : > { %v1435_v41 = vadd.f32 %v3670_v27, %v1434_v39  ;;  %v4484_v39 = vld [vmem:[#allocation29_spill] sm:$0xff] }
 0xa75   : > { %v1438_v16 = vmax.f32 %v1435_v41, 0.0  ;;  %v4485_v41 = vld [vmem:[#allocation31_spill] sm:$0xff] }
 0xa77   : > { %v1439_v60 = vpack.c.bf16 %v1438_v16, %v1438_v16  ;;  %v4486_v16 = vld [vmem:[#allocation33_spill] sm:$0xff] }
 0xa79   : > { %2574 = vmatmul.msk.bf16.vlgmr.msrb.gmra.mxu0 %vm1043_vm9, %v1439_v60 }
 0xa7a   : > { %v1436_v61 = vpop.f32.mrf.mxu2  ;;  %1672 = vmatpush.bf16.msrb.mxu0 %v4430_v3 }
 0xa7e   : > { %1673 = vmatpush.bf16.msrb.mxu0 %v4432_v30 }
 0xaf6   : > { %v1452_v55 = vpop.f32.mrf.mxu0 }
 0xaf7   : > { %v3840_v56 = vadd.f32 %v3687_v15, %v1452_v55 }
 0xaf9   : > { %v1456_v42 = vmul.f32 0.015625, %v3840_v56 }
 0xafb   : > { %v1457_v12 = vadd.f32 %v2762_v0, %v1456_v42 }
 0xafd   : > { %1473 = vmatpush.msra.mxu3 %v1457_v12  ;;  %1496 = vmatpush.msrb.mxu1 %v1457_v12 }
 0xafe   : > { %v1454_v2 = vpop.f32.mrf.mxu0  ;;  %2577 = vmatmul.msk.f32.vlgmr.msrb.gmra.mxu1 %vm75_vm0, %v3697_v48  ;;  %2575 = vmatmul.msk.f32.vlgmr.msra.gmra.mxu3 %vm75_vm0, %v3704_v62 }
 0xaff   : > { %1539 = vmatpush.bf16.msrb.mxu3 %v2908_v14  ;;  %1559 = vmatpush.bf16.msra.mxu1 %v2921_v18 }
 0xb03   : > { %1607 = vmatpush.bf16.msra.mxu3 %v3047_v8  ;;  %1560 = vmatpush.bf16.msra.mxu1 %v2941_v25 }
 0xb06   : > { %2578 = vmatmul.msk.f32.gmra.mxu1 %vm75_vm0, %v3717_v33  ;;  %2576 = vmatmul.msk.f32.gmra.mxu3 %vm75_vm0, %v3724_v10  ;;  %v4506_v33 = vld [vmem:[#allocation55_spill] sm:$0xff] }
 0xb07   : > { %1608 = vmatpush.bf16.msra.mxu3 %v3084_v24  ;;  %1561 = vmatpush.bf16.msra.mxu1 %v4473_v40 }
 0xb0b   : > { %1562 = vmatpush.bf16.msra.mxu1 %v4474_v34  ;;  %v3905_v34 = vld [vmem:[%s4180_s6 + $0x10] sm:$0xf] }
 0xb0c   : > { %4501 = vst [vmem:[#allocation22_spill] sm:$0xff] %v3905_v34 }
 0xb0f   : > { %1563 = vmatpush.bf16.msra.mxu1 %v4475_v58 }
 0xb13   : > { %1564 = vmatpush.bf16.msra.mxu1 %v4476_v44  ;;  %v3897_v44 = vld [vmem:[%s4180_s6 + $0x8] sm:$0xff] }
 0xb14   : > { %4500 = vst [vmem:[#allocation25_spill] sm:$0xff] %v3897_v44 }
 0xb17   : > { %1565 = vmatpush.bf16.msra.mxu1 %v4477_v57 }
 0xb1b   : > { %1566 = vmatpush.bf16.msra.mxu1 %v4478_v49  ;;  %v3891_v49 = vld [vmem:[%s4180_s6] sm:$0xff] }
 0xb1c   : > { %4499 = vst [vmem:[#allocation23_spill] sm:$0xff] %v3891_v49 }
 0xb1f   : > { %1652 = vmatpush.bf16.msrb.mxu1 %v4479_v37 }
 0xb23   : > { %1653 = vmatpush.bf16.msrb.mxu1 %v4480_v31 }
 0xb27   : > { %1654 = vmatpush.bf16.msrb.mxu1 %v4481_v43 }
 0xb2b   : > { %1655 = vmatpush.bf16.msrb.mxu1 %v4482_v53 }
 0xb2f   : > { %1656 = vmatpush.bf16.msrb.mxu1 %v4483_v47 }
 0xb33   : > { %1657 = vmatpush.bf16.msrb.mxu1 %v4484_v39  ;;  %v4498_v39 = vld [vmem:[#allocation18_spill] sm:$0xff] }
 0xb37   : > { %1658 = vmatpush.bf16.msrb.mxu1 %v4485_v41  ;;  %v4488_v41 = vld [vmem:[#allocation34_spill] sm:$0xff] }
 0xb3b   : > { %1659 = vmatpush.bf16.msrb.mxu1 %v4486_v16  ;;  %v4487_v16 = vld [vmem:[#allocation13_spill] sm:$0xff] }
 0xb7b   : > { %v1498_v60 = vpop.f32.mrf.mxu1 }
 0xb81   : > { %v1475_v42 = vpop.f32.mrf.mxu3 }
 0xb83   : > { %v1501_v61 = vpop.f32.mrf.mxu1 }
 0xb84   : > { %v2708_v55 = vpack.i.bf16 %v1501_v61, %v1498_v60  ;;  %v4489_v60 = vld [vmem:[#allocation15_spill] sm:$0xff]  ;;  %v4490_v61 = vld [vmem:[#allocation36_spill] sm:$0xff] }
 0xb86   : > { %2709 = vrot.lane.b32.xlu1 %v2708_v55, %s2768_s29  ;;  %v4491_v55 = vld [vmem:[#allocation17_spill] sm:$0xff] }
 0xb89   : > { %v1478_v2 = vpop.f32.mrf.mxu3 }
 0xbf8   : > { %v2710_v12 = vpop.permute.xlu1 %2709 }
 0xbf9   : > { %v2712_v30 = vunpack.i.h.bf16 %v2710_v12  ;;  %v2711_v3 = vunpack.i.l.bf16 %v2710_v12  ;;  %v4492_v12 = vld [vmem:[#allocation20_spill] sm:$0xff] }
 0xbfb   : > { %v1512_v53 = vsel %vm144_vm2, %v1475_v42, %v2711_v3  ;;  %v1513_v47 = vsel %vm144_vm2, %v1478_v2, %v2712_v30  ;;  %v4493_v3 = vld [vmem:[#allocation26_spill] sm:$0xff]  ;;  %v4494_v30 = vld [vmem:[#allocation28_spill] sm:$0xff] }
 0xbfc   : > { %v1514_v43 = vpack.c.bf16 %v1513_v47, %v1512_v53  ;;  %v4495_v53 = vld [vmem:[#allocation30_spill] sm:$0xff]  ;;  %v4496_v47 = vld [vmem:[#allocation32_spill] sm:$0xff] }
 0xbfd   : > { %v4497_v2 = vld [vmem:[#allocation80_spill] sm:$0xff] }
 0xbfe   : > { %2579 = vmatmul.msk.bf16.vlgmr.msrb.gmra.mxu2 %vm75_vm0, %v1514_v43  ;;  %2580 = vmatmul.msk.bf16.vlgmr.msrb.gmra.mxu3 %vm75_vm0, %v1514_v43 }
 0xbff   : > { %1624 = vmatpush.bf16.msrb.mxu2 %v4487_v16  ;;  %1644 = vmatpush.bf16.msrb.mxu3 %v4488_v41 }
 0xc03   : > { %1625 = vmatpush.bf16.msrb.mxu2 %v4489_v60  ;;  %1645 = vmatpush.bf16.msrb.mxu3 %v4490_v61 }
 0xc07   : > { %1626 = vmatpush.bf16.msrb.mxu2 %v4491_v55 }
 0xc0b   : > { %1627 = vmatpush.bf16.msrb.mxu2 %v4492_v12 }
 0xc0f   : > { %1628 = vmatpush.bf16.msrb.mxu2 %v4493_v3 }
 0xc13   : > { %1629 = vmatpush.bf16.msrb.mxu2 %v4494_v30 }
 0xc17   : > { %1630 = vmatpush.bf16.msrb.mxu2 %v4495_v53 }
 0xc1b   : > { %1631 = vmatpush.bf16.msrb.mxu2 %v4496_v47 }
 0xc81   : > { %v1527_v43 = vpop.f32.mrf.mxu2  ;;  %v1541_v42 = vpop.f32.mrf.mxu3 }
 0xc82   : > { %v1528_v41 = vadd.f32 %v1527_v43, %v4497_v2  ;;  %v1542_v31 = vadd.f32 %v1541_v42, %v4498_v39 }
 0xc84   : > { %v1546_v57 = vadd.f32 %v3891_v49, %v1528_v41  ;;  %v1547_v58 = vadd.f32 %v3897_v44, %v1542_v31  ;;  %v3911_v41 = vld [vmem:[%s4180_s6 + $0x18] sm:$0xf] }
 0xc85   : > { %4502 = vst [vmem:[#allocation24_spill] sm:$0xff] %v3911_v41 }
 0xc86   : > { %v1550_v10 = vmax.f32 %v1546_v57, 0.0  ;;  %v1551_v31 = vmax.f32 %v1547_v58, 0.0  ;;  %v4507_v57 = vld [vmem:[#allocation42_spill] sm:$0xff]  ;;  %v4510_v58 = vld [vmem:[#allocation59_spill] sm:$0xff] }
 0xc89   : > { %v1529_v37 = vpop.f32.mrf.mxu2  ;;  %v1543_v61 = vpop.f32.mrf.mxu3 }
 0xc8a   : > { %v1530_v43 = vadd.f32 %v1529_v37, %v4497_v2  ;;  %v1544_v42 = vadd.f32 %v1543_v61, %v4498_v39  ;;  %v4503_v61 = vld [vmem:[#allocation38_spill] sm:$0xff] }
 0xc8c   : > { %v1548_v40 = vadd.f32 %v3905_v34, %v1530_v43  ;;  %v1549_v49 = vadd.f32 %v3911_v41, %v1544_v42  ;;  %v4504_v43 = vld [vmem:[#allocation39_spill] sm:$0xff]  ;;  %v4505_v34 = vld [vmem:[#allocation53_spill] sm:$0xff]  ;;  %v4513_v42 = vld [vmem:[#allocation46_spill] sm:$0xff] }
 0xc8e   : > { %v1552_v44 = vmax.f32 %v1548_v40, 0.0  ;;  %v1553_v37 = vmax.f32 %v1549_v49, 0.0  ;;  %v4508_v40 = vld [vmem:[#allocation43_spill] sm:$0xff]  ;;  %v4512_v49 = vld [vmem:[#allocation45_spill] sm:$0xff] }
 0xc90   : > { %v1554_v2 = vpack.c.bf16 %v1552_v44, %v1550_v10  ;;  %v1555_v39 = vpack.c.bf16 %v1553_v37, %v1551_v31  ;;  %v4509_v10 = vld [vmem:[#allocation57_spill] sm:$0xff]  ;;  %v4511_v44 = vld [vmem:[#allocation44_spill] sm:$0xff]  ;;  %v4514_v31 = vld [vmem:[#allocation47_spill] sm:$0xff] }
 0xc91   : > { %v4515_v37 = vld [vmem:[#allocation48_spill] sm:$0xff] }
 0xc92   : > { %1567 = vmatmul.bf16.vlgmr.msra.gmra.mxu1 %v1554_v2  ;;  %2581 = vmatmul.msk.bf16.vlgmr.msra.gmra.mxu2 %vm334_vm4, %v1555_v39 }
 0xc93   : > { %1595 = vmatmul.bf16.vlgmr.msra.gmra.mxu0 %v1554_v2  ;;  %2582 = vmatmul.msk.bf16.vlgmr.msra.gmra.mxu3 %vm334_vm4, %v1555_v39  ;;  %v4516_v2 = vld [vmem:[#allocation49_spill] sm:$0xff]  ;;  %v4517_v39 = vld [vmem:[#allocation50_spill] sm:$0xff] }
 0xc94   : > { %1689 = vmatpush.bf16.msra.mxu3 %v4503_v61  ;;  %1717 = vmatpush.bf16.msra.mxu0 %v4504_v43 }
 0xc95   : > { %1709 = vmatpush.bf16.msra.mxu2 %v4505_v34  ;;  %1737 = vmatpush.bf16.msra.mxu1 %v4506_v33 }
 0xc98   : > { %1690 = vmatpush.bf16.msra.mxu3 %v4507_v57  ;;  %1718 = vmatpush.bf16.msra.mxu0 %v4508_v40  ;;  %v4518_v57 = vld [vmem:[#allocation51_spill] sm:$0xff]  ;;  %v4519_v40 = vld [vmem:[#allocation52_spill] sm:$0xff] }
 0xc99   : > { %1710 = vmatpush.bf16.msra.mxu2 %v4509_v10  ;;  %1738 = vmatpush.bf16.msra.mxu1 %v4510_v58  ;;  %v4520_v10 = vld [vmem:[#allocation54_spill] sm:$0xff]  ;;  %v4521_v58 = vld [vmem:[#allocation56_spill] sm:$0xff] }
 0xc9c   : > { %1691 = vmatpush.bf16.msra.mxu3 %v4511_v44  ;;  %1719 = vmatpush.bf16.msra.mxu0 %v4512_v49  ;;  %v4522_v44 = vld [vmem:[#allocation58_spill] sm:$0xff] }
 0xca0   : > { %1692 = vmatpush.bf16.msra.mxu3 %v4513_v42  ;;  %1720 = vmatpush.bf16.msra.mxu0 %v4514_v31 }
 0xca4   : > { %1693 = vmatpush.bf16.msra.mxu3 %v4515_v37  ;;  %1721 = vmatpush.bf16.msra.mxu0 %v4516_v2 }
 0xca8   : > { %1694 = vmatpush.bf16.msra.mxu3 %v4517_v39  ;;  %1722 = vmatpush.bf16.msra.mxu0 %v4518_v57 }
 0xcac   : > { %1695 = vmatpush.bf16.msra.mxu3 %v4519_v40  ;;  %1723 = vmatpush.bf16.msra.mxu0 %v4520_v10 }
 0xcb0   : > { %1696 = vmatpush.bf16.msra.mxu3 %v4521_v58  ;;  %1724 = vmatpush.bf16.msra.mxu0 %v4522_v44 }
 0xd0f   : > { %v1568_v49 = vpop.f32.mrf.mxu1 }
 0xd10   : > { %v1596_v42 = vpop.f32.mrf.mxu0  ;;  %v1569_v37 = vadd.f32 %v1568_v49, %v4460_v4 }
 0xd11   : > { %v1597_v39 = vadd.f32 %v1596_v42, %v4461_v51 }
 0xd15   : > { %v1582_v33 = vpop.f32.mrf.mxu2 }
 0xd16   : > { %v1610_v31 = vpop.f32.mrf.mxu3  ;;  %v1583_v43 = vadd.f32 %v1582_v33, %v1569_v37  ;;  %v4529_v33 = vld [vmem:[#allocation68_spill] sm:$0xff] }
 0xd17   : > { %v1570_v34 = vpop.f32.mrf.mxu1  ;;  %v1611_v40 = vadd.f32 %v1610_v31, %v1597_v39 }
 0xd18   : > { %v1598_v2 = vpop.f32.mrf.mxu0  ;;  %v1571_v57 = vadd.f32 %v1570_v34, %v4460_v4  ;;  %v1615_v24 = vmax.f32 %v1583_v43, 0.0 }
 0xd19   : > { %v1599_v10 = vadd.f32 %v1598_v2, %v4461_v51  ;;  %v1616_v8 = vmax.f32 %v1611_v40, 0.0 }
 0xd1d   : > { %v1584_v61 = vpop.f32.mrf.mxu2 }
 0xd1e   : > { %v1585_v58 = vadd.f32 %v1584_v61, %v1571_v57  ;;  %v1612_v41 = vpop.f32.mrf.mxu3 }
 0xd1f   : > { %v1613_v44 = vadd.f32 %v1612_v41, %v1599_v10 }
 0xd20   : > { %v1617_v25 = vmax.f32 %v1585_v58, 0.0 }
 0xd21   : > { %v1618_v18 = vmax.f32 %v1613_v44, 0.0 }
 0xd22   : > { %v1619_v14 = vpack.c.bf16 %v1617_v25, %v1615_v24  ;;  %v4523_v25 = vld [vmem:[#allocation64_spill] sm:$0xff]  ;;  %v4527_v24 = vld [vmem:[#allocation66_spill] sm:$0xff] }
 0xd23   : > { %v1620_v62 = vpack.c.bf16 %v1618_v18, %v1616_v8  ;;  %v4524_v18 = vld [vmem:[#allocation71_spill] sm:$0xff]  ;;  %v4526_v8 = vld [vmem:[#allocation72_spill] sm:$0xff] }
 0xd24   : > { %1632 = vmatmul.bf16.vlgmr.msrb.gmra.mxu2 %v1619_v14  ;;  %1660 = vmatmul.bf16.vlgmr.msrb.gmra.mxu1 %v1619_v14  ;;  %v4525_v14 = vld [vmem:[#allocation65_spill] sm:$0xff] }
 0xd25   : > { %2583 = vmatmul.msk.bf16.vlgmr.msrb.gmra.mxu3 %vm334_vm4, %v1620_v62  ;;  %2584 = vmatmul.msk.bf16.vlgmr.msrb.gmra.mxu0 %vm334_vm4, %v1620_v62  ;;  %v4528_v62 = vld [vmem:[#allocation67_spill] sm:$0xff] }
 0xd26   : > { %1754 = vmatpush.bf16.msrb.mxu2 %v4462_v23  ;;  %1774 = vmatpush.bf16.msrb.mxu3 %v3542_v21  ;;  %v4530_v23 = vld [vmem:[#allocation69_spill] sm:$0xff] }
 0xd27   : > { %1813 = vmatpush.bf16.msrb.mxu0 %v3573_v17 }
 0xd2a   : > { %1755 = vmatpush.bf16.msrb.mxu2 %v4463_v36  ;;  %1775 = vmatpush.bf16.msrb.mxu3 %v4464_v63 }
 0xd2b   : > { %1814 = vmatpush.bf16.msrb.mxu0 %v3579_v29 }
 0xd2e   : > { %1756 = vmatpush.bf16.msrb.mxu2 %v4523_v25 }
 0xd2f   : > { %1815 = vmatpush.bf16.msrb.mxu0 %v4524_v18 }
 0xd32   : > { %1757 = vmatpush.bf16.msrb.mxu2 %v4525_v14 }
 0xd33   : > { %1816 = vmatpush.bf16.msrb.mxu0 %v4526_v8 }
 0xd36   : > { %1758 = vmatpush.bf16.msrb.mxu2 %v4527_v24  ;;  %v4531_v24 = vld [vmem:[#allocation73_spill] sm:$0xff] }
 0xd3a   : > { %1759 = vmatpush.bf16.msrb.mxu2 %v4528_v62  ;;  %v4532_v62 = vld [vmem:[#allocation74_spill] sm:$0xff] }
 0xd3e   : > { %1760 = vmatpush.bf16.msrb.mxu2 %v4529_v33  ;;  %v4533_v33 = vld [vmem:[#allocation75_spill] sm:$0xff] }
 0xd42   : > { %1761 = vmatpush.bf16.msrb.mxu2 %v4530_v23 }
 0xda1   : > { %v1661_v36 = vpop.f32.mrf.mxu1 }
 0xda2   : > { %v1675_v63 = vpop.f32.mrf.mxu0  ;;  %v1662_v29 = vadd.f32 %v1661_v36, %v4472_v46 }
 0xda4   : > { %v1676_v43 = vadd.f32 %v1675_v63, %v1662_v29 }
 0xda6   : > { %v1681_v44 = vmax.f32 %v1676_v43, 0.0 }
 0xda7   : > { %v1633_v34 = vpop.f32.mrf.mxu2 }
 0xda8   : > { %v1647_v41 = vpop.f32.mrf.mxu3  ;;  %v1634_v10 = vadd.f32 %v1633_v34, %v4471_v45 }
 0xda9   : > { %v1663_v61 = vpop.f32.mrf.mxu1 }
 0xdaa   : > { %v1664_v57 = vadd.f32 %v1663_v61, %v4472_v46  ;;  %v1677_v40 = vpop.f32.mrf.mxu0  ;;  %v1648_v31 = vadd.f32 %v1647_v41, %v1634_v10 }
 0xdac   : > { %v1678_v58 = vadd.f32 %v1677_v40, %v1664_v57  ;;  %v1680_v18 = vmax.f32 %v1648_v31, 0.0 }
 0xdae   : > { %v1683_v49 = vmax.f32 %v1678_v58, 0.0 }
 0xdaf   : > { %v1635_v42 = vpop.f32.mrf.mxu2 }
 0xdb0   : > { %v1685_v37 = vpack.c.bf16 %v1683_v49, %v1681_v44  ;;  %v1636_v2 = vadd.f32 %v1635_v42, %v4471_v45  ;;  %v1649_v39 = vpop.f32.mrf.mxu3 }
 0xdb2   : > { %v1650_v25 = vadd.f32 %v1649_v39, %v1636_v2  ;;  %2585 = vmatmul.msk.bf16.vlgmr.msra.gmra.mxu2 %vm334_vm4, %v1685_v37  ;;  %2586 = vmatmul.msk.bf16.vlgmr.msra.gmra.mxu1 %vm334_vm4, %v1685_v37 }
 0xdb4   : > { %v1682_v14 = vmax.f32 %v1650_v25, 0.0 }
 0xdb6   : > { %v1684_v8 = vpack.c.bf16 %v1682_v14, %v1680_v18 }
 0xdb8   : > { %1697 = vmatmul.bf16.vlgmr.msra.gmra.mxu3 %v1684_v8  ;;  %1725 = vmatmul.bf16.vlgmr.msra.gmra.mxu0 %v1684_v8 }
 0xdb9   : > { %1828 = vmatpush.bf16.msra.mxu3 %v3613_v11  ;;  %1917 = vmatpush.bf16.msra.mxu0 %v2905_v13 }
 0xdbd   : > { %1829 = vmatpush.bf16.msra.mxu3 %v3619_v54 }
 0xdc1   : > { %1830 = vmatpush.bf16.msra.mxu3 %v3625_v5 }
 0xdc5   : > { %1831 = vmatpush.bf16.msra.mxu3 %v3631_v35 }
 0xdc9   : > { %1832 = vmatpush.bf16.msra.mxu3 %v4531_v24 }
 0xdcd   : > { %1833 = vmatpush.bf16.msra.mxu3 %v4532_v62 }
 0xdd1   : > { %1834 = vmatpush.bf16.msra.mxu3 %v4533_v33 }
 0xe2f   : > { %v1740_v23 = vpop.f32.mrf.mxu1 }
 0xe35   : > { %v1726_v36 = vpop.f32.mrf.mxu0  ;;  %v1712_v29 = vpop.f32.mrf.mxu2 }
 0xe36   : > { %v1727_v63 = vadd.f32 %v1726_v36, %v3563_v9 }
 0xe37   : > { %v1742_v61 = vpop.f32.mrf.mxu1 }
 0xe38   : > { %v1741_v13 = vadd.f32 %v1740_v23, %v1727_v63  ;;  %v4544_v63 = vld [vmem:[#allocation6_spill] sm:$0xff] }
 0xe3a   : > { %v1746_v43 = vmax.f32 %v1741_v13, 0.0  ;;  %v4548_v13 = vld [vmem:[#allocation11_spill] sm:$0xff] }
 0xe3b   : > { %v1698_v34 = vpop.f32.mrf.mxu3 }
 0xe3c   : > { %v1699_v5 = vadd.f32 %v1698_v34, %v3561_v1  ;;  %v4546_v34 = vld [vmem:[#allocation8_spill] sm:$0xff] }
 0xe3d   : > { %v1728_v41 = vpop.f32.mrf.mxu0  ;;  %v1714_v49 = vpop.f32.mrf.mxu2 }
 0xe3e   : > { %v1729_v54 = vadd.f32 %v1728_v41, %v3563_v9  ;;  %v1713_v10 = vadd.f32 %v1712_v29, %v1699_v5  ;;  %v4545_v29 = vld [vmem:[#allocation7_spill] sm:$0xff]  ;;  %v4547_v41 = vld [vmem:[#allocation9_spill] sm:$0xff] }
 0xe3f   : > { %v4551_v5 = vld [vmem:[#allocation19_spill] sm:$0xff] }
 0xe40   : > { %v1743_v35 = vadd.f32 %v1742_v61, %v1729_v54  ;;  %v1745_v31 = vmax.f32 %v1713_v10, 0.0  ;;  %v4549_v54 = vld [vmem:[#allocation14_spill] sm:$0xff]  ;;  %v4550_v61 = vld [vmem:[#allocation16_spill] sm:$0xff]  ;;  %v4556_v10 = vld [vmem:[#allocation33_spill] sm:$0xff] }
 0xe42   : > { %v1748_v57 = vmax.f32 %v1743_v35, 0.0  ;;  %v4552_v35 = vld [vmem:[#allocation21_spill] sm:$0xff] }
 0xe43   : > { %v1700_v40 = vpop.f32.mrf.mxu3 }
 0xe44   : > { %v1750_v58 = vpack.c.bf16 %v1748_v57, %v1746_v43  ;;  %v1701_v44 = vadd.f32 %v1700_v40, %v3561_v1  ;;  %v4553_v43 = vld [vmem:[#allocation27_spill] sm:$0xff]  ;;  %v4554_v57 = vld [vmem:[#allocation29_spill] sm:$0xff] }
 0xe45   : > { %v4555_v40 = vld [vmem:[#allocation31_spill] sm:$0xff] }
 0xe46   : > { %v1715_v42 = vadd.f32 %v1714_v49, %v1701_v44  ;;  %2587 = vmatmul.msk.bf16.vlgmr.msrb.gmra.mxu3 %vm334_vm4, %v1750_v58 }
 0xe47   : > { %1971 = vmatpush.bf16.msrb.mxu3 %v3042_v6 }
 0xe48   : > { %v1747_v37 = vmax.f32 %v1715_v42, 0.0 }
 0xe4a   : > { %v1749_v2 = vpack.c.bf16 %v1747_v37, %v1745_v31 }
 0xe4b   : > { %1972 = vmatpush.bf16.msrb.mxu3 %v3073_v19 }
 0xe4c   : > { %1762 = vmatmul.bf16.vlgmr.msrb.gmra.mxu2 %v1749_v2 }
 0xec9   : > { %v1777_v39 = vpop.f32.mrf.mxu3 }
 0xecf   : > { %v1763_v25 = vpop.f32.mrf.mxu2 }
 0xed0   : > { %v1764_v14 = vadd.f32 %v3591_v50, %v1763_v25 }
 0xed1   : > { %v1779_v24 = vpop.f32.mrf.mxu3 }
 0xed2   : > { %v1778_v33 = vadd.f32 %v1777_v39, %v1764_v14 }
 0xed7   : > { %v1765_v18 = vpop.f32.mrf.mxu2 }
 0xed8   : > { %v1766_v8 = vadd.f32 %v3591_v50, %v1765_v18 }
 0xeda   : > { %v1780_v62 = vadd.f32 %v1779_v24, %v1766_v8  ;;  %v4557_v8 = vld [vmem:[#allocation34_spill] sm:$0xff]  ;;  %v4558_v24 = vld [vmem:[#allocation35_spill] sm:$0xff] }
 0xedc   : > { %2588 = vmatpush.msk.msrb.mxu1 %vm165_vm1, %v1780_v62  ;;  %v4559_v62 = vld [vmem:[#allocation36_spill] sm:$0xff] }
 0xede   : > { %1800 = vmatpush.msrb.mxu1 %v1778_v33  ;;  %v4560_v33 = vld [vmem:[#allocation37_spill] sm:$0xff] }
 0xedf   : > { %2589 = vmatmul.msk.f32.vlgmr.msrb.gmra.mxu1 %vm904_vm6, %v3599_v28 }
 0xf5c   : > { %v1802_v6 = vpop.f32.mrf.mxu1 }
 0xf5d   : > { %v1805_v23 = vpack.c.bf16 %v1802_v6, %v1802_v6 }
 0xf5f   : > { %2590 = vmatmul.msk.bf16.vlgmr.msrb.gmra.mxu0 %vm964_vm8, %v1805_v23  ;;  %v2729_v23 = vld [vmem:[%s4179_s5] sm:$0x3] }
 0xf60   : > { %1979 = vmatpush.bf16.msrb.mxu0 %v2932_v22 }
 0xf64   : > { %1980 = vmatpush.bf16.msrb.mxu0 %v2944_v26  ;;  %v2232_v26 = vmul.f32 2.0, %v3840_v56  ;;  %v4536_v56 = vld [vmem:[#allocation2_spill] sm:$0xff] }
 0xf68   : > { %1981 = vmatpush.bf16.msrb.mxu0 %v2962_v32 }
 0xf6c   : > { %1982 = vmatpush.bf16.msrb.mxu0 %v2980_v38 }
 0xf70   : > { %1983 = vmatpush.bf16.msrb.mxu0 %v3002_v52  ;;  %v4534_v52 = vld [vmem:[#allocation76_spill] sm:$0xff] }
 0xf74   : > { %1984 = vmatpush.bf16.msrb.mxu0 %v3023_v59  ;;  %v2233_v59 = vadd.f32 %v2232_v26, %v4534_v52 }
 0xf78   : > { %1985 = vmatpush.bf16.msrb.mxu0 %v3044_v7 }
 0xf7c   : > { %1986 = vmatpush.bf16.msrb.mxu0 %v3075_v20 }
 0xfdc   : > { %v1818_v19 = vpop.f32.mrf.mxu0 }
 0xfdd   : > { %v1819_v50 = vadd.f32 %v3670_v27, %v1818_v19 }
 0xfdf   : > { %v1822_v28 = vmax.f32 %v1819_v50, 0.0 }
 0xfe1   : > { %v1823_v36 = vpack.c.bf16 %v1822_v28, %v1822_v28 }
 0xfe3   : > { %2591 = vmatmul.msk.bf16.vlgmr.msra.gmra.mxu3 %vm1043_vm9, %v1823_v36 }
 0xfe4   : > { %v1820_v22 = vpop.f32.mrf.mxu0  ;;  %2016 = vmatpush.bf16.msra.mxu3 %v4487_v16 }
 0xfe8   : > { %2017 = vmatpush.bf16.msra.mxu3 %v4489_v60 }
 0xfec   : > { %2018 = vmatpush.bf16.msra.mxu3 %v4491_v55  ;;  %v4535_v55 = vld [vmem:[#allocation77_spill] sm:$0xff] }
 0xff0   : > { %2019 = vmatpush.bf16.msra.mxu3 %v4492_v12  ;;  %v4538_v12 = vld [vmem:[#allocation10_spill] sm:$0xff] }
 0xff4   : > { %2020 = vmatpush.bf16.msra.mxu3 %v4493_v3  ;;  %v4539_v3 = vld [vmem:[#allocation4_spill] sm:$0xff] }
 0xff8   : > { %2021 = vmatpush.bf16.msra.mxu3 %v4494_v30  ;;  %v4540_v30 = vld [vmem:[#allocation12_spill] sm:$0xff] }
 0xffc   : > { %2022 = vmatpush.bf16.msra.mxu3 %v4495_v53  ;;  %v4541_v53 = vld [vmem:[#allocation78_spill] sm:$0xff] }
0x1000   : > { %2023 = vmatpush.bf16.msra.mxu3 %v4496_v47  ;;  %v4542_v47 = vld [vmem:[#allocation79_spill] sm:$0xff] }
0x1066   : > { %v1836_v32 = vpop.f32.mrf.mxu3 }
0x1067   : > { %v1837_v38 = vadd.f32 %v3687_v15, %v1836_v32  ;;  %v4537_v15 = vld [vmem:[#allocation3_spill] sm:$0xff] }
0x1069   : > { %v1841_v7 = vmul.f32 0.03125, %v1837_v38  ;;  %v2234_v20 = vmul.f32 2.0, %v1837_v38 }
0x106b   : > { %v1842_v27 = vadd.f32 %v2762_v0, %v1841_v7  ;;  %v4005_v16 = vadd.f32 %v2234_v20, %v2233_v59  ;;  %v4561_v59 = vld [vmem:[#allocation23_spill] sm:$0xff]  ;;  %v4562_v20 = vld [vmem:[#allocation25_spill] sm:$0xff] }
0x106d   : > { %1858 = vmatpush.msra.mxu1 %v1842_v27  ;;  %1881 = vmatpush.msra.mxu2 %v1842_v27 }
0x106e   : > { %v1838_v60 = vpop.f32.mrf.mxu3  ;;  %2594 = vmatmul.msk.f32.vlgmr.msra.gmra.mxu2 %vm75_vm0, %v3697_v48  ;;  %2592 = vmatmul.msk.f32.vlgmr.msra.gmra.mxu1 %vm75_vm0, %v4535_v55  ;;  %v4543_v48 = vld [vmem:[#allocation5_spill] sm:$0xff] }
0x106f   : > { %1931 = vmatpush.bf16.msrb.mxu1 %v4536_v56  ;;  %1951 = vmatpush.bf16.msrb.mxu2 %v4537_v15  ;;  %v4563_v56 = vld [vmem:[#allocation22_spill] sm:$0xff] }
0x1073   : > { %1999 = vmatpush.bf16.msra.mxu1 %v4538_v12  ;;  %1952 = vmatpush.bf16.msrb.mxu2 %v4539_v3  ;;  %v4564_v12 = vld [vmem:[#allocation24_spill] sm:$0xff] }
0x1076   : > { %2595 = vmatmul.msk.f32.gmra.mxu2 %vm75_vm0, %v4541_v53  ;;  %2593 = vmatmul.msk.f32.gmra.mxu1 %vm75_vm0, %v4542_v47 }
0x1077   : > { %2000 = vmatpush.bf16.msra.mxu1 %v4540_v30  ;;  %1953 = vmatpush.bf16.msrb.mxu2 %v4543_v48 }
0x107b   : > { %1954 = vmatpush.bf16.msrb.mxu2 %v4544_v63 }
0x107f   : > { %1955 = vmatpush.bf16.msrb.mxu2 %v4545_v29 }
0x1083   : > { %1956 = vmatpush.bf16.msrb.mxu2 %v4546_v34  ;;  %v4565_v34 = vld [vmem:[#allocation38_spill] sm:$0xff] }
0x1087   : > { %1957 = vmatpush.bf16.msrb.mxu2 %v4547_v41  ;;  %v4566_v41 = vld [vmem:[#allocation39_spill] sm:$0xff] }
0x108b   : > { %1958 = vmatpush.bf16.msrb.mxu2 %v4548_v13  ;;  %v4567_v13 = vld [vmem:[#allocation53_spill] sm:$0xff] }
0x108f   : > { %2044 = vmatpush.bf16.msra.mxu2 %v4549_v54  ;;  %v4568_v54 = vld [vmem:[#allocation55_spill] sm:$0xff] }
0x1093   : > { %2045 = vmatpush.bf16.msra.mxu2 %v4550_v61  ;;  %v4569_v61 = vld [vmem:[#allocation42_spill] sm:$0xff] }
0x1097   : > { %2046 = vmatpush.bf16.msra.mxu2 %v4551_v5  ;;  %v4570_v5 = vld [vmem:[#allocation43_spill] sm:$0xff] }
0x109b   : > { %2047 = vmatpush.bf16.msra.mxu2 %v4552_v35  ;;  %v4571_v35 = vld [vmem:[#allocation57_spill] sm:$0xff] }
0x109f   : > { %2048 = vmatpush.bf16.msra.mxu2 %v4553_v43  ;;  %v4572_v43 = vld [vmem:[#allocation59_spill] sm:$0xff] }
0x10a3   : > { %2049 = vmatpush.bf16.msra.mxu2 %v4554_v57  ;;  %v4573_v57 = vld [vmem:[#allocation44_spill] sm:$0xff] }
0x10a7   : > { %2050 = vmatpush.bf16.msra.mxu2 %v4555_v40  ;;  %v4574_v40 = vld [vmem:[#allocation45_spill] sm:$0xff] }
0x10ab   : > { %2051 = vmatpush.bf16.msra.mxu2 %v4556_v10  ;;  %v4575_v10 = vld [vmem:[#allocation46_spill] sm:$0xff] }
0x10eb   : > { %v1860_v42 = vpop.f32.mrf.mxu1 }
0x10f1   : > { %v1883_v58 = vpop.f32.mrf.mxu2 }
0x10f3   : > { %v1863_v37 = vpop.f32.mrf.mxu1 }
0x10f9   : > { %v1886_v44 = vpop.f32.mrf.mxu2 }
0x10fa   : > { %v2713_v49 = vpack.i.bf16 %v1886_v44, %v1883_v58  ;;  %v4576_v58 = vld [vmem:[#allocation47_spill] sm:$0xff]  ;;  %v4577_v44 = vld [vmem:[#allocation48_spill] sm:$0xff] }
0x10fc   : > { %2714 = vrot.lane.b32.xlu1 %v2713_v49, %s2768_s29  ;;  %s1840_s29 = sadd.f32 0.03125, %s3121_s24  ;;  %v4578_v49 = vld [vmem:[#allocation49_spill] sm:$0xff] }
0x10fe   : > { %v1900_v6 = vstv %s1840_s29 }
0x10ff   : > { %v1901_v19 = vmul.f32 %v2729_v23, %v1900_v6 }
0x1101   : > { %v1903_v36 = vperm.slane %v1901_v19, 0  ;;  %v1904_v22 = vperm.slane %v1901_v19, 1 }
0x116e   : > { %v2715_v31 = vpop.permute.xlu1 %2714 }
0x116f   : > { %v2717_v2 = vunpack.i.h.bf16 %v2715_v31  ;;  %v2716_v39 = vunpack.i.l.bf16 %v2715_v31  ;;  %v4580_v31 = vld [vmem:[#allocation51_spill] sm:$0xff] }
0x1171   : > { %v1897_v25 = vsel %vm144_vm2, %v1860_v42, %v2716_v39  ;;  %v1898_v18 = vsel %vm144_vm2, %v1863_v37, %v2717_v2  ;;  %v4579_v42 = vld [vmem:[#allocation50_spill] sm:$0xff]  ;;  %v4581_v37 = vld [vmem:[#allocation52_spill] sm:$0xff] }
0x1172   : > { %v1899_v14 = vpack.c.bf16 %v1898_v18, %v1897_v25  ;;  %v4582_v2 = vld [vmem:[#allocation54_spill] sm:$0xff]  ;;  %v4583_v39 = vld [vmem:[#allocation56_spill] sm:$0xff] }
0x1173   : > { %v4584_v25 = vld [vmem:[#allocation58_spill] sm:$0xff] }
0x1174   : > { %2596 = vmatmul.msk.bf16.vlgmr.msra.gmra.mxu0 %vm75_vm0, %v1899_v14  ;;  %2597 = vmatmul.msk.bf16.vlgmr.msrb.gmra.mxu1 %vm75_vm0, %v1899_v14 }
0x1175   : > { %2036 = vmatpush.bf16.msrb.mxu1 %v4557_v8  ;;  %2064 = vmatpush.bf16.msra.mxu0 %v4558_v24 }
0x1179   : > { %2037 = vmatpush.bf16.msrb.mxu1 %v4559_v62  ;;  %2065 = vmatpush.bf16.msra.mxu0 %v4560_v33 }
0x11f1   : > { %v1919_v50 = vpop.f32.mrf.mxu0  ;;  %v1933_v28 = vpop.f32.mrf.mxu1 }
0x11f2   : > { %v1920_v26 = vadd.f32 %v1919_v50, %v1903_v36  ;;  %v1934_v32 = vadd.f32 %v1933_v28, %v1904_v22 }
0x11f4   : > { %v1938_v7 = vadd.f32 %v4561_v59, %v1920_v26  ;;  %v1939_v27 = vadd.f32 %v4562_v20, %v1934_v32 }
0x11f6   : > { %v1942_v30 = vmax.f32 %v1938_v7, 0.0  ;;  %v1943_v53 = vmax.f32 %v1939_v27, 0.0 }
0x11f9   : > { %v1921_v38 = vpop.f32.mrf.mxu0  ;;  %v1935_v52 = vpop.f32.mrf.mxu1 }
0x11fa   : > { %v1922_v60 = vadd.f32 %v1921_v38, %v1903_v36  ;;  %v1936_v55 = vadd.f32 %v1935_v52, %v1904_v22 }
0x11fc   : > { %v1940_v15 = vadd.f32 %v4563_v56, %v1922_v60  ;;  %v1941_v3 = vadd.f32 %v4564_v12, %v1936_v55  ;;  %v2731_v60 = vld [vmem:[%s4187_s13 + $0x40] sm:$0xff]  ;;  %v2732_v55 = vld [vmem:[%s4189_s15 + $0x10] sm:$0xff]  ;;  %v2735_v56 = vld [vmem:[%s4187_s13 + $0x28] sm:$0xff] }
0x11fd   : > { %v2737_v12 = vld [vmem:[%s4187_s13 + $0x20] sm:$0xff] }
0x11fe   : > { %v1944_v47 = vmax.f32 %v1940_v15, 0.0  ;;  %v1945_v48 = vmax.f32 %v1941_v3, 0.0  ;;  %v2736_v15 = vld [vmem:[%s4189_s15] sm:$0xff]  ;;  %v2738_v3 = vld [vmem:[%s4187_s13 + $0x18] sm:$0xff] }
0x1200   : > { %v1946_v63 = vpack.c.bf16 %v1944_v47, %v1942_v30  ;;  %v1947_v29 = vpack.c.bf16 %v1945_v48, %v1943_v53  ;;  %v2739_v30 = vld [vmem:[%s4187_s13 + $0x10] sm:$0xff]  ;;  %v2740_v53 = vld [vmem:[%s4187_s13 + $0x8] sm:$0xff]  ;;  %v2741_v47 = vld [vmem:[%s4187_s13] sm:$0xff] }
0x1202   : > { %1959 = vmatmul.bf16.vlgmr.msrb.gmra.mxu2 %v1946_v63  ;;  %2598 = vmatmul.msk.bf16.vlgmr.msrb.gmra.mxu3 %vm334_vm4, %v1947_v29 }
0x1203   : > { %1987 = vmatmul.bf16.vlgmr.msrb.gmra.mxu0 %v1946_v63  ;;  %2599 = vmatmul.msk.bf16.vlgmr.msra.gmra.mxu1 %vm334_vm4, %v1947_v29 }
0x1204   : > { %2081 = vmatpush.bf16.msra.mxu1 %v4565_v34  ;;  %2109 = vmatpush.bf16.msrb.mxu0 %v4566_v41 }
0x1205   : > { %2101 = vmatpush.bf16.msrb.mxu3 %v4567_v13  ;;  %2129 = vmatpush.bf16.msrb.mxu2 %v4568_v54 }
0x1208   : > { %2082 = vmatpush.bf16.msra.mxu1 %v4569_v61  ;;  %2110 = vmatpush.bf16.msrb.mxu0 %v4570_v5 }
0x1209   : > { %2102 = vmatpush.bf16.msrb.mxu3 %v4571_v35  ;;  %2130 = vmatpush.bf16.msrb.mxu2 %v4572_v43 }
0x120c   : > { %2083 = vmatpush.bf16.msra.mxu1 %v4573_v57  ;;  %2111 = vmatpush.bf16.msrb.mxu0 %v4574_v40 }
0x1210   : > { %2084 = vmatpush.bf16.msra.mxu1 %v4575_v10  ;;  %2112 = vmatpush.bf16.msrb.mxu0 %v4576_v58 }
0x1214   : > { %2085 = vmatpush.bf16.msra.mxu1 %v4577_v44  ;;  %2113 = vmatpush.bf16.msrb.mxu0 %v4578_v49 }
0x1218   : > { %2086 = vmatpush.bf16.msra.mxu1 %v4579_v42  ;;  %2114 = vmatpush.bf16.msrb.mxu0 %v4580_v31 }
0x121c   : > { %2087 = vmatpush.bf16.msra.mxu1 %v4581_v37  ;;  %2115 = vmatpush.bf16.msrb.mxu0 %v4582_v2 }
0x1220   : > { %2088 = vmatpush.bf16.msra.mxu1 %v4583_v39  ;;  %2116 = vmatpush.bf16.msrb.mxu0 %v4584_v25  ;;  %v2744_v25 = vld [vmem:[%s4191_s17 + $0x18] sm:$0xff] }
0x1280   : > { %v1988_v18 = vpop.f32.mrf.mxu0  ;;  %v2002_v14 = vpop.f32.mrf.mxu1 }
0x1281   : > { %v1989_v8 = vadd.f32 %v1988_v18, %v4461_v51  ;;  %v2745_v18 = vld [vmem:[%s4191_s17 + $0x10] sm:$0xff] }
0x1283   : > { %v2003_v6 = vadd.f32 %v2002_v14, %v1989_v8  ;;  %v2747_v14 = vld [vmem:[%s4191_s17] sm:$0xff] }
0x1285   : > { %v1960_v24 = vpop.f32.mrf.mxu2  ;;  %v1974_v62 = vpop.f32.mrf.mxu3  ;;  %v2008_v36 = vmax.f32 %v2003_v6, 0.0 }
0x1286   : > { %v1961_v19 = vadd.f32 %v1960_v24, %v4460_v4 }
0x1288   : > { %v1990_v33 = vpop.f32.mrf.mxu0  ;;  %v2004_v50 = vpop.f32.mrf.mxu1  ;;  %v1975_v32 = vadd.f32 %v1974_v62, %v1961_v19 }
0x1289   : > { %v1991_v23 = vadd.f32 %v1990_v33, %v4461_v51 }
0x128a   : > { %v2007_v20 = vmax.f32 %v1975_v32, 0.0 }
0x128b   : > { %v2005_v28 = vadd.f32 %v2004_v50, %v1991_v23 }
0x128d   : > { %v2010_v22 = vmax.f32 %v2005_v28, 0.0  ;;  %v1962_v26 = vpop.f32.mrf.mxu2  ;;  %v1976_v59 = vpop.f32.mrf.mxu3 }
0x128e   : > { %v1963_v38 = vadd.f32 %v1962_v26, %v4460_v4  ;;  %v2730_v4 = vld [vmem:[%s4187_s13 + $0x38] sm:$0xff] }
0x128f   : > { %v2012_v52 = vpack.c.bf16 %v2010_v22, %v2008_v36 }
0x1290   : > { %v1977_v7 = vadd.f32 %v1976_v59, %v1963_v38 }
0x1291   : > { %2600 = vmatmul.msk.bf16.vlgmr.msrb.gmra.mxu1 %vm334_vm4, %v2012_v52  ;;  %2601 = vmatmul.msk.bf16.vlgmr.msra.gmra.mxu0 %vm334_vm4, %v2012_v52 }
0x1292   : > { %v2009_v27 = vmax.f32 %v1977_v7, 0.0  ;;  %2166 = vmatpush.bf16.msrb.mxu1 %v3542_v21  ;;  %2205 = vmatpush.bf16.msra.mxu0 %v3573_v17  ;;  %v2733_v21 = vld [vmem:[%s4187_s13 + $0x30] sm:$0xff]  ;;  %v2734_v17 = vld [vmem:[%s4189_s15 + $0x8] sm:$0xff] }
0x1294   : > { %v2011_v51 = vpack.c.bf16 %v2009_v27, %v2007_v20 }
0x1296   : > { %2024 = vmatmul.bf16.vlgmr.msra.gmra.mxu3 %v2011_v51  ;;  %2052 = vmatmul.bf16.vlgmr.msra.gmra.mxu2 %v2011_v51 }
0x1297   : > { %2146 = vmatpush.bf16.msra.mxu3 %v2730_v4  ;;  %2167 = vmatpush.bf16.msrb.mxu1 %v2731_v60 }
0x1298   : > { %2206 = vmatpush.bf16.msra.mxu0 %v2732_v55 }
0x129b   : > { %2147 = vmatpush.bf16.msra.mxu3 %v2733_v21 }
0x129c   : > { %2207 = vmatpush.bf16.msra.mxu0 %v2734_v17 }
0x129f   : > { %2148 = vmatpush.bf16.msra.mxu3 %v2735_v56 }
0x12a0   : > { %2208 = vmatpush.bf16.msra.mxu0 %v2736_v15 }
0x12a3   : > { %2149 = vmatpush.bf16.msra.mxu3 %v2737_v12 }
0x12a7   : > { %2150 = vmatpush.bf16.msra.mxu3 %v2738_v3 }
0x12ab   : > { %2151 = vmatpush.bf16.msra.mxu3 %v2739_v30  ;;  %v2749_v30 = vld [vmem:[%s4421_s22] sm:$0xff] }
0x12af   : > { %2152 = vmatpush.bf16.msra.mxu3 %v2740_v53 }
0x12b3   : > { %2153 = vmatpush.bf16.msra.mxu3 %v2741_v47 }
0x130e   : > { %v2039_v48 = vpop.f32.mrf.mxu1  ;;  %v2067_v63 = vpop.f32.mrf.mxu0 }
0x1316   : > { %v2041_v40 = vpop.f32.mrf.mxu1  ;;  %v2069_v10 = vpop.f32.mrf.mxu0 }
0x1319   : > { %v2025_v29 = vpop.f32.mrf.mxu3  ;;  %v2053_v34 = vpop.f32.mrf.mxu2 }
0x131a   : > { %v2026_v41 = vadd.f32 %v2025_v29, %v4471_v45  ;;  %v2054_v13 = vadd.f32 %v2053_v34, %v4472_v46 }
0x131c   : > { %v2040_v5 = vadd.f32 %v2039_v48, %v2026_v41  ;;  %v2068_v35 = vadd.f32 %v2067_v63, %v2054_v13  ;;  %v2750_v63 = vld [vmem:[%s4190_s16] ss:$0 sm:$0xff] }
0x131e   : > { %v2072_v49 = vmax.f32 %v2040_v5, 0.0  ;;  %v2073_v42 = vmax.f32 %v2068_v35, 0.0 }
0x1321   : > { %v2027_v54 = vpop.f32.mrf.mxu3  ;;  %v2055_v61 = vpop.f32.mrf.mxu2 }
0x1322   : > { %v2028_v43 = vadd.f32 %v2027_v54, %v4471_v45  ;;  %v2056_v57 = vadd.f32 %v2055_v61, %v4472_v46  ;;  %v2742_v45 = vld [vmem:[%s4191_s17 + $0x28] sm:$0xff]  ;;  %v2743_v46 = vld [vmem:[%s4191_s17 + $0x20] sm:$0xff] }
0x1323   : > { %v2751_v61 = vld [vmem:[%s4192_s18] ss:$0 sm:$0xff] }
0x1324   : > { %v2042_v58 = vadd.f32 %v2041_v40, %v2028_v43  ;;  %v2070_v44 = vadd.f32 %v2069_v10, %v2056_v57 }
0x1326   : > { %v2074_v31 = vmax.f32 %v2042_v58, 0.0  ;;  %v2075_v37 = vmax.f32 %v2070_v44, 0.0 }
0x1328   : > { %v2076_v2 = vpack.c.bf16 %v2074_v31, %v2072_v49  ;;  %v2077_v39 = vpack.c.bf16 %v2075_v37, %v2073_v42 }
0x132a   : > { %2089 = vmatmul.bf16.vlgmr.msra.gmra.mxu1 %v2076_v2  ;;  %2602 = vmatmul.msk.bf16.vlgmr.msrb.gmra.mxu3 %vm334_vm4, %v2077_v39 }
0x132b   : > { %2117 = vmatmul.bf16.vlgmr.msrb.gmra.mxu0 %v2076_v2  ;;  %2603 = vmatmul.msk.bf16.vlgmr.msrb.gmra.mxu2 %vm334_vm4, %v2077_v39 }
0x132c   : > { %2220 = vmatpush.bf16.msra.mxu1 %v3613_v11  ;;  %v2746_v11 = vld [vmem:[%s4191_s17 + $0x8] sm:$0xff] }
0x1330   : > { %2221 = vmatpush.bf16.msra.mxu1 %v2742_v45 }
0x1334   : > { %2222 = vmatpush.bf16.msra.mxu1 %v2743_v46 }
0x1338   : > { %2223 = vmatpush.bf16.msra.mxu1 %v2744_v25 }
0x133c   : > { %2224 = vmatpush.bf16.msra.mxu1 %v2745_v18 }
0x1340   : > { %2225 = vmatpush.bf16.msra.mxu1 %v2746_v11 }
0x1344   : > { %2226 = vmatpush.bf16.msra.mxu1 %v2747_v14 }
0x13a7   : > { %v2090_v8 = vpop.f32.mrf.mxu1 }
0x13a8   : > { %v2118_v24 = vpop.f32.mrf.mxu0  ;;  %v2091_v23 = vadd.f32 %v2090_v8, %v3561_v1 }
0x13a9   : > { %v2119_v50 = vadd.f32 %v2118_v24, %v3563_v9 }
0x13ad   : > { %v2104_v62 = vpop.f32.mrf.mxu3 }
0x13ae   : > { %v2132_v33 = vpop.f32.mrf.mxu2  ;;  %v2105_v28 = vadd.f32 %v2104_v62, %v2091_v23 }
0x13af   : > { %v2092_v6 = vpop.f32.mrf.mxu1  ;;  %v2133_v22 = vadd.f32 %v2132_v33, %v2119_v50 }
0x13b0   : > { %v2120_v19 = vpop.f32.mrf.mxu0  ;;  %v2093_v36 = vadd.f32 %v2092_v6, %v3561_v1  ;;  %v2137_v7 = vmax.f32 %v2105_v28, 0.0  ;;  %v2748_v1 = vld [vmem:[%s4188_s14] ss:$0 sm:$0xff] }
0x13b1   : > { %v2121_v26 = vadd.f32 %v2120_v19, %v3563_v9  ;;  %v2138_v27 = vmax.f32 %v2133_v22, 0.0 }
0x13b5   : > { %v2106_v32 = vpop.f32.mrf.mxu3 }
0x13b6   : > { %v2107_v38 = vadd.f32 %v2106_v32, %v2093_v36  ;;  %v2134_v52 = vpop.f32.mrf.mxu2 }
0x13b7   : > { %v2135_v59 = vadd.f32 %v2134_v52, %v2121_v26 }
0x13b8   : > { %v2139_v20 = vmax.f32 %v2107_v38, 0.0 }
0x13b9   : > { %v2140_v51 = vmax.f32 %v2135_v59, 0.0 }
0x13ba   : > { %v2141_v4 = vpack.c.bf16 %v2139_v20, %v2137_v7 }
0x13bb   : > { %v2142_v60 = vpack.c.bf16 %v2140_v51, %v2138_v27 }
0x13bc   : > { %2154 = vmatmul.bf16.vlgmr.msra.gmra.mxu3 %v2141_v4 }
0x13bd   : > { %2604 = vmatmul.msk.bf16.vlgmr.msrb.gmra.mxu1 %vm334_vm4, %v2142_v60 }
0x143a   : > { %v2169_v55 = vpop.f32.mrf.mxu1 }
0x143f   : > { %v2155_v21 = vpop.f32.mrf.mxu3 }
0x1440   : > { %v2156_v9 = vadd.f32 %v2748_v1, %v2155_v21 }
0x1442   : > { %v2171_v15 = vpop.f32.mrf.mxu1  ;;  %v2170_v3 = vadd.f32 %v2169_v55, %v2156_v9 }
0x1447   : > { %v2157_v17 = vpop.f32.mrf.mxu3 }
0x1448   : > { %v2158_v56 = vadd.f32 %v2748_v1, %v2157_v17 }
0x144a   : > { %v2172_v12 = vadd.f32 %v2171_v15, %v2158_v56 }
0x144c   : > { %2605 = vmatpush.msk.msra.mxu2 %vm165_vm1, %v2172_v12 }
0x144e   : > { %2192 = vmatpush.msra.mxu2 %v2170_v3 }
0x144f   : > { %2606 = vmatmul.msk.f32.vlgmr.msra.gmra.mxu2 %vm904_vm6, %v2749_v30 }
0x14d2   : > { %v2194_v53 = vpop.f32.mrf.mxu2 }
0x14d3   : > { %v2197_v47 = vpack.c.bf16 %v2194_v53, %v2194_v53 }
0x14d5   : > { %2607 = vmatmul.msk.bf16.vlgmr.msra.gmra.mxu0 %vm964_vm8, %v2197_v47 }
0x1552   : > { %v2210_v48 = vpop.f32.mrf.mxu0 }
0x1553   : > { %v2211_v29 = vadd.f32 %v2750_v63, %v2210_v48 }
0x1555   : > { %v2214_v34 = vmax.f32 %v2211_v29, 0.0 }
0x1557   : > { %v2215_v41 = vpack.c.bf16 %v2214_v34, %v2214_v34 }
0x1559   : > { %2608 = vmatmul.msk.bf16.vlgmr.msra.gmra.mxu1 %vm1043_vm9, %v2215_v41 }
0x155a   : > { %v2212_v13 = vpop.f32.mrf.mxu0 }
0x15d6   : > { %v2228_v54 = vpop.f32.mrf.mxu1 }
0x15d7   : > { %v2229_v5 = vadd.f32 %v2751_v61, %v2228_v54 }
0x15d9   : > { %v2236_v35 = vadd.f32 %v4005_v16, %v2229_v5 }
0x15db   : > { %v2237_v43 = vmul.f32 0.0052083335, %v2236_v35  ;;  %68 = sbr.rel (!%p66_p0) target bundleno = 12 (0xc), region = 103 }
0x15dd   : > { %v2238_v57 = vadd.f32 %v2762_v0, %v2237_v43  }
0x15de   : > { %v2230_v40 = vpop.f32.mrf.mxu1 }
0x15df   : > { %v4585_v0 = vmov %v2238_v57  ;;  %2240 = vst.msk [vmem:[%s4193_s19] sm:$0xff] (%p66_p0), %vm144_vm2, %v2238_v57 }

</bundles_post_ra>
